<compile_context>
chip_gen: v5e
topology: v5e:2x2
jax: 0.10.0
libtpu: 0.0.40
codegen_flags: <defaults>
</compile_context>

<pallas_src>
from functools import partial

import jax
import jax.numpy as jnp
from jax.experimental import pallas as pl
from jax.experimental.pallas import tpu as pltpu

BN_EPS = 1e-3


def _fused_kernel(xse_ref, w1t_ref, b1_ref, x_ref, w2_ref, gamma_ref, beta_ref,
                  out_ref):
    # ---- SE projection as a sublane reduce ----
    # w1t: [C_se, C_mid] fp32, xse: [C_se, 1] fp32 -> s_lin: [1, C_mid] (lane-dense row)
    s_lin = jnp.sum(w1t_ref[...] * xse_ref[...], axis=0, keepdims=True) + b1_ref[...]
    s = jax.nn.sigmoid(s_lin)                                    # [1, C_mid] fp32

    # ---- fold the channel gate into W2's columns (fp32 scale, bf16 cast once) ----
    # w2: [C_out_blk, C_mid] fp32; s broadcasts over rows via stride-0 sublane bcast.
    w2g = (w2_ref[...] * s).astype(jnp.bfloat16)                 # [C_out_blk, C_mid]

    # ---- 1x1 conv (no bias): MXU matmul, bf16 operands, fp32 accumulate ----
    # x: [C_mid, HW] bf16 (consumed directly, no in-kernel pack).
    z = jnp.dot(w2g, x_ref[...],
                preferred_element_type=jnp.float32)              # [C_out_blk, HW] fp32

    # ---- BatchNorm2d, training mode (batch stats over N*H*W == HW; biased var) ----
    # Per-output-channel stats, so the C_out split across cores is exact.
    inv_hw = 1.0 / z.shape[1]
    mean = jnp.sum(z, axis=1, keepdims=True) * inv_hw            # [C_out_blk, 1]
    centered = z - mean                                          # reused for var & out
    var = jnp.sum(centered * centered, axis=1, keepdims=True) * inv_hw
    scale = jax.lax.rsqrt(var + BN_EPS) * gamma_ref[...]         # [C_out_blk, 1]
    out_ref[...] = centered * scale + beta_ref[...]


@partial(jax.jit, static_argnames=("n_split",))
def m_forward(x312, x309, w1, b1, w2, gamma, beta, *, n_split=1):
    """x312: [1, C_se, 1, 1], x309: [1, C_mid, H, W] (NCHW). Returns NCHW [1, C_out, H, W]."""
    B, C_se, _, _ = x312.shape
    _, C_mid, H, W = x309.shape
    C_out = w2.shape[0]
    assert B == 1, "module spec is batch=1 (BN stats over N,H,W collapse to HW)"
    assert C_out % n_split == 0 and (C_out // n_split) % 8 == 0
    HW = H * W
    C_blk = C_out // n_split

    # Layout plumbing: pure reshapes only (NCHW-native), no HBM transposes.
    xse = x312.reshape(C_se, 1).astype(jnp.float32)              # [C_se, 1]
    w1t = w1.reshape(C_mid, C_se).T.astype(jnp.float32)          # [C_se, C_mid] (static weight)
    b1_2d = b1.reshape(1, C_mid).astype(jnp.float32)             # [1, C_mid]
    # bf16 x: should fuse into x309's producer in a real network (stand-in cast here).
    x2d = x309.reshape(C_mid, HW).astype(jnp.bfloat16)           # [C_mid, HW] bf16
    w2_2d = w2.reshape(C_out, C_mid).astype(jnp.float32)         # [C_out, C_mid] fp32
    gamma_2d = gamma.reshape(C_out, 1).astype(jnp.float32)
    beta_2d = beta.reshape(C_out, 1).astype(jnp.float32)

    cost = pl.CostEstimate(
        flops=int(2 * C_out * C_mid * HW + 2 * C_se * C_mid + C_out * C_mid
                  + 6 * C_out * HW),
        transcendentals=int(C_mid + C_out),                      # sigmoid + rsqrt
        bytes_accessed=int(xse.size * 4 + w1t.size * 4 + b1_2d.size * 4
                           + x2d.size * 2 + w2_2d.size * 4
                           + (gamma_2d.size + beta_2d.size) * 4
                           + C_out * HW * 4),
    )

    grid_spec = pltpu.PrefetchScalarGridSpec(
        num_scalar_prefetch=0,
        grid=(n_split,),
        in_specs=[
            pl.BlockSpec((C_se, 1), lambda i: (0, 0)),           # xse  (replicated)
            pl.BlockSpec((C_se, C_mid), lambda i: (0, 0)),       # w1t  (replicated)
            pl.BlockSpec((1, C_mid), lambda i: (0, 0)),          # b1   (replicated)
            pl.BlockSpec((C_mid, HW), lambda i: (0, 0)),         # x    (replicated)
            pl.BlockSpec((C_blk, C_mid), lambda i: (i, 0)),      # w2   (split over C_out)
            pl.BlockSpec((C_blk, 1), lambda i: (i, 0)),          # gamma
            pl.BlockSpec((C_blk, 1), lambda i: (i, 0)),          # beta
        ],
        out_specs=pl.BlockSpec((C_blk, HW), lambda i: (i, 0)),
    )

    z2d = pl.pallas_call(
        _fused_kernel,
        out_shape=jax.ShapeDtypeStruct((C_out, HW), jnp.float32),
        grid_spec=grid_spec,
        compiler_params=pltpu.CompilerParams(dimension_semantics=("parallel",)),
        cost_estimate=cost,
    )(xse, w1t, b1_2d, x2d, w2_2d, gamma_2d, beta_2d)

    return z2d.reshape(B, C_out, H, W)


def m_forward_ref(x312, x309, w1, b1, w2, gamma, beta):
    """Pure-JAX fp32 reference mirroring the PyTorch semantics (training-mode BN)."""
    C_mid, C_se = w1.shape[0], w1.shape[1]
    C_out = w2.shape[0]
    s = jax.nn.sigmoid(
        jnp.einsum('oi,bihw->bohw', w1.reshape(C_mid, C_se), x312)
        + b1[None, :, None, None])
    y = s * x309
    z = jnp.einsum('oi,bihw->bohw', w2.reshape(C_out, C_mid), y)
    mean = z.mean(axis=(0, 2, 3), keepdims=True)
    var = ((z - mean) ** 2).mean(axis=(0, 2, 3), keepdims=True)
    zn = (z - mean) / jnp.sqrt(var + BN_EPS)
    return zn * gamma[None, :, None, None] + beta[None, :, None, None]


def _num_tensorcores():
    """2-way C_out split only on 2-TC chips (v7x); 1 elsewhere (v5e/v6e single TC)."""
    try:
        kind = jax.devices()[0].device_kind.lower()
    except Exception:
        return 1
    return 2 if "v7" in kind else 1


if __name__ == "__main__":
    B, C_se, C_mid, C_out, H, W = 1, 40, 960, 160, 14, 14

    key = jax.random.PRNGKey(0)
    k_xse, k_x, k_w1, k_b1, k_w2 = jax.random.split(key, 5)

    # inputs (match the module's shapes)
    x312 = jax.random.normal(k_xse, (B, C_se, 1, 1), dtype=jnp.float32)
    x309 = jax.random.normal(k_x, (B, C_mid, H, W), dtype=jnp.float32)

    # deterministic parameter init (shapes from the module's __init__)
    w1 = 0.1 * jax.random.normal(k_w1, (C_mid, C_se, 1, 1), dtype=jnp.float32)   # conv2d100 weight
    b1 = 0.1 * jax.random.normal(k_b1, (C_mid,), dtype=jnp.float32)              # conv2d100 bias
    w2 = 0.05 * jax.random.normal(k_w2, (C_out, C_mid, 1, 1), dtype=jnp.float32) # conv2d101 weight
    gamma = jnp.ones((C_out,), dtype=jnp.float32)   # BatchNorm2d default weight
    beta = jnp.zeros((C_out,), dtype=jnp.float32)   # BatchNorm2d default bias

    n_split = _num_tensorcores()
    out = jax.block_until_ready(
        m_forward(x312, x309, w1, b1, w2, gamma, beta, n_split=n_split))
    ref = jax.block_until_ready(m_forward_ref(x312, x309, w1, b1, w2, gamma, beta))

    assert out.shape == (B, C_out, H, W), out.shape
    # Tolerance accounts for bf16 MXU operands (gated W2 and x, fp32 accumulate);
    # sigmoid / gate-fold / BN math is fp32.
    assert jnp.allclose(out, ref, atol=4e-2, rtol=4e-2), float(jnp.max(jnp.abs(out - ref)))
    print("KERNEL_OK")
</pallas_src>

<mosaic_0001>
module attributes {stable_mosaic.version = 11 : i64} {
  func.func @_fused_kernel(%arg0: i32, %arg1: memref<40x1xf32, #tpu.memory_space<vmem>>, %arg2: memref<40x960xf32, #tpu.memory_space<vmem>>, %arg3: memref<1x960xf32, #tpu.memory_space<vmem>>, %arg4: memref<960x196xbf16, #tpu.memory_space<vmem>>, %arg5: memref<160x960xf32, #tpu.memory_space<vmem>>, %arg6: memref<160x1xf32, #tpu.memory_space<vmem>>, %arg7: memref<160x1xf32, #tpu.memory_space<vmem>>, %arg8: memref<160x196xf32, #tpu.memory_space<vmem>>) attributes {dimension_semantics = [#tpu.dimension_semantics<parallel>], iteration_bounds = array<i64: 1>, scalar_prefetch = 0 : i64, scratch_operands = 0 : i64, tpu.core_type = #tpu.core_type<tc>, window_params = [{pipeline_mode = #tpu.pipeline_mode<synchronous>, transform_indices = @transform_0, window_bounds = array<i64: 40, 1>}, {pipeline_mode = #tpu.pipeline_mode<synchronous>, transform_indices = @transform_1, window_bounds = array<i64: 40, 960>}, {pipeline_mode = #tpu.pipeline_mode<synchronous>, transform_indices = @transform_2, window_bounds = array<i64: 1, 960>}, {pipeline_mode = #tpu.pipeline_mode<synchronous>, transform_indices = @transform_3, window_bounds = array<i64: 960, 196>}, {transform_indices = @transform_4, window_bounds = array<i64: 160, 960>}, {transform_indices = @transform_5, window_bounds = array<i64: 160, 1>}, {transform_indices = @transform_6, window_bounds = array<i64: 160, 1>}, {transform_indices = @transform_7, window_bounds = array<i64: 160, 196>}]} {
    %c0 = arith.constant 0 : index
    %c0_0 = arith.constant 0 : index
    %0 = vector.load %arg2[%c0, %c0_0] : memref<40x960xf32, #tpu.memory_space<vmem>>, vector<40x960xf32>
    %c0_1 = arith.constant 0 : index
    %c0_2 = arith.constant 0 : index
    %1 = vector.load %arg1[%c0_1, %c0_2] : memref<40x1xf32, #tpu.memory_space<vmem>>, vector<40x1xf32>
    %2 = vector.broadcast %1 : vector<40x1xf32> to vector<40x960xf32>
    %3 = arith.mulf %0, %2 : vector<40x960xf32>
    %cst = arith.constant dense<0.000000e+00> : vector<960xf32>
    %4 = vector.multi_reduction <add>, %3, %cst [0] : vector<40x960xf32> to vector<960xf32>
    %5 = vector.shape_cast %4 : vector<960xf32> to vector<1x960xf32>
    %c0_3 = arith.constant 0 : index
    %c0_4 = arith.constant 0 : index
    %6 = vector.load %arg3[%c0_3, %c0_4] : memref<1x960xf32, #tpu.memory_space<vmem>>, vector<1x960xf32>
    %7 = arith.addf %5, %6 : vector<1x960xf32>
    %8 = arith.negf %7 : vector<1x960xf32>
    %9 = math.exp %8 : vector<1x960xf32>
    %cst_5 = arith.constant 1.000000e+00 : f32
    %10 = vector.broadcast %cst_5 : f32 to vector<1x960xf32>
    %11 = arith.addf %10, %9 : vector<1x960xf32>
    %12 = arith.divf %10, %11 : vector<1x960xf32>
    %c0_6 = arith.constant 0 : index
    %c0_7 = arith.constant 0 : index
    %13 = vector.load %arg5[%c0_6, %c0_7] : memref<160x960xf32, #tpu.memory_space<vmem>>, vector<160x960xf32>
    %14 = vector.broadcast %12 : vector<1x960xf32> to vector<160x960xf32>
    %15 = arith.mulf %13, %14 : vector<160x960xf32>
    %16 = arith.truncf %15 : vector<160x960xf32> to vector<160x960xbf16>
    %c0_8 = arith.constant 0 : index
    %c0_9 = arith.constant 0 : index
    %17 = vector.load %arg4[%c0_8, %c0_9] : memref<960x196xbf16, #tpu.memory_space<vmem>>, vector<960x196xbf16>
    %cst_10 = arith.constant dense<0.000000e+00> : vector<160x196xf32>
    %18 = tpu.matmul %16, %17, %cst_10 {dimension_numbers = #tpu.dot_dimension_numbers<[1], [0], [0], [1], [0, 0, 1, 1], [], []>} : vector<160x960xbf16>, vector<960x196xbf16>, vector<160x196xf32> -> vector<160x196xf32>
    %cst_11 = arith.constant dense<0.000000e+00> : vector<160xf32>
    %19 = vector.multi_reduction <add>, %18, %cst_11 [1] : vector<160x196xf32> to vector<160xf32>
    %20 = vector.shape_cast %19 : vector<160xf32> to vector<160x1xf32>
    %cst_12 = arith.constant 0.00510204071 : f32
    %21 = vector.broadcast %cst_12 : f32 to vector<160x1xf32>
    %22 = arith.mulf %20, %21 : vector<160x1xf32>
    %23 = vector.broadcast %22 : vector<160x1xf32> to vector<160x196xf32>
    %24 = arith.subf %18, %23 : vector<160x196xf32>
    %25 = arith.mulf %24, %24 : vector<160x196xf32>
    %cst_13 = arith.constant dense<0.000000e+00> : vector<160xf32>
    %26 = vector.multi_reduction <add>, %25, %cst_13 [1] : vector<160x196xf32> to vector<160xf32>
    %27 = vector.shape_cast %26 : vector<160xf32> to vector<160x1xf32>
    %cst_14 = arith.constant 0.00510204071 : f32
    %28 = vector.broadcast %cst_14 : f32 to vector<160x1xf32>
    %29 = arith.mulf %27, %28 : vector<160x1xf32>
    %cst_15 = arith.constant 1.000000e-03 : f32
    %30 = vector.broadcast %cst_15 : f32 to vector<160x1xf32>
    %31 = arith.addf %29, %30 : vector<160x1xf32>
    %32 = math.rsqrt %31 : vector<160x1xf32>
    %c0_16 = arith.constant 0 : index
    %c0_17 = arith.constant 0 : index
    %33 = vector.load %arg6[%c0_16, %c0_17] : memref<160x1xf32, #tpu.memory_space<vmem>>, vector<160x1xf32>
    %34 = arith.mulf %32, %33 : vector<160x1xf32>
    %35 = vector.broadcast %34 : vector<160x1xf32> to vector<160x196xf32>
    %36 = arith.mulf %24, %35 : vector<160x196xf32>
    %c0_18 = arith.constant 0 : index
    %c0_19 = arith.constant 0 : index
    %37 = vector.load %arg7[%c0_18, %c0_19] : memref<160x1xf32, #tpu.memory_space<vmem>>, vector<160x1xf32>
    %38 = vector.broadcast %37 : vector<160x1xf32> to vector<160x196xf32>
    %39 = arith.addf %36, %38 : vector<160x196xf32>
    %c0_20 = arith.constant 0 : index
    %c0_21 = arith.constant 0 : index
    %40 = vector.load %arg8[%c0_20, %c0_21] : memref<160x196xf32, #tpu.memory_space<vmem>>, vector<160x196xf32>
    tpu.vector_store %arg8[%c0_20, %c0_21], %39 {strides = array<i32>} : memref<160x196xf32, #tpu.memory_space<vmem>>, vector<160x196xf32>,
    return
  }
  func.func @transform_0(%arg0: i32) -> (i32, i32) {
    %c0_i32 = arith.constant 0 : i32
    %c0_i32_0 = arith.constant 0 : i32
    %c0_i32_1 = arith.constant 0 : i32
    return %c0_i32, %c0_i32_0 : i32, i32
  }
  func.func @transform_1(%arg0: i32) -> (i32, i32) {
    %c0_i32 = arith.constant 0 : i32
    %c0_i32_0 = arith.constant 0 : i32
    %c0_i32_1 = arith.constant 0 : i32
    return %c0_i32, %c0_i32_0 : i32, i32
  }
  func.func @transform_2(%arg0: i32) -> (i32, i32) {
    %c0_i32 = arith.constant 0 : i32
    %c0_i32_0 = arith.constant 0 : i32
    %c0_i32_1 = arith.constant 0 : i32
    return %c0_i32, %c0_i32_0 : i32, i32
  }
  func.func @transform_3(%arg0: i32) -> (i32, i32) {
    %c0_i32 = arith.constant 0 : i32
    %c0_i32_0 = arith.constant 0 : i32
    %c0_i32_1 = arith.constant 0 : i32
    return %c0_i32, %c0_i32_0 : i32, i32
  }
  func.func @transform_4(%arg0: i32) -> (i32, i32) {
    %c0_i32 = arith.constant 0 : i32
    %c0_i32_0 = arith.constant 0 : i32
    return %arg0, %c0_i32 : i32, i32
  }
  func.func @transform_5(%arg0: i32) -> (i32, i32) {
    %c0_i32 = arith.constant 0 : i32
    %c0_i32_0 = arith.constant 0 : i32
    return %arg0, %c0_i32 : i32, i32
  }
  func.func @transform_6(%arg0: i32) -> (i32, i32) {
    %c0_i32 = arith.constant 0 : i32
    %c0_i32_0 = arith.constant 0 : i32
    return %arg0, %c0_i32 : i32, i32
  }
  func.func @transform_7(%arg0: i32) -> (i32, i32) {
    %c0_i32 = arith.constant 0 : i32
    %c0_i32_0 = arith.constant 0 : i32
    return %arg0, %c0_i32 : i32, i32
  }
}

</mosaic_0001>

<bundles_post_ra>
// kernel: m_forward.1
= control target key start
LH: loop header
LB: loop body
LE: loop exit
PB: predicated region body
PF: predicated region fallthrough
CT: control target
= control target key end

     0   :  { %v4092_v0 = vmov 0   ;;  %vm207_vm0 = vcmask 523264   ;;  %s7159_s0 = inlined_call_operand.vmem [shape: f32[40,1], index: 0, kind: input, shape index: {}]   ;;  %s7160_s6 = inlined_call_operand.vmem [shape: f32[160,1], index: 6, kind: input, shape index: {}]   ;;  %s7161_s1 = inlined_call_operand.vmem [shape: f32[40,960], index: 1, kind: input, shape index: {}]   ;;  %s7162_s2 = inlined_call_operand.vmem [shape: f32[1,960], index: 2, kind: input, shape index: {}]   ;;  %s7163_s3 = inlined_call_operand.vmem [shape: bf16[960,196], index: 3, kind: input, shape index: {}]   ;;  %s7164_s4 = inlined_call_operand.vmem [shape: f32[160,960], index: 4, kind: input, shape index: {}]   ;;  %s7165_s5 = inlined_call_operand.vmem [shape: f32[160,1], index: 5, kind: input, shape index: {}]   ;;  %s7166_s7 = inlined_call_operand.vmem [shape: f32[160,196], index: 7, kind: output, shape index: {}]  }
   0x1   :  { %4019 = vset.pattern.permute.xlu2 %v4092_v0  ;;  %4018 = vset.pattern.permute.xlu1 %v4092_v0  ;;  %v71_v1 = vld [vmem:[%s7159_s0 + $0x20] sm:$0xff]  ;;  %v69_v2 = vld [vmem:[%s7159_s0 + $0x10] sm:$0xff]  ;;  %v70_v5 = vld [vmem:[%s7159_s0 + $0x18] sm:$0xff] }
   0x2   :  { %v67_v3 = vld [vmem:[%s7159_s0] sm:$0xff]  ;;  %4017 = vset.pattern.permute.xlu0 %v4092_v0  ;;  %94 = vperm.xlu2 %4019, %v71_v1   ;;  %v3186_v4 = vld [vmem:[%s7160_s6 + $0x10] sm:$0xff]  ;;  %v68_v6 = vld [vmem:[%s7159_s0 + $0x8] sm:$0xff] }
   0x3   :  { %84 = vperm.xlu1 %4018, %v69_v2   ;;  %74 = vperm.xlu0 %4017, %v67_v3   ;;  %v3189_v7 = vld [vmem:[%s7160_s6 + $0x28] sm:$0xff]  ;;  %v3184_v8 = vld [vmem:[%s7160_s6] sm:$0xff]  ;;  %v3187_v11 = vld [vmem:[%s7160_s6 + $0x18] sm:$0xff] }
   0x4   :  { %v3185_v9 = vld [vmem:[%s7160_s6 + $0x8] sm:$0xff]  ;;  %v3192_v10 = vld [vmem:[%s7160_s6 + $0x40] sm:$0xff]  ;;  %v3195_v13 = vld [vmem:[%s7160_s6 + $0x58] sm:$0xff] }
   0x5   :  { %v3188_v12 = vld [vmem:[%s7160_s6 + $0x20] sm:$0xff]  ;;  %v3190_v14 = vld [vmem:[%s7160_s6 + $0x30] sm:$0xff]  ;;  %v3191_v15 = vld [vmem:[%s7160_s6 + $0x38] sm:$0xff] }
   0x6   :  { %v3198_v16 = vld [vmem:[%s7160_s6 + $0x70] sm:$0xff]  ;;  %v3193_v17 = vld [vmem:[%s7160_s6 + $0x48] sm:$0xff]  ;;  %v3196_v19 = vld [vmem:[%s7160_s6 + $0x60] sm:$0xff] }
   0x7   :  { %v3194_v18 = vld [vmem:[%s7160_s6 + $0x50] sm:$0xff]  ;;  %v3197_v20 = vld [vmem:[%s7160_s6 + $0x68] sm:$0xff]  ;;  %v3199_v21 = vld [vmem:[%s7160_s6 + $0x78] sm:$0xff] }
   0x8   :  { %v3200_v22 = vld [vmem:[%s7160_s6 + $0x80] sm:$0xff]  ;;  %v66_v23 = vld [vmem:[%s7161_s1 + $0x138] sm:$0xff]  ;;  %v60_v25 = vld [vmem:[%s7161_s1 + $0x108] sm:$0xff] }
   0x9   :  { %v59_v24 = vld [vmem:[%s7161_s1 + $0x100] sm:$0xff]  ;;  %v61_v26 = vld [vmem:[%s7161_s1 + $0x110] sm:$0xff]  ;;  %v62_v28 = vld [vmem:[%s7161_s1 + $0x118] sm:$0xff] }
   0xa   :  { %3216 = vperm.xlu2 %4019, %v3186_v4   ;;  %v63_v29 = vld [vmem:[%s7161_s1 + $0x120] sm:$0xff]  ;;  %v64_v30 = vld [vmem:[%s7161_s1 + $0x128] sm:$0xff]  ;;  %v65_v32 = vld [vmem:[%s7161_s1 + $0x130] sm:$0xff] }
   0xb   :  { %89 = vperm.xlu1 %4018, %v70_v5   ;;  %79 = vperm.xlu0 %4017, %v68_v6   ;;  %v43_v33 = vld [vmem:[%s7161_s1 + $0x80] sm:$0xff]  ;;  %v44_v37 = vld [vmem:[%s7161_s1 + $0x88] sm:$0xff]  ;;  %v45_v38 = vld [vmem:[%s7161_s1 + $0x90] sm:$0xff] }
   0xc   :  { %v4229_v34 = vld [vmem:[%s7162_s2] sm:$0xff]  ;;  %v50_v39 = vld [vmem:[%s7161_s1 + $0xb8] sm:$0xff]  ;;  %v48_v48 = vld [vmem:[%s7161_s1 + $0xa8] sm:$0xff] }
   0xd   :  { %v46_v46 = vld [vmem:[%s7161_s1 + $0x98] sm:$0xff]  ;;  %v47_v47 = vld [vmem:[%s7161_s1 + $0xa0] sm:$0xff]  ;;  %v49_v51 = vld [vmem:[%s7161_s1 + $0xb0] sm:$0xff]  ;;  %v225_v54 = vperm.slane %v4229_v34, 0  ;;  %v226_v55 = vperm.slane %v4229_v34, 1  ;;  %v227_v60 = vperm.slane %v4229_v34, 2 }
   0xe   :  { %v27_v52 = vld [vmem:[%s7161_s1] sm:$0xff]  ;;  %v34_v53 = vld [vmem:[%s7161_s1 + $0x38] sm:$0xff]  ;;  %v28_v57 = vld [vmem:[%s7161_s1 + $0x8] sm:$0xff]  ;;  %v228_v61 = vperm.slane %v4229_v34, 3 }
   0xf   :  { %v29_v58 = vld [vmem:[%s7161_s1 + $0x10] sm:$0xff]  ;;  %v30_v59 = vld [vmem:[%s7161_s1 + $0x18] sm:$0xff]  ;;  %v31_v0 = vld [vmem:[%s7161_s1 + $0x20] sm:$0xff] }
  0x10   :  { %v32_v1 = vld [vmem:[%s7161_s1 + $0x28] sm:$0xff]  ;;  %v33_v2 = vld [vmem:[%s7161_s1 + $0x30] sm:$0xff] }
  0x12   :  { %3231 = vperm.xlu2 %4019, %v3189_v7  }
  0x13   :  { %3206 = vperm.xlu1 %4018, %v3184_v8   ;;  %3211 = vperm.xlu0 %4017, %v3185_v9  }
  0x1a   :  { %3246 = vperm.xlu2 %4019, %v3192_v10   ;;  %v51_v10 = vld [vmem:[%s7161_s1 + $0xc0] sm:$0xff] }
  0x1b   :  { %3221 = vperm.xlu1 %4018, %v3187_v11   ;;  %3226 = vperm.xlu0 %4017, %v3188_v12   ;;  %v52_v11 = vld [vmem:[%s7161_s1 + $0xc8] sm:$0xff]  ;;  %v53_v12 = vld [vmem:[%s7161_s1 + $0xd0] sm:$0xff] }
  0x22   :  { %3261 = vperm.xlu2 %4019, %v3195_v13  }
  0x23   :  { %3236 = vperm.xlu1 %4018, %v3190_v14   ;;  %3241 = vperm.xlu0 %4017, %v3191_v15  }
  0x2a   :  { %3276 = vperm.xlu2 %4019, %v3198_v16  }
  0x2b   :  { %3251 = vperm.xlu1 %4018, %v3193_v17   ;;  %3256 = vperm.xlu0 %4017, %v3194_v18   ;;  %v54_v17 = vld [vmem:[%s7161_s1 + $0xd8] sm:$0xff]  ;;  %v55_v18 = vld [vmem:[%s7161_s1 + $0xe0] sm:$0xff] }
  0x33   :  { %3266 = vperm.xlu1 %4018, %v3196_v19   ;;  %3271 = vperm.xlu0 %4017, %v3197_v20   ;;  %v56_v19 = vld [vmem:[%s7161_s1 + $0xe8] sm:$0xff] }
  0x3b   :  { %3281 = vperm.xlu1 %4018, %v3199_v21   ;;  %3286 = vperm.xlu0 %4017, %v3200_v22  }
  0x5c   :  { %v95_v27 = vpop.permute.xlu2 %94 }
  0x5d   :  { %v136_v31 = vmul.f32 %v95_v27, %v66_v23  ;;  %v4231_v35 = vmul.f32 %v95_v27, %v59_v24  ;;  %v4233_v36 = vmul.f32 %v95_v27, %v60_v25  ;;  %v4244_v42 = vmul.f32 %v95_v27, %v61_v26  ;;  %v57_v24 = vld [vmem:[%s7161_s1 + $0xf0] sm:$0xff]  ;;  %v58_v25 = vld [vmem:[%s7161_s1 + $0xf8] sm:$0xff]  ;;  %v35_v26 = vld [vmem:[%s7161_s1 + $0x40] sm:$0xff] }
  0x5e   :  { %v4246_v43 = vmul.f32 %v95_v27, %v62_v28  ;;  %v4248_v44 = vmul.f32 %v95_v27, %v63_v29  ;;  %v4250_v45 = vmul.f32 %v95_v27, %v64_v30  ;;  %v4261_v49 = vmul.f32 %v95_v27, %v65_v32  ;;  %v36_v32 = vld [vmem:[%s7161_s1 + $0x48] sm:$0xff] }
  0x5f   :  { %v4264_v50 = vsel %vm207_vm0, %v136_v31, 0.0 }
  0x75   :  { %v85_v40 = vpop.permute.xlu1 %84  ;;  %v75_v41 = vpop.permute.xlu0 %74 }
  0x76   :  { %v120_v56 = vmul.f32 %v85_v40, %v50_v39  ;;  %v4289_v63 = vmul.f32 %v85_v40, %v43_v33  ;;  %v114_v6 = vmul.f32 %v85_v40, %v44_v37  ;;  %v115_v7 = vmul.f32 %v85_v40, %v45_v38  ;;  %v37_v33 = vld [vmem:[%s7161_s1 + $0x50] sm:$0xff]  ;;  %v38_v37 = vld [vmem:[%s7161_s1 + $0x58] sm:$0xff] }
  0x77   :  { %v116_v8 = vmul.f32 %v85_v40, %v46_v46  ;;  %v104_v9 = vmul.f32 %v75_v41, %v34_v53  ;;  %v117_v13 = vmul.f32 %v85_v40, %v47_v47  ;;  %v118_v14 = vmul.f32 %v85_v40, %v48_v48  ;;  %v39_v47 = vld [vmem:[%s7161_s1 + $0x60] sm:$0xff]  ;;  %v40_v48 = vld [vmem:[%s7161_s1 + $0x68] sm:$0xff] }
  0x78   :  { %v119_v15 = vmul.f32 %v85_v40, %v49_v51  ;;  %v97_v16 = vmul.f32 %v75_v41, %v27_v52  ;;  %v4322_v20 = vsel %vm207_vm0, %v120_v56, 0.0  ;;  %v98_v21 = vmul.f32 %v75_v41, %v28_v57  ;;  %v41_v51 = vld [vmem:[%s7161_s1 + $0x70] sm:$0xff] }
  0x79   :  { %v99_v22 = vmul.f32 %v75_v41, %v29_v58  ;;  %v100_v23 = vmul.f32 %v75_v41, %v30_v59  ;;  %v101_v27 = vmul.f32 %v75_v41, %v31_v0  ;;  %v102_v28 = vmul.f32 %v75_v41, %v32_v1  ;;  %v42_v58 = vld [vmem:[%s7161_s1 + $0x78] sm:$0xff] }
  0x7a   :  { %v103_v29 = vmul.f32 %v75_v41, %v33_v2  ;;  %v208_v30 = vsel %vm207_vm0, %v104_v9, 0.0 }
  0x7d   :  { %v90_v31 = vpop.permute.xlu1 %89  ;;  %v80_v38 = vpop.permute.xlu0 %79 }
  0x7e   :  { %v121_v39 = vmul.f32 %v90_v31, %v51_v10  ;;  %v122_v40 = vmul.f32 %v90_v31, %v52_v11  ;;  %v123_v46 = vmul.f32 %v90_v31, %v53_v12  ;;  %v124_v41 = vmul.f32 %v90_v31, %v54_v17 }
  0x7f   :  { %v125_v52 = vmul.f32 %v90_v31, %v55_v18  ;;  %v126_v53 = vmul.f32 %v90_v31, %v56_v19  ;;  %v127_v56 = vmul.f32 %v90_v31, %v57_v24  ;;  %v128_v57 = vmul.f32 %v90_v31, %v58_v25 }
  0x80   :  { %v105_v59 = vmul.f32 %v80_v38, %v35_v26  ;;  %v106_v0 = vmul.f32 %v80_v38, %v36_v32  ;;  %v107_v1 = vmul.f32 %v80_v38, %v37_v33  ;;  %v108_v2 = vmul.f32 %v80_v38, %v38_v37 }
  0x81   :  { %v213_v9 = vsel %vm207_vm0, %v128_v57, 0.0  ;;  %v109_v10 = vmul.f32 %v80_v38, %v39_v47  ;;  %v110_v11 = vmul.f32 %v80_v38, %v40_v48  ;;  %v111_v12 = vmul.f32 %v80_v38, %v41_v51 }
  0x82   :  { %v112_v17 = vmul.f32 %v80_v38, %v42_v58  ;;  %v137_v5 = vadd.f32 %v105_v59, %v97_v16  ;;  %v147_v4 = vadd.f32 %v106_v0, %v98_v21  ;;  %v157_v18 = vadd.f32 %v107_v1, %v99_v22 }
  0x83   :  { %v167_v19 = vadd.f32 %v108_v2, %v100_v23  ;;  %v177_v24 = vadd.f32 %v109_v10, %v101_v27  ;;  %v187_v25 = vadd.f32 %v110_v11, %v102_v28  ;;  %v197_v31 = vadd.f32 %v111_v12, %v103_v29 }
  0x84   :  { %v138_v3 = vadd.f32 %v137_v5, %v4289_v63  ;;  %v148_v62 = vadd.f32 %v147_v4, %v114_v6  ;;  %v158_v26 = vadd.f32 %v157_v18, %v115_v7  ;;  %v209_v32 = vsel %vm207_vm0, %v112_v17, 0.0 }
  0x85   :  { %v168_v33 = vadd.f32 %v167_v19, %v116_v8  ;;  %v178_v37 = vadd.f32 %v177_v24, %v117_v13  ;;  %v188_v57 = vadd.f32 %v187_v25, %v118_v14  ;;  %v198_v47 = vadd.f32 %v197_v31, %v119_v15 }
  0x86   :  { %v139_v48 = vadd.f32 %v138_v3, %v121_v39  ;;  %v149_v51 = vadd.f32 %v148_v62, %v122_v40  ;;  %v159_v38 = vadd.f32 %v158_v26, %v123_v46  ;;  %v210_v16 = vadd.f32 %v209_v32, %v208_v30 }
  0x87   :  { %v169_v21 = vadd.f32 %v168_v33, %v124_v41  ;;  %v179_v22 = vadd.f32 %v178_v37, %v125_v52  ;;  %v189_v23 = vadd.f32 %v188_v57, %v126_v53  ;;  %v199_v27 = vadd.f32 %v198_v47, %v127_v56 }
  0x88   :  { %v140_v28 = vadd.f32 %v139_v48, %v4231_v35  ;;  %v150_v63 = vadd.f32 %v149_v51, %v4233_v36  ;;  %v160_v4 = vadd.f32 %v159_v38, %v4244_v42  ;;  %v212_v5 = vadd.f32 %v4322_v20, %v210_v16  ;;  %v3454_v51 = vld [vmem:[%s7163_s3 + $0x70] sm:$0xf] }
  0x89   :  { %v170_v6 = vadd.f32 %v169_v21, %v4246_v43  ;;  %v180_v7 = vadd.f32 %v179_v22, %v4248_v44  ;;  %v190_v62 = vadd.f32 %v189_v23, %v4250_v45  ;;  %v200_v3 = vadd.f32 %v199_v27, %v4261_v49  ;;  %v3911_v23 = vld [vmem:[%s7163_s3 + $0x74] sm:$0xf0]  ;;  %v3518_v27 = vld [vmem:[%s7163_s3 + $0xf0] sm:$0xf] }
  0x8a   :  { %v141_v8 = vrot.slane %v140_v28, 4  ;;  %v151_v13 = vrot.slane %v150_v63, 4  ;;  %v161_v14 = vrot.slane %v160_v4, 4  ;;  %v214_v15 = vadd.f32 %v213_v9, %v212_v5 }
  0x8b   :  { %v171_v29 = vrot.slane %v170_v6, 4  ;;  %v181_v35 = vrot.slane %v180_v7, 4  ;;  %v191_v30 = vrot.slane %v190_v62, 4  ;;  %v201_v36 = vrot.slane %v200_v3, 4 }
  0x8c   :  { %v142_v39 = vadd.f32 %v141_v8, %v140_v28  ;;  %v152_v42 = vadd.f32 %v151_v13, %v150_v63  ;;  %v162_v40 = vadd.f32 %v161_v14, %v160_v4  ;;  %v216_v20 = vadd.f32 %v4264_v50, %v214_v15  ;;  %v3927_v28 = vld [vmem:[%s7163_s3 + $0xf4] sm:$0xf0] }
  0x8d   :  { %v172_v43 = vadd.f32 %v171_v29, %v170_v6  ;;  %v182_v46 = vadd.f32 %v181_v35, %v180_v7  ;;  %v192_v44 = vadd.f32 %v191_v30, %v190_v62  ;;  %v202_v41 = vadd.f32 %v201_v36, %v200_v3  ;;  %v3582_v7 = vld [vmem:[%s7163_s3 + $0x170] sm:$0xf]  ;;  %v3943_v62 = vld [vmem:[%s7163_s3 + $0x174] sm:$0xf0]  ;;  %v3446_v35 = vld [vmem:[%s7163_s3 + $0x60] sm:$0xf] }
  0x8e   :  { %v143_v45 = vrot.slane %v142_v39, 2  ;;  %v153_v52 = vrot.slane %v152_v42, 2  ;;  %v163_v49 = vrot.slane %v162_v40, 2  ;;  %v217_v53 = vrot.slane %v216_v20, 4  ;;  %v3646_v3 = vld [vmem:[%s7163_s3 + $0x1f0] sm:$0xf] }
  0x8f   :  { %v173_v56 = vrot.slane %v172_v43, 2  ;;  %v183_v58 = vrot.slane %v182_v46, 2  ;;  %v193_v59 = vrot.slane %v192_v44, 2  ;;  %v203_v0 = vrot.slane %v202_v41, 2  ;;  %v3510_v30 = vld [vmem:[%s7163_s3 + $0xe0] sm:$0xf] }
  0x90   :  { %v144_v1 = vadd.f32 %v143_v45, %v142_v39  ;;  %v154_v2 = vadd.f32 %v153_v52, %v152_v42  ;;  %v164_v9 = vadd.f32 %v163_v49, %v162_v40  ;;  %v218_v10 = vadd.f32 %v217_v53, %v216_v20  ;;  %v3941_v49 = vld [vmem:[%s7163_s3 + $0x164] sm:$0xf0]  ;;  %v3638_v53 = vld [vmem:[%s7163_s3 + $0x1e0] sm:$0xf] }
  0x91   :  { %v174_v11 = vadd.f32 %v173_v56, %v172_v43  ;;  %v184_v12 = vadd.f32 %v183_v58, %v182_v46  ;;  %v194_v17 = vadd.f32 %v193_v59, %v192_v44  ;;  %v204_v50 = vadd.f32 %v203_v0, %v202_v41  ;;  %v3925_v46 = vld [vmem:[%s7163_s3 + $0xe4] sm:$0xf0]  ;;  %v3574_v44 = vld [vmem:[%s7163_s3 + $0x160] sm:$0xf] }
  0x92   :  { %v145_v18 = vrot.slane %v144_v1, 1  ;;  %v155_v19 = vrot.slane %v154_v2, 1  ;;  %v165_v24 = vrot.slane %v164_v9, 1  ;;  %v219_v25 = vrot.slane %v218_v10, 2  ;;  %v3957_v56 = vld [vmem:[%s7163_s3 + $0x1e4] sm:$0xf0] }
  0x93   :  { %v175_v31 = vrot.slane %v174_v11, 1  ;;  %v185_v26 = vrot.slane %v184_v12, 1  ;;  %v195_v32 = vrot.slane %v194_v17, 1  ;;  %v205_v33 = vrot.slane %v204_v50, 1 }
  0x94   :  { %v146_v37 = vadd.f32 %v145_v18, %v144_v1  ;;  %v156_v57 = vadd.f32 %v155_v19, %v154_v2  ;;  %v166_v47 = vadd.f32 %v165_v24, %v164_v9  ;;  %v220_v48 = vadd.f32 %v219_v25, %v218_v10  ;;  %v3438_v1 = vld [vmem:[%s7163_s3 + $0x50] sm:$0xf]  ;;  %v3907_v2 = vld [vmem:[%s7163_s3 + $0x54] sm:$0xf0]  ;;  %v3430_v25 = vld [vmem:[%s7163_s3 + $0x40] sm:$0xf] }
  0x95   :  { %v176_v38 = vadd.f32 %v175_v31, %v174_v11  ;;  %v186_v16 = vadd.f32 %v185_v26, %v184_v12  ;;  %v196_v21 = vadd.f32 %v195_v32, %v194_v17  ;;  %v206_v22 = vadd.f32 %v205_v33, %v204_v50  ;;  %v3502_v11 = vld [vmem:[%s7163_s3 + $0xd0] sm:$0xf]  ;;  %v3923_v12 = vld [vmem:[%s7163_s3 + $0xd4] sm:$0xf0]  ;;  %v3905_v32 = vld [vmem:[%s7163_s3 + $0x44] sm:$0xf0] }
  0x96   :  { %v221_v63 = vrot.slane %v220_v48, 1  ;;  %v241_v4 = vadd.f32 %v225_v54, %v146_v37  ;;  %v242_v5 = vadd.f32 %v226_v55, %v156_v57  ;;  %v243_v6 = vadd.f32 %v227_v60, %v166_v47  ;;  %v3959_v54 = vld [vmem:[%s7163_s3 + $0x1f4] sm:$0xf0]  ;;  %v3566_v17 = vld [vmem:[%s7163_s3 + $0x150] sm:$0xf] }
  0x97   :  { %v244_v55 = vadd.f32 %v228_v61, %v176_v38  ;;  %v7239_v60 = vperm.slane %v4229_v34, 4  ;;  %v7240_v13 = vperm.slane %v4229_v34, 5  ;;  %v7241_v15 = vperm.slane %v4229_v34, 6  ;;  %v3909_v61 = vld [vmem:[%s7163_s3 + $0x64] sm:$0xf0] }
  0x98   :  { %v222_v36 = vadd.f32 %v221_v63, %v220_v48  ;;  %v3388_v39 = vmul.f32 -1.442695, %v241_v4  ;;  %v3389_v42 = vmul.f32 -1.442695, %v242_v5  ;;  %v3390_v40 = vmul.f32 -1.442695, %v243_v6 }
  0x99   :  { %v4401_v8 = vadd.f32 %v7239_v60, %v186_v16  ;;  %v4405_v14 = vadd.f32 %v7240_v13, %v196_v21  ;;  %v4409_v29 = vadd.f32 %v7241_v15, %v206_v22  ;;  %v3391_v20 = vmul.f32 -1.442695, %v244_v55  ;;  %v3939_v50 = vld [vmem:[%s7163_s3 + $0x154] sm:$0xf0]  ;;  %v3630_v18 = vld [vmem:[%s7163_s3 + $0x1d0] sm:$0xf] }
  0x9a   :  { %v3455_v43 = vor.u32 %v3911_v23, %v3454_v51  ;;  %v7242_v41 = vperm.slane %v4229_v34, 7  ;;  %4020 = vpow2.f32 %v3388_v39  ;;  %v3519_v52 = vor.u32 %v3927_v28, %v3518_v27  ;;  %v3955_v19 = vld [vmem:[%s7163_s3 + $0x1d4] sm:$0xf0]  ;;  %v3494_v33 = vld [vmem:[%s7163_s3 + $0xc0] sm:$0xf] }
  0x9b   :  { %4022 = vpow2.f32 %v3389_v42  ;;  %v3583_v58 = vor.u32 %v3943_v62, %v3582_v7  ;;  %v3647_v34 = vor.u32 %v3959_v54, %v3646_v3  ;;  %v3447_v59 = vor.u32 %v3909_v61, %v3446_v35  ;;  %v3921_v37 = vld [vmem:[%s7163_s3 + $0xc4] sm:$0xf0]  ;;  %v3558_v38 = vld [vmem:[%s7163_s3 + $0x140] sm:$0xf]  ;;  %v3422_v7 = vld [vmem:[%s7163_s3 + $0x30] sm:$0xf] }
  0x9c   :  { %v4428_v45 = vadd.f32 %v7242_v41, %v222_v36  ;;  %1559 = vmatpush.bf16.msra.mxu0 %v3455_v43  ;;  %4024 = vpow2.f32 %v3390_v40  ;;  %1618 = vmatpush.bf16.msra.mxu1 %v3519_v52  ;;  %v3511_v0 = vor.u32 %v3925_v46, %v3510_v30  ;;  %v3575_v9 = vor.u32 %v3941_v49, %v3574_v44  ;;  %v3937_v16 = vld [vmem:[%s7163_s3 + $0x144] sm:$0xf0]  ;;  %v3622_v23 = vld [vmem:[%s7163_s3 + $0x1c0] sm:$0xf]  ;;  %v3903_v62 = vld [vmem:[%s7163_s3 + $0x34] sm:$0xf0] }
  0x9d   :  { %4026 = vpow2.f32 %v3391_v20  ;;  %1677 = vmatpush.bf16.msra.mxu2 %v3583_v58  ;;  %1736 = vmatpush.bf16.msra.mxu3 %v3647_v34  ;;  %v3639_v10 = vor.u32 %v3957_v56, %v3638_v53  ;;  %v3439_v24 = vor.u32 %v3907_v2, %v3438_v1  ;;  %v3503_v26 = vor.u32 %v3923_v12, %v3502_v11  ;;  %v3953_v27 = vld [vmem:[%s7163_s3 + $0x1c4] sm:$0xf0]  ;;  %v3486_v55 = vld [vmem:[%s7163_s3 + $0xb0] sm:$0xf]  ;;  %v3919_v60 = vld [vmem:[%s7163_s3 + $0xb4] sm:$0xf0] }
  0x9e   :  { %v3567_v48 = vor.u32 %v3939_v50, %v3566_v17  ;;  %v3631_v51 = vor.u32 %v3955_v19, %v3630_v18  ;;  %v3431_v4 = vor.u32 %v3905_v32, %v3430_v25  ;;  %v3495_v6 = vor.u32 %v3921_v37, %v3494_v33  ;;  %v3550_v13 = vld [vmem:[%s7163_s3 + $0x130] sm:$0xf]  ;;  %v3935_v15 = vld [vmem:[%s7163_s3 + $0x134] sm:$0xf0]  ;;  %v3414_v37 = vld [vmem:[%s7163_s3 + $0x20] sm:$0xf] }
  0x9f   :  { %v3559_v3 = vor.u32 %v3937_v16, %v3558_v38  ;;  %v3623_v54 = vor.u32 %v3953_v27, %v3622_v23  ;;  %v3614_v35 = vld [vmem:[%s7163_s3 + $0x1b0] sm:$0xf]  ;;  %v3951_v61 = vld [vmem:[%s7163_s3 + $0x1b4] sm:$0xf0]  ;;  %v3423_v30 = vor.u32 %v3903_v62, %v3422_v7  ;;  %v3487_v36 = vor.u32 %v3919_v60, %v3486_v55  ;;  %v3478_v16 = vld [vmem:[%s7163_s3 + $0xa0] sm:$0xf] }
  0xa0   :  { %1560 = vmatpush.bf16.msra.mxu0 %v3447_v59  ;;  %v4021_v31 = vpop.eup %4020  ;;  %1619 = vmatpush.bf16.msra.mxu1 %v3511_v0  ;;  %v3551_v42 = vor.u32 %v3935_v15, %v3550_v13  ;;  %v3615_v40 = vor.u32 %v3951_v61, %v3614_v35  ;;  %v3933_v23 = vld [vmem:[%s7163_s3 + $0x124] sm:$0xf0]  ;;  %v3899_v55 = vld [vmem:[%s7163_s3 + $0x14] sm:$0xf0]  ;;  %v3470_v60 = vld [vmem:[%s7163_s3 + $0x90] sm:$0xf] }
  0xa1   :  { %v4023_v57 = vpop.eup %4022  ;;  %v4475_v47 = vadd.f32 1.0, %v4021_v31  ;;  %1678 = vmatpush.bf16.msra.mxu2 %v3575_v9  ;;  %1737 = vmatpush.bf16.msra.mxu3 %v3639_v10  ;;  %v3949_v7 = vld [vmem:[%s7163_s3 + $0x1a4] sm:$0xf0]  ;;  %v3915_v35 = vld [vmem:[%s7163_s3 + $0x94] sm:$0xf0] }
  0xa2   :  { %v4025_v21 = vpop.eup %4024  ;;  %v4483_v22 = vadd.f32 1.0, %v4023_v57  ;;  %v3901_v57 = vld [vmem:[%s7163_s3 + $0x24] sm:$0xf0]  ;;  %v3534_v61 = vld [vmem:[%s7163_s3 + $0x110] sm:$0xf] }
  0xa3   :  { %v4027_v28 = vpop.eup %4026  ;;  %v4491_v63 = vadd.f32 1.0, %v4025_v21  ;;  %4028 = vrcp.f32 %v4475_v47  ;;  %vm286_vm1 = vweird.f32 %v4475_v47  ;;  %v290_v2 = vand.u32 2147483647, %v4475_v47  ;;  %v3917_v21 = vld [vmem:[%s7163_s3 + $0xa4] sm:$0xf0] }
  0xa4   :  { %1561 = vmatpush.bf16.msra.mxu0 %v3439_v24  ;;  %v4494_v5 = vadd.f32 1.0, %v4027_v28  ;;  %4030 = vrcp.f32 %v4483_v22  ;;  %1620 = vmatpush.bf16.msra.mxu1 %v3503_v26  ;;  %v292_v9 = vand.u32 2147483648, %v4475_v47  ;;  %vm301_vm3 = vweird.f32 %v4483_v22  ;;  %v3590_v19 = vld [vmem:[%s7163_s3 + $0x180] sm:$0xf]  ;;  %v3945_v26 = vld [vmem:[%s7163_s3 + $0x184] sm:$0xf0] }
  0xa5   :  { %1679 = vmatpush.bf16.msra.mxu2 %v3567_v48  ;;  %1738 = vmatpush.bf16.msra.mxu3 %v3631_v51  ;;  %4032 = vrcp.f32 %v4491_v63  ;;  %v305_v12 = vand.u32 2147483647, %v4483_v22  ;;  %v307_v50 = vand.u32 2147483648, %v4483_v22  ;;  %v320_v24 = vand.u32 2147483647, %v4491_v63 }
  0xa6   :  { %4034 = vrcp.f32 %v4494_v5  ;;  %v322_v25 = vand.u32 2147483648, %v4491_v63  ;;  %vm316_vm9 = vweird.f32 %v4491_v63  ;;  %v335_v32 = vand.u32 2147483647, %v4494_v5  ;;  %v3838_v38 = vld [vmem:[%s7163_s3 + $0x370] sm:$0xf] }
  0xa7   :  { %v337_v33 = vand.u32 2147483648, %v4494_v5  ;;  %vm4579_vm10 = vcmp.eq.f32.partialorder %v290_v2, 8.507059e+37  ;;  %v293_v51 = vor.u32 1.1754944e-38, %v292_v9  ;;  %vm331_vm12 = vweird.f32 %v4494_v5  ;;  %v4015_v28 = vld [vmem:[%s7163_s3 + $0x3b4] sm:$0xf0] }
  0xa8   :  { %1562 = vmatpush.bf16.msra.mxu0 %v3431_v4  ;;  %1621 = vmatpush.bf16.msra.mxu1 %v3495_v6  ;;  %vm4605_vm13 = vcmp.eq.f32.partialorder %v305_v12, 8.507059e+37  ;;  %v3606_v6 = vld [vmem:[%s7163_s3 + $0x1a0] sm:$0xf]  ;;  %vm321_vm15 = vcmp.eq.f32.partialorder %v320_v24, 8.507059e+37  ;;  %v323_v62 = vor.u32 1.1754944e-38, %v322_v25  ;;  %v410_v24 = vld [vmem:[%s7164_s4 + $0x48] sm:$0xff] }
  0xa9   :  { %v4523_v39 = vpop.eup %4028  ;;  %1680 = vmatpush.bf16.msra.mxu2 %v3559_v3  ;;  %1739 = vmatpush.bf16.msra.mxu3 %v3623_v54  ;;  %v3406_v54 = vld [vmem:[%s7163_s3 + $0x10] sm:$0xf]  ;;  %v338_v15 = vor.u32 1.1754944e-38, %v337_v33  ;;  %v3929_v12 = vld [vmem:[%s7163_s3 + $0x104] sm:$0xf0]  ;;  %v404_v33 = vld [vmem:[%s7164_s4 + $0x18] sm:$0xff] }
  0xaa   :  { %v4525_v20 = vpop.eup %4030  ;;  %v282_v43 = vmul.f32 %v4523_v39, %v4475_v47  ;;  %vm287_vm2 = vweird.f32 %v4523_v39  ;;  %v3407_v9 = vor.u32 %v3899_v55, %v3406_v54  ;;  %v403_v25 = vld [vmem:[%s7164_s4 + $0x10] sm:$0xff] }
  0xab   :  { %v297_v46 = vmul.f32 %v4525_v20, %v4483_v22  ;;  %v4531_v44 = vpop.eup %4032  ;;  %vm302_vm4 = vweird.f32 %v4525_v20  ;;  %vm4555_vm6 = vmor %vm286_vm1, %vm287_vm2  ;;  %v3542_v22 = vld [vmem:[%s7163_s3 + $0x120] sm:$0xf]  ;;  %vm336_vm1 = vcmp.eq.f32.partialorder %v335_v32, 8.507059e+37  ;;  %v411_v32 = vld [vmem:[%s7164_s4 + $0x50] sm:$0xff] }
  0xac   :  { %1563 = vmatpush.bf16.msra.mxu0 %v3423_v30  ;;  %v283_v41 = vsub.f32 1.0, %v282_v43  ;;  %1622 = vmatpush.bf16.msra.mxu1 %v3487_v36  ;;  %v312_v49 = vmul.f32 %v4531_v44, %v4491_v63  ;;  %v4535_v53 = vpop.eup %4034  ;;  %vm317_vm5 = vweird.f32 %v4531_v44  ;;  %vm4563_vm8 = vmor %vm301_vm3, %vm302_vm4  ;;  %v308_v63 = vor.u32 1.1754944e-38, %v307_v50  ;;  %v3774_v55 = vld [vmem:[%s7163_s3 + $0x2f0] sm:$0xf] }
  0xad   :  { %v298_v52 = vsub.f32 1.0, %v297_v46  ;;  %1681 = vmatpush.bf16.msra.mxu2 %v3551_v42  ;;  %1740 = vmatpush.bf16.msra.mxu3 %v3615_v40  ;;  %v327_v58 = vmul.f32 %v4535_v53, %v4494_v5  ;;  %vm332_vm7 = vweird.f32 %v4535_v53  ;;  %vm4585_vm11 = vmor %vm316_vm9, %vm317_vm5  ;;  %v3931_v42 = vld [vmem:[%s7163_s3 + $0x114] sm:$0xf0]  ;;  %v3598_v40 = vld [vmem:[%s7163_s3 + $0x190] sm:$0xf]  ;;  %v3479_v46 = vor.u32 %v3917_v21, %v3478_v16 }
  0xae   :  { %v313_v56 = vsub.f32 1.0, %v312_v49  ;;  %v284_v34 = vmul.f32 %v4523_v39, %v283_v41  ;;  %vm4614_vm14 = vmor %vm331_vm12, %vm332_vm7  ;;  %v3398_v41 = vld [vmem:[%s7163_s3] sm:$0xf]  ;;  %v3535_v50 = vor.u32 %v3931_v42, %v3534_v61  ;;  %v4007_v16 = vld [vmem:[%s7163_s3 + $0x374] sm:$0xf0] }
  0xaf   :  { %v299_v59 = vmul.f32 %v4525_v20, %v298_v52  ;;  %v328_v1 = vsub.f32 1.0, %v327_v58  ;;  %v3897_v52 = vld [vmem:[%s7163_s3 + $0x4] sm:$0xf0]  ;;  %v401_v49 = vld [vmem:[%s7164_s4] sm:$0xff]  ;;  %v3607_v58 = vor.u32 %v3949_v7, %v3606_v6  ;;  %v3710_v6 = vld [vmem:[%s7163_s3 + $0x270] sm:$0xf]  ;;  %v3839_v54 = vor.u32 %v4007_v16, %v3838_v38 }
  0xb0   :  { %v314_v0 = vmul.f32 %v4531_v44, %v313_v56  ;;  %v285_v11 = vadd.f32 %v4523_v39, %v284_v34  ;;  %v3462_v34 = vld [vmem:[%s7163_s3 + $0x80] sm:$0xf]  ;;  %1623 = vmatpush.bf16.msra.mxu1 %v3479_v46  ;;  %v3975_v7 = vld [vmem:[%s7163_s3 + $0x274] sm:$0xf0]  ;;  %v4005_v42 = vld [vmem:[%s7163_s3 + $0x364] sm:$0xf0] }
  0xb1   :  { %v329_v10 = vmul.f32 %v4535_v53, %v328_v1  ;;  %v300_v17 = vadd.f32 %v4525_v20, %v299_v59  ;;  %v3913_v59 = vld [vmem:[%s7163_s3 + $0x84] sm:$0xf0]  ;;  %1741 = vmatpush.bf16.msra.mxu3 %v3607_v58 }
  0xb2   :  { %v315_v18 = vadd.f32 %v4531_v44, %v314_v0  ;;  %v289_v47 = vsel %vm4555_vm6, %v4523_v39, %v285_v11  ;;  %v3415_v39 = vor.u32 %v3901_v57, %v3414_v37  ;;  %v402_v0 = vld [vmem:[%s7164_s4 + $0x8] sm:$0xff]  ;;  %v3526_v11 = vld [vmem:[%s7163_s3 + $0x100] sm:$0xf]  ;;  %v3463_v37 = vor.u32 %v3913_v59, %v3462_v34  ;;  %v3971_v34 = vld [vmem:[%s7163_s3 + $0x254] sm:$0xf0] }
  0xb3   :  { %v330_v31 = vadd.f32 %v4535_v53, %v329_v10  ;;  %v304_v27 = vsel %vm4563_vm8, %v4525_v20, %v300_v17  ;;  %v294_v13 = vsel %vm4579_vm10, %v293_v51, %v289_v47  ;;  %v3947_v20 = vld [vmem:[%s7163_s3 + $0x194] sm:$0xf0]  ;;  %v3471_v10 = vor.u32 %v3915_v35, %v3470_v60  ;;  %v3989_v46 = vld [vmem:[%s7163_s3 + $0x2e4] sm:$0xf0]  ;;  %v3862_v59 = vld [vmem:[%s7163_s3 + $0x3a0] sm:$0xf] }
  0xb4   :  { %v319_v4 = vsel %vm4585_vm11, %v4531_v44, %v315_v18  ;;  %v309_v30 = vsel %vm4605_vm13, %v308_v63, %v304_v27  ;;  %v3543_v44 = vor.u32 %v3933_v23, %v3542_v22  ;;  %v4667_v56 = vperm.slane %v294_v13, 0  ;;  %1564 = vmatpush.bf16.msra.mxu0 %v3415_v39  ;;  %v412_v51 = vld [vmem:[%s7164_s4 + $0x58] sm:$0xff]  ;;  %v3870_v27 = vld [vmem:[%s7163_s3 + $0x3b0] sm:$0xf] }
  0xb5   :  { %v334_v3 = vsel %vm4614_vm14, %v4535_v53, %v330_v31  ;;  %v324_v36 = vsel %vm321_vm15, %v323_v62, %v319_v4  ;;  %v409_v53 = vld [vmem:[%s7164_s4 + $0x40] sm:$0xff]  ;;  %v4678_v1 = vperm.slane %v309_v30, 0  ;;  %v3599_v18 = vor.u32 %v3947_v20, %v3598_v40  ;;  %1624 = vmatpush.bf16.msra.mxu1 %v3471_v10  ;;  %v3991_v60 = vld [vmem:[%s7163_s3 + $0x2f4] sm:$0xf0]  ;;  %v3973_v20 = vld [vmem:[%s7163_s3 + $0x264] sm:$0xf0] }
  0xb6   :  { %v339_v43 = vsel %vm336_vm1, %v338_v15, %v334_v3  ;;  %v4680_v2 = vperm.slane %v324_v36, 0  ;;  %1682 = vmatpush.bf16.msra.mxu2 %v3543_v44  ;;  %v3399_v31 = vor.u32 %v3897_v52, %v3398_v41  ;;  %v3527_v57 = vor.u32 %v3929_v12, %v3526_v11  ;;  %v3830_v36 = vld [vmem:[%s7163_s3 + $0x360] sm:$0xf]  ;;  %v3822_v52 = vld [vmem:[%s7163_s3 + $0x350] sm:$0xf] }
  0xb7   :  { %v4688_v17 = vperm.slane %v339_v43, 0  ;;  %v569_v47 = vmul.f32 %v4667_v56, %v401_v49  ;;  %v577_v48 = vmul.f32 %v4667_v56, %v409_v53  ;;  %v570_v21 = vmul.f32 %v4678_v1, %v402_v0  ;;  %1742 = vmatpush.bf16.msra.mxu3 %v3599_v18  ;;  %v3702_v40 = vld [vmem:[%s7163_s3 + $0x260] sm:$0xf]  ;;  %v4003_v49 = vld [vmem:[%s7163_s3 + $0x354] sm:$0xf0] }
  0xb8   :  { %1565 = vmatpush.bf16.msra.mxu0 %v3407_v9  ;;  %v578_v22 = vmul.f32 %v4678_v1, %v410_v24  ;;  %v571_v23 = vmul.f32 %v4680_v2, %v403_v25  ;;  %v3591_v63 = vor.u32 %v3945_v26, %v3590_v19  ;;  %v579_v4 = vmul.f32 %v4680_v2, %v411_v32  ;;  %v3766_v43 = vld [vmem:[%s7163_s3 + $0x2e0] sm:$0xf]  ;;  %v3694_v53 = vld [vmem:[%s7163_s3 + $0x250] sm:$0xf]  ;;  %v4013_v0 = vld [vmem:[%s7163_s3 + $0x3a4] sm:$0xf0] }
  0xb9   :  { %v572_v5 = vmul.f32 %v4688_v17, %v404_v33  ;;  %v4736_v62 = vpack.c.bf16 %v577_v48, %v569_v47  ;;  %v580_v3 = vmul.f32 %v4688_v17, %v412_v51  ;;  %v3871_v35 = vor.u32 %v4015_v28, %v3870_v27  ;;  %1625 = vmatpush.bf16.msra.mxu1 %v3463_v37  ;;  %v3758_v9 = vld [vmem:[%s7163_s3 + $0x2d0] sm:$0xf]  ;;  %v3987_v10 = vld [vmem:[%s7163_s3 + $0x2d4] sm:$0xf0]  ;;  %v417_v18 = vld [vmem:[%s7164_s4 + $0x80] sm:$0xff] }
  0xba   :  { %1683 = vmatpush.bf16.msra.mxu2 %v3535_v50  ;;  %v4745_v13 = vpack.c.bf16 %v578_v22, %v570_v21  ;;  %v4747_v15 = vpack.c.bf16 %v579_v4, %v571_v23  ;;  %v3711_v30 = vor.u32 %v3975_v7, %v3710_v6  ;;  %v3775_v39 = vor.u32 %v3991_v60, %v3774_v55  ;;  %v425_v19 = vld [vmem:[%s7164_s4 + $0xc0] sm:$0xff]  ;;  %v418_v24 = vld [vmem:[%s7164_s4 + $0x88] sm:$0xff]  ;;  %v419_v26 = vld [vmem:[%s7164_s4 + $0x90] sm:$0xff] }
  0xbb   :  { %v4749_v61 = vpack.c.bf16 %v580_v3, %v572_v5  ;;  %1743 = vmatpush.bf16.msra.mxu3 %v3591_v63  ;;  %v3831_v44 = vor.u32 %v4005_v42, %v3830_v36  ;;  %v3703_v41 = vor.u32 %v3973_v20, %v3702_v40  ;;  %v3767_v58 = vor.u32 %v3989_v46, %v3766_v43  ;;  %v427_v32 = vld [vmem:[%s7164_s4 + $0xd0] sm:$0xff]  ;;  %v420_v33 = vld [vmem:[%s7164_s4 + $0x98] sm:$0xff]  ;;  %v3814_v4 = vld [vmem:[%s7163_s3 + $0x340] sm:$0xf] }
  0xbc   :  { %1566 = vmatpush.bf16.msra.mxu0 %v3399_v31  ;;  %1626 = vmatmul.bf16.vlgmr.msra.gmra.mxu1 %v4745_v13  ;;  %v3823_v11 = vor.u32 %v4003_v49, %v3822_v52  ;;  %v3695_v12 = vor.u32 %v3971_v34, %v3694_v53  ;;  %v3863_v50 = vor.u32 %v4013_v0, %v3862_v59  ;;  %v426_v31 = vld [vmem:[%s7164_s4 + $0xc8] sm:$0xff]  ;;  %v428_v37 = vld [vmem:[%s7164_s4 + $0xd8] sm:$0xff]  ;;  %v3686_v6 = vld [vmem:[%s7163_s3 + $0x240] sm:$0xf] }
  0xbd   :  { %1854 = vmatpush.bf16.msrb.mxu1 %v3775_v39  ;;  %v3759_v25 = vor.u32 %v3987_v10, %v3758_v9  ;;  %v593_v47 = vmul.f32 %v4667_v56, %v425_v19  ;;  %v586_v48 = vmul.f32 %v4678_v1, %v418_v24  ;;  %v594_v51 = vmul.f32 %v4678_v1, %v426_v31  ;;  %v4001_v5 = vld [vmem:[%s7163_s3 + $0x344] sm:$0xf0]  ;;  %v433_v55 = vld [vmem:[%s7164_s4 + $0x100] sm:$0xff]  ;;  %v435_v36 = vld [vmem:[%s7164_s4 + $0x110] sm:$0xff] }
  0xbe   :  { %1684 = vmatpush.bf16.msra.mxu2 %v3527_v57  ;;  %1744 = vmatmul.bf16.vlgmr.msra.gmra.mxu3 %v4749_v61  ;;  %v585_v57 = vmul.f32 %v4667_v56, %v417_v18  ;;  %v587_v38 = vmul.f32 %v4680_v2, %v419_v26  ;;  %v595_v16 = vmul.f32 %v4680_v2, %v427_v32  ;;  %v3969_v3 = vld [vmem:[%s7163_s3 + $0x244] sm:$0xf0]  ;;  %v441_v60 = vld [vmem:[%s7164_s4 + $0x140] sm:$0xff]  ;;  %v443_v39 = vld [vmem:[%s7164_s4 + $0x150] sm:$0xff] }
  0xbf   :  { %1567 = vmatmul.bf16.vlgmr.msra.gmra.mxu0 %v4736_v62  ;;  %1976 = vmatpush.bf16.msrb.mxu3 %v3871_v35  ;;  %v588_v21 = vmul.f32 %v4688_v17, %v420_v33  ;;  %v596_v22 = vmul.f32 %v4688_v17, %v428_v37  ;;  %v4831_v27 = vpack.c.bf16 %v594_v51, %v586_v48  ;;  %v434_v35 = vld [vmem:[%s7164_s4 + $0x108] sm:$0xff]  ;;  %v436_v42 = vld [vmem:[%s7164_s4 + $0x118] sm:$0xff]  ;;  %v3750_v9 = vld [vmem:[%s7163_s3 + $0x2c0] sm:$0xf] }
  0xc0   :  { %1795 = vmatpush.bf16.msrb.mxu0 %v3711_v30  ;;  %v4829_v23 = vpack.c.bf16 %v593_v47, %v585_v57  ;;  %v4833_v28 = vpack.c.bf16 %v595_v16, %v587_v38  ;;  %v3815_v7 = vor.u32 %v4001_v5, %v3814_v4  ;;  %v442_v30 = vld [vmem:[%s7164_s4 + $0x148] sm:$0xff]  ;;  %v444_v40 = vld [vmem:[%s7164_s4 + $0x158] sm:$0xff]  ;;  %v601_v20 = vmul.f32 %v4667_v56, %v433_v55  ;;  %v451_v24 = vld [vmem:[%s7164_s4 + $0x190] sm:$0xff] }
  0xc1   :  { %1685 = vmatmul.bf16.vlgmr.msra.gmra.mxu2 %v4747_v15  ;;  %1855 = vmatpush.bf16.msrb.mxu1 %v3767_v58  ;;  %v4836_v63 = vpack.c.bf16 %v596_v22, %v588_v21  ;;  %v609_v43 = vmul.f32 %v4667_v56, %v441_v60  ;;  %v602_v46 = vmul.f32 %v4678_v1, %v434_v35  ;;  %v3985_v10 = vld [vmem:[%s7163_s3 + $0x2c4] sm:$0xf0]  ;;  %v452_v31 = vld [vmem:[%s7164_s4 + $0x198] sm:$0xff]  ;;  %v3806_v5 = vld [vmem:[%s7163_s3 + $0x330] sm:$0xf] }
  0xc2   :  { %1913 = vmatpush.bf16.msrb.mxu2 %v3839_v54  ;;  %v3687_v54 = vor.u32 %v3969_v3, %v3686_v6  ;;  %v611_v52 = vmul.f32 %v4680_v2, %v443_v39  ;;  %v604_v49 = vmul.f32 %v4688_v17, %v436_v42  ;;  %v612_v53 = vmul.f32 %v4688_v17, %v444_v40  ;;  %v450_v18 = vld [vmem:[%s7164_s4 + $0x188] sm:$0xff]  ;;  %v460_v26 = vld [vmem:[%s7164_s4 + $0x1d8] sm:$0xff]  ;;  %v3854_v55 = vld [vmem:[%s7163_s3 + $0x390] sm:$0xf] }
  0xc3   :  { %1977 = vmatpush.bf16.msrb.mxu3 %v3863_v50  ;;  %v4885_v58 = vpack.c.bf16 %v609_v43, %v601_v20  ;;  %v457_v50 = vld [vmem:[%s7164_s4 + $0x1c0] sm:$0xff]  ;;  %v458_v19 = vld [vmem:[%s7164_s4 + $0x1c8] sm:$0xff]  ;;  %v618_v37 = vmul.f32 %v4678_v1, %v450_v18  ;;  %v619_v47 = vmul.f32 %v4680_v2, %v451_v24  ;;  %v620_v51 = vmul.f32 %v4688_v17, %v452_v31  ;;  %v3999_v6 = vld [vmem:[%s7163_s3 + $0x334] sm:$0xf0] }
  0xc4   :  { %1796 = vmatpush.bf16.msrb.mxu0 %v3703_v41  ;;  %v603_v41 = vmul.f32 %v4680_v2, %v435_v36  ;;  %v4892_v0 = vpack.c.bf16 %v612_v53, %v604_v49  ;;  %v625_v33 = vmul.f32 %v4667_v56, %v457_v50  ;;  %v626_v57 = vmul.f32 %v4678_v1, %v458_v19  ;;  %v4011_v60 = vld [vmem:[%s7163_s3 + $0x394] sm:$0xf0]  ;;  %v3742_v36 = vld [vmem:[%s7163_s3 + $0x2b0] sm:$0xf]  ;;  %v465_v40 = vld [vmem:[%s7164_s4 + $0x200] sm:$0xff] }
  0xc5   :  { %1856 = vmatpush.bf16.msrb.mxu1 %v3759_v25  ;;  %v459_v25 = vld [vmem:[%s7164_s4 + $0x1d0] sm:$0xff]  ;;  %v628_v38 = vmul.f32 %v4688_v17, %v460_v26  ;;  %v3807_v3 = vor.u32 %v3999_v6, %v3806_v5  ;;  %v3983_v39 = vld [vmem:[%s7163_s3 + $0x2b4] sm:$0xf0]  ;;  %v473_v20 = vld [vmem:[%s7164_s4 + $0x240] sm:$0xff]  ;;  %v633_v53 = vmul.f32 %v4667_v56, %v465_v40 }
  0xc6   :  { %1914 = vmatpush.bf16.msrb.mxu2 %v3831_v44  ;;  %v610_v44 = vmul.f32 %v4678_v1, %v442_v30  ;;  %v4889_v59 = vpack.c.bf16 %v611_v52, %v603_v41  ;;  %v627_v48 = vmul.f32 %v4680_v2, %v459_v25  ;;  %v4937_v21 = vpack.c.bf16 %v626_v57, %v618_v37  ;;  %v466_v43 = vld [vmem:[%s7164_s4 + $0x208] sm:$0xff]  ;;  %v475_v41 = vld [vmem:[%s7164_s4 + $0x250] sm:$0xff]  ;;  %v468_v52 = vld [vmem:[%s7164_s4 + $0x218] sm:$0xff] }
  0xc7   :  { %v4942_v4 = vpack.c.bf16 %v628_v38, %v620_v51  ;;  %v3855_v30 = vor.u32 %v4011_v60, %v3854_v55  ;;  %v3743_v42 = vor.u32 %v3983_v39, %v3742_v36  ;;  %v476_v49 = vld [vmem:[%s7164_s4 + $0x258] sm:$0xff]  ;;  %v643_v50 = vmul.f32 %v4680_v2, %v475_v41  ;;  %v3670_v37 = vld [vmem:[%s7163_s3 + $0x220] sm:$0xf]  ;;  %v3981_v51 = vld [vmem:[%s7163_s3 + $0x2a4] sm:$0xf0] }
  0xc8   :  { %1797 = vmatpush.bf16.msrb.mxu0 %v3695_v12  ;;  %v4887_v34 = vpack.c.bf16 %v610_v44, %v602_v46  ;;  %v449_v12 = vld [vmem:[%s7164_s4 + $0x180] sm:$0xff]  ;;  %v4939_v22 = vpack.c.bf16 %v627_v48, %v619_v47  ;;  %v474_v46 = vld [vmem:[%s7164_s4 + $0x248] sm:$0xff]  ;;  %v467_v44 = vld [vmem:[%s7164_s4 + $0x210] sm:$0xff]  ;;  %v636_v18 = vmul.f32 %v4688_v17, %v468_v52  ;;  %v644_v19 = vmul.f32 %v4688_v17, %v476_v49 }
  0xc9   :  { %v617_v32 = vmul.f32 %v4667_v56, %v449_v12  ;;  %1978 = vmatpush.bf16.msrb.mxu3 %v3855_v30  ;;  %v635_v12 = vmul.f32 %v4680_v2, %v467_v44  ;;  %v3965_v47 = vld [vmem:[%s7163_s3 + $0x224] sm:$0xf0]  ;;  %v3734_v48 = vld [vmem:[%s7163_s3 + $0x2a0] sm:$0xf]  ;;  %v483_v55 = vld [vmem:[%s7164_s4 + $0x290] sm:$0xff] }
  0xca   :  { %1915 = vmatpush.bf16.msrb.mxu2 %v3823_v11  ;;  %v3751_v11 = vor.u32 %v3985_v10, %v3750_v9  ;;  %v641_v9 = vmul.f32 %v4667_v56, %v473_v20  ;;  %v634_v10 = vmul.f32 %v4678_v1, %v466_v43  ;;  %v5010_v26 = vpack.c.bf16 %v644_v19, %v636_v18  ;;  %v481_v6 = vld [vmem:[%s7164_s4 + $0x280] sm:$0xff]  ;;  %v491_v60 = vld [vmem:[%s7164_s4 + $0x2d0] sm:$0xff]  ;;  %v492_v30 = vld [vmem:[%s7164_s4 + $0x2d8] sm:$0xff] }
  0xcb   :  { %v4935_v16 = vpack.c.bf16 %v625_v33, %v617_v32  ;;  %v5007_v31 = vpack.c.bf16 %v643_v50, %v635_v12  ;;  %v3798_v32 = vld [vmem:[%s7163_s3 + $0x320] sm:$0xf]  ;;  %v3997_v33 = vld [vmem:[%s7163_s3 + $0x324] sm:$0xf0]  ;;  %v3671_v38 = vor.u32 %v3965_v47, %v3670_v37  ;;  %v3735_v5 = vor.u32 %v3981_v51, %v3734_v48  ;;  %v3963_v50 = vld [vmem:[%s7163_s3 + $0x214] sm:$0xf0] }
  0xcc   :  { %1631 = vmatmul.bf16.gmra.mxu1 %v4831_v27  ;;  %1798 = vmatpush.bf16.msrb.mxu0 %v3687_v54  ;;  %v3967_v54 = vld [vmem:[%s7163_s3 + $0x234] sm:$0xf0]  ;;  %v5003_v24 = vpack.c.bf16 %v641_v9, %v633_v53  ;;  %v3799_v57 = vor.u32 %v3997_v33, %v3798_v32  ;;  %v649_v36 = vmul.f32 %v4667_v56, %v481_v6  ;;  %v3790_v9 = vld [vmem:[%s7163_s3 + $0x310] sm:$0xf]  ;;  %v3846_v18 = vld [vmem:[%s7163_s3 + $0x380] sm:$0xf] }
  0xcd   :  { %1857 = vmatpush.bf16.msrb.mxu1 %v3751_v11  ;;  %v642_v11 = vmul.f32 %v4678_v1, %v474_v46  ;;  %v651_v20 = vmul.f32 %v4680_v2, %v483_v55  ;;  %v659_v43 = vmul.f32 %v4680_v2, %v491_v60  ;;  %v660_v44 = vmul.f32 %v4688_v17, %v492_v30  ;;  %v4009_v19 = vld [vmem:[%s7163_s3 + $0x384] sm:$0xf0]  ;;  %v3726_v37 = vld [vmem:[%s7163_s3 + $0x290] sm:$0xf]  ;;  %v497_v48 = vld [vmem:[%s7164_s4 + $0x300] sm:$0xff] }
  0xce   :  { %1749 = vmatmul.bf16.gmra.mxu3 %v4836_v63  ;;  %1916 = vmatpush.bf16.msrb.mxu2 %v3815_v7  ;;  %v3678_v7 = vld [vmem:[%s7163_s3 + $0x230] sm:$0xf]  ;;  %v3847_v33 = vor.u32 %v4009_v19, %v3846_v18  ;;  %v505_v51 = vld [vmem:[%s7164_s4 + $0x340] sm:$0xff]  ;;  %v665_v55 = vmul.f32 %v4667_v56, %v497_v48  ;;  %v514_v18 = vld [vmem:[%s7164_s4 + $0x388] sm:$0xff] }
  0xcf   :  { %1572 = vmatmul.bf16.gmra.mxu0 %v4829_v23  ;;  %v3679_v35 = vor.u32 %v3967_v54, %v3678_v7  ;;  %v5005_v25 = vpack.c.bf16 %v642_v11, %v634_v10  ;;  %v489_v7 = vld [vmem:[%s7164_s4 + $0x2c0] sm:$0xff]  ;;  %v490_v54 = vld [vmem:[%s7164_s4 + $0x2c8] sm:$0xff]  ;;  %v5069_v49 = vpack.c.bf16 %v659_v43, %v651_v20  ;;  %v3995_v10 = vld [vmem:[%s7163_s3 + $0x314] sm:$0xf0]  ;;  %v673_v60 = vmul.f32 %v4667_v56, %v505_v51 }
  0xd0   :  { %v657_v39 = vmul.f32 %v4667_v56, %v489_v7  ;;  %v658_v40 = vmul.f32 %v4678_v1, %v490_v54  ;;  %v3662_v11 = vld [vmem:[%s7163_s3 + $0x210] sm:$0xf]  ;;  %v3791_v12 = vor.u32 %v3995_v10, %v3790_v9  ;;  %1979 = vmatpush.bf16.msrb.mxu3 %v3847_v33  ;;  %v508_v54 = vld [vmem:[%s7164_s4 + $0x358] sm:$0xff]  ;;  %v3392_v9 = vmul.f32 -1.442695, %v4401_v8  ;;  %v521_v8 = vld [vmem:[%s7164_s4 + $0x3c0] sm:$0xff] }
  0xd1   :  { %1690 = vmatmul.bf16.gmra.mxu2 %v4833_v28  ;;  %1799 = vmatpush.bf16.msrb.mxu0 %v3679_v35  ;;  %v484_v35 = vld [vmem:[%s7164_s4 + $0x298] sm:$0xff]  ;;  %7256 = vst [vmem:[#allocation3_spill] sm:$0xff] %v5069_v49  ;;  %v3663_v32 = vor.u32 %v3963_v50, %v3662_v11  ;;  %v499_v6 = vld [vmem:[%s7164_s4 + $0x310] sm:$0xff]  ;;  %v5133_v20 = vpack.c.bf16 %v673_v60, %v665_v55  ;;  %v3393_v10 = vmul.f32 -1.442695, %v4405_v14  ;;  %v513_v50 = vld [vmem:[%s7164_s4 + $0x380] sm:$0xff] }
  0xd2   :  { %1917 = vmatpush.bf16.msrb.mxu2 %v3807_v3  ;;  %1858 = vmatpush.bf16.msrb.mxu1 %v3743_v42  ;;  %v482_v3 = vld [vmem:[%s7164_s4 + $0x288] sm:$0xff]  ;;  %v652_v46 = vmul.f32 %v4688_v17, %v484_v35  ;;  %v5065_v41 = vpack.c.bf16 %v657_v39, %v649_v36  ;;  %v507_v7 = vld [vmem:[%s7164_s4 + $0x350] sm:$0xff]  ;;  %v667_v36 = vmul.f32 %v4680_v2, %v499_v6  ;;  %4036 = vpow2.f32 %v3392_v9  ;;  %v516_v19 = vld [vmem:[%s7164_s4 + $0x398] sm:$0xff] }
  0xd3   :  { %v650_v42 = vmul.f32 %v4678_v1, %v482_v3  ;;  %v500_v3 = vld [vmem:[%s7164_s4 + $0x318] sm:$0xff]  ;;  %v675_v39 = vmul.f32 %v4680_v2, %v507_v7  ;;  %7258 = vst [vmem:[#allocation5_spill] sm:$0xff] %v5133_v20  ;;  %v3394_v11 = vmul.f32 -1.442695, %v4409_v29  ;;  %4038 = vpow2.f32 %v3393_v10  ;;  %v522_v14 = vld [vmem:[%s7164_s4 + $0x3c8] sm:$0xff]  ;;  %v515_v29 = vld [vmem:[%s7164_s4 + $0x390] sm:$0xff] }
  0xd4   :  { %v5072_v53 = vpack.c.bf16 %v660_v44, %v652_v46  ;;  %v681_v33 = vmul.f32 %v4667_v56, %v513_v50  ;;  %v690_v48 = vmul.f32 %v4678_v1, %v522_v14  ;;  %v683_v51 = vmul.f32 %v4680_v2, %v515_v29 }
  0xd5   :  { %1800 = vmatpush.bf16.msrb.mxu0 %v3671_v38  ;;  %v5067_v52 = vpack.c.bf16 %v658_v40, %v650_v42  ;;  %v498_v38 = vld [vmem:[%s7164_s4 + $0x308] sm:$0xff]  ;;  %v668_v42 = vmul.f32 %v4688_v17, %v500_v3  ;;  %v676_v40 = vmul.f32 %v4688_v17, %v508_v54  ;;  %v5137_v46 = vpack.c.bf16 %v675_v39, %v667_v36  ;;  %v3654_v39 = vld [vmem:[%s7163_s3 + $0x200] sm:$0xf] }
  0xd6   :  { %1918 = vmatpush.bf16.msrb.mxu2 %v3799_v57  ;;  %1859 = vmatpush.bf16.msrb.mxu1 %v3735_v5  ;;  %7257 = vst [vmem:[#allocation4_spill] sm:$0xff] %v5072_v53  ;;  %v3979_v57 = vld [vmem:[%s7163_s3 + $0x294] sm:$0xf0]  ;;  %v506_v5 = vld [vmem:[%s7164_s4 + $0x348] sm:$0xff]  ;;  %v666_v35 = vmul.f32 %v4678_v1, %v498_v38  ;;  %4040 = vpow2.f32 %v3394_v11 }
  0xd7   :  { %7255 = vst [vmem:[#allocation2_spill] sm:$0xff] %v5067_v52  ;;  %v3727_v47 = vor.u32 %v3979_v57, %v3726_v37  ;;  %v674_v30 = vmul.f32 %v4678_v1, %v506_v5  ;;  %v5140_v44 = vpack.c.bf16 %v676_v40, %v668_v42  ;;  %v689_v37 = vmul.f32 %v4667_v56, %v521_v8  ;;  %v3993_v36 = vld [vmem:[%s7163_s3 + $0x304] sm:$0xf0]  ;;  %v3718_v8 = vld [vmem:[%s7163_s3 + $0x280] sm:$0xf] }
  0xd8   :  { %7260 = vst [vmem:[#allocation7_spill] sm:$0xff] %v5137_v46  ;;  %v4037_v57 = vpop.eup %4036  ;;  %v684_v5 = vmul.f32 %v4688_v17, %v516_v19  ;;  %v3961_v11 = vld [vmem:[%s7163_s3 + $0x204] sm:$0xf0]  ;;  %v537_v19 = vld [vmem:[%s7164_s4 + $0x440] sm:$0xff] }
  0xd9   :  { %1801 = vmatpush.bf16.msrb.mxu0 %v3663_v32  ;;  %v5135_v43 = vpack.c.bf16 %v674_v30, %v666_v35  ;;  %7261 = vst [vmem:[#allocation8_spill] sm:$0xff] %v5140_v44  ;;  %v524_v32 = vld [vmem:[%s7164_s4 + $0x3d8] sm:$0xff]  ;;  %v4039_v7 = vpop.eup %4038  ;;  %v5181_v3 = vadd.f32 1.0, %v4037_v57  ;;  %v5183_v54 = vpack.c.bf16 %v689_v37, %v681_v33  ;;  %v3782_v30 = vld [vmem:[%s7163_s3 + $0x300] sm:$0xf]  ;;  %v538_v33 = vld [vmem:[%s7164_s4 + $0x448] sm:$0xff] }
  0xda   :  { %1919 = vmatpush.bf16.msrb.mxu2 %v3791_v12  ;;  %1860 = vmatpush.bf16.msrb.mxu1 %v3727_v47  ;;  %v3395_v12 = vmul.f32 -1.442695, %v4428_v45  ;;  %v523_v45 = vld [vmem:[%s7164_s4 + $0x3d0] sm:$0xff]  ;;  %v682_v47 = vmul.f32 %v4678_v1, %v514_v18  ;;  %v692_v6 = vmul.f32 %v4688_v17, %v524_v32  ;;  %v5198_v40 = vadd.f32 1.0, %v4039_v7  ;;  %v3977_v18 = vld [vmem:[%s7163_s3 + $0x284] sm:$0xf0] }
  0xdb   :  { %7259 = vst [vmem:[#allocation6_spill] sm:$0xff] %v5135_v43  ;;  %v691_v38 = vmul.f32 %v4680_v2, %v523_v45  ;;  %v3783_v10 = vor.u32 %v3993_v36, %v3782_v30  ;;  %v3719_v29 = vor.u32 %v3977_v18, %v3718_v8  ;;  %v529_v45 = vld [vmem:[%s7164_s4 + $0x400] sm:$0xff]  ;;  %v530_v32 = vld [vmem:[%s7164_s4 + $0x408] sm:$0xff]  ;;  %v531_v37 = vld [vmem:[%s7164_s4 + $0x410] sm:$0xff]  ;;  %vm346_vm2 = vweird.f32 %v5181_v3 }
  0xdc   :  { %1636 = vmatmul.bf16.gmra.mxu1 %v4887_v34  ;;  %4042 = vpow2.f32 %v3395_v12  ;;  %7262 = vst [vmem:[#allocation9_spill] sm:$0xff] %v5183_v54  ;;  %v4041_v55 = vpop.eup %4040  ;;  %v5185_v60 = vpack.c.bf16 %v690_v48, %v682_v47  ;;  %v5201_v9 = vpack.c.bf16 %v692_v6, %v684_v5  ;;  %v3655_v12 = vor.u32 %v3961_v11, %v3654_v39  ;;  %v539_v57 = vld [vmem:[%s7164_s4 + $0x450] sm:$0xff]  ;;  %v532_v48 = vld [vmem:[%s7164_s4 + $0x418] sm:$0xff] }
  0xdd   :  { %v5187_v35 = vpack.c.bf16 %v691_v38, %v683_v51  ;;  %v5208_v50 = vadd.f32 1.0, %v4041_v55  ;;  %4044 = vrcp.f32 %v5181_v3  ;;  %v540_v51 = vld [vmem:[%s7164_s4 + $0x458] sm:$0xff]  ;;  %v697_v5 = vmul.f32 %v4667_v56, %v529_v45 }
  0xde   :  { %1754 = vmatmul.bf16.gmra.mxu3 %v4892_v0  ;;  %7263 = vst [vmem:[#allocation10_spill] sm:$0xff] %v5185_v60  ;;  %1920 = vmatpush.bf16.msrb.mxu2 %v3783_v10  ;;  %4046 = vrcp.f32 %v5198_v40  ;;  %v705_v6 = vmul.f32 %v4667_v56, %v537_v19  ;;  %v698_v7 = vmul.f32 %v4678_v1, %v530_v32  ;;  %vm361_vm3 = vweird.f32 %v5198_v40 }
  0xdf   :  { %1577 = vmatmul.bf16.gmra.mxu0 %v4885_v58  ;;  %7264 = vst [vmem:[#allocation11_spill] sm:$0xff] %v5187_v35  ;;  %1861 = vmatpush.bf16.msrb.mxu1 %v3719_v29  ;;  %4048 = vrcp.f32 %v5208_v50  ;;  %v706_v55 = vmul.f32 %v4678_v1, %v538_v33  ;;  %v699_v30 = vmul.f32 %v4680_v2, %v531_v37  ;;  %vm376_vm6 = vweird.f32 %v5208_v50 }
  0xe0   :  { %7265 = vst [vmem:[#allocation12_spill] sm:$0xff] %v5201_v9  ;;  %1802 = vmatpush.bf16.msrb.mxu0 %v3655_v12  ;;  %v707_v36 = vmul.f32 %v4680_v2, %v539_v57  ;;  %v708_v10 = vmul.f32 %v4688_v17, %v540_v51  ;;  %v5267_v45 = vpack.c.bf16 %v705_v6, %v697_v5  ;;  %v3942_v6 = vld [vmem:[%s7163_s3 + $0x174] sm:$0xf] }
  0xe1   :  { %1695 = vmatmul.bf16.gmra.mxu2 %v4889_v59  ;;  %v5269_v32 = vpack.c.bf16 %v706_v55, %v698_v7  ;;  %v3584_v7 = vld [vmem:[%s7163_s3 + $0x178] sm:$0xf0]  ;;  %v3910_v55 = vld [vmem:[%s7163_s3 + $0x74] sm:$0xf] }
  0xe2   :  { %v4043_v42 = vpop.eup %4042  ;;  %7266 = vst [vmem:[#allocation13_spill] sm:$0xff] %v5267_v45  ;;  %v5271_v33 = vpack.c.bf16 %v707_v36, %v699_v30  ;;  %v3587_v30 = vor.u32 %v3942_v6, %v3584_v7  ;;  %v3456_v36 = vld [vmem:[%s7163_s3 + $0x78] sm:$0xf0] }
  0xe3   :  { %v5217_v14 = vadd.f32 1.0, %v4043_v42  ;;  %v5241_v47 = vpop.eup %4044  ;;  %v700_v42 = vmul.f32 %v4688_v17, %v532_v48  ;;  %7267 = vst [vmem:[#allocation14_spill] sm:$0xff] %v5269_v32 }
  0xe4   :  { %v5249_v38 = vpop.eup %4046  ;;  %v342_v12 = vmul.f32 %v5241_v47, %v5181_v3  ;;  %7268 = vst [vmem:[#allocation15_spill] sm:$0xff] %v5271_v33  ;;  %2149 = vmatpush.bf16.msra.mxu2 %v3587_v30  ;;  %vm347_vm4 = vweird.f32 %v5241_v47 }
  0xe5   :  { %4050 = vrcp.f32 %v5217_v14  ;;  %v5257_v39 = vpop.eup %4048  ;;  %v357_v8 = vmul.f32 %v5249_v38, %v5198_v40  ;;  %v5278_v48 = vpack.c.bf16 %v708_v10, %v700_v42  ;;  %v3958_v42 = vld [vmem:[%s7163_s3 + $0x1f4] sm:$0xf]  ;;  %v3648_v10 = vld [vmem:[%s7163_s3 + $0x1f8] sm:$0xf0]  ;;  %vm362_vm5 = vweird.f32 %v5249_v38  ;;  %vm5362_vm9 = vmor %vm346_vm2, %vm347_vm4 }
  0xe6   :  { %v372_v37 = vmul.f32 %v5257_v39, %v5208_v50  ;;  %v343_v51 = vsub.f32 1.0, %v342_v12  ;;  %vm377_vm7 = vweird.f32 %v5257_v39  ;;  %vm5374_vm10 = vmor %vm361_vm3, %vm362_vm5  ;;  %vm391_vm12 = vweird.f32 %v5217_v14 }
  0xe7   :  { %7269 = vst [vmem:[#allocation16_spill] sm:$0xff] %v5278_v48  ;;  %v358_v5 = vsub.f32 1.0, %v357_v8  ;;  %vm5388_vm11 = vmor %vm376_vm6, %vm377_vm7  ;;  %vm2503_vm3 = vcmask 556032  }
  0xe8   :  { %v373_v12 = vsub.f32 1.0, %v372_v37 }
  0xeb   :  { %v5261_v11 = vpop.eup %4050 }
  0xec   :  { %1641 = vmatmul.bf16.gmra.mxu1 %v4937_v21  ;;  %v387_v57 = vmul.f32 %v5261_v11, %v5217_v14  ;;  %vm392_vm8 = vweird.f32 %v5261_v11 }
  0xed   :  { %vm5398_vm13 = vmor %vm391_vm12, %vm392_vm8 }
  0xee   :  { %1759 = vmatmul.bf16.gmra.mxu3 %v4942_v4  ;;  %v388_v8 = vsub.f32 1.0, %v387_v57 }
  0xef   :  { %1582 = vmatmul.bf16.gmra.mxu0 %v4935_v16 }
  0xf1   :  { %1700 = vmatmul.bf16.gmra.mxu2 %v4939_v22 }
  0xfc   :  { %1646 = vmatmul.bf16.gmra.mxu1 %v5005_v25 }
  0xfe   :  { %1764 = vmatmul.bf16.gmra.mxu3 %v5010_v26 }
  0xff   :  { %1587 = vmatmul.bf16.gmra.mxu0 %v5003_v24 }
 0x101   :  { %1705 = vmatmul.bf16.gmra.mxu2 %v5007_v31 }
 0x10c   :  { %1651 = vmatmul.bf16.gmra.mxu1 %v5067_v52 }
 0x10e   :  { %1769 = vmatmul.bf16.gmra.mxu3 %v5072_v53 }
 0x10f   :  { %1592 = vmatmul.bf16.gmra.mxu0 %v5065_v41 }
 0x111   :  { %1710 = vmatmul.bf16.gmra.mxu2 %v5069_v49 }
 0x11c   :  { %1656 = vmatmul.bf16.gmra.mxu1 %v5135_v43 }
 0x11e   :  { %1774 = vmatmul.bf16.gmra.mxu3 %v5140_v44 }
 0x11f   :  { %1597 = vmatmul.bf16.gmra.mxu0 %v5133_v20 }
 0x121   :  { %1715 = vmatmul.bf16.gmra.mxu2 %v5137_v46 }
 0x12c   :  { %1661 = vmatmul.bf16.gmra.mxu1 %v5185_v60 }
 0x12e   :  { %1779 = vmatmul.bf16.gmra.mxu3 %v5201_v9  ;;  %v352_v9 = vand.u32 2147483648, %v5181_v3 }
 0x12f   :  { %1602 = vmatmul.bf16.gmra.mxu0 %v5183_v54 }
 0x131   :  { %1720 = vmatmul.bf16.gmra.mxu2 %v5187_v35  ;;  %v359_v35 = vmul.f32 %v5249_v38, %v358_v5 }
 0x133   :  { %v360_v37 = vadd.f32 %v5249_v38, %v359_v35  ;;  %v408_v35 = vld [vmem:[%s7164_s4 + $0x38] sm:$0xff] }
 0x139   :  { %v1627_v29 = vpop.f32.mrf.mxu1 }
 0x13c   :  { %v1568_v18 = vpop.f32.mrf.mxu0  ;;  %1666 = vmatmul.bf16.gmra.mxu1 %v5269_v32 }
 0x13d   :  { %v1628_v19 = vadd.f32 %v1627_v29, %v1568_v18  ;;  %v3459_v29 = vor.u32 %v3910_v55, %v3456_v36  ;;  %v545_v55 = vld [vmem:[%s7164_s4 + $0x480] sm:$0xff]  ;;  %v546_v36 = vld [vmem:[%s7164_s4 + $0x488] sm:$0xff] }
 0x13e   :  { %1784 = vmatmul.bf16.gmra.mxu3 %v5278_v48  ;;  %v3651_v48 = vor.u32 %v3958_v42, %v3648_v10  ;;  %v3926_v42 = vld [vmem:[%s7163_s3 + $0xf4] sm:$0xf]  ;;  %v3520_v10 = vld [vmem:[%s7163_s3 + $0xf8] sm:$0xf0] }
 0x13f   :  { %1607 = vmatmul.bf16.gmra.mxu0 %v5267_v45 }
 0x140   :  { %2031 = vmatpush.bf16.msra.mxu0 %v3459_v29  ;;  %2208 = vmatpush.bf16.msra.mxu3 %v3651_v48  ;;  %v367_v48 = vand.u32 2147483648, %v5198_v40  ;;  %v547_v29 = vld [vmem:[%s7164_s4 + $0x490] sm:$0xff] }
 0x141   :  { %1725 = vmatmul.bf16.gmra.mxu2 %v5271_v33  ;;  %v344_v33 = vmul.f32 %v5241_v47, %v343_v51  ;;  %v1745_v7 = vpop.f32.mrf.mxu3  ;;  %v1629_v57 = vpop.f32.mrf.mxu1  ;;  %v5315_v51 = vor.u32 1.1754944e-38, %v352_v9  ;;  %v374_v9 = vmul.f32 %v5257_v39, %v373_v12  ;;  %v548_v12 = vld [vmem:[%s7164_s4 + $0x498] sm:$0xff]  ;;  %v715_v60 = vmul.f32 %v4680_v2, %v547_v29 }
 0x142   :  { %v382_v29 = vand.u32 2147483648, %v5208_v50 }
 0x144   :  { %v1686_v18 = vpop.f32.mrf.mxu2  ;;  %v1570_v32 = vpop.f32.mrf.mxu0 }
 0x145   :  { %v1687_v6 = vadd.f32 %v1686_v18, %v1628_v19  ;;  %v553_v19 = vld [vmem:[%s7164_s4 + $0x4c0] sm:$0xff]  ;;  %v1630_v30 = vadd.f32 %v1629_v57, %v1570_v32  ;;  %v389_v18 = vmul.f32 %v5261_v11, %v388_v8  ;;  %v554_v32 = vld [vmem:[%s7164_s4 + $0x4c8] sm:$0xff]  ;;  %v345_v57 = vadd.f32 %v5241_v47, %v344_v33  ;;  %v556_v8 = vld [vmem:[%s7164_s4 + $0x4d8] sm:$0xff] }
 0x146   :  { %v713_v33 = vmul.f32 %v4667_v56, %v545_v55  ;;  %v722_v45 = vmul.f32 %v4678_v1, %v554_v32  ;;  %v375_v55 = vadd.f32 %v5257_v39, %v374_v9  ;;  %v380_v32 = vand.u32 2147483647, %v5208_v50 }
 0x147   :  { %v5317_v5 = vadd.f32 %v1745_v7, %v1687_v6  ;;  %v555_v6 = vld [vmem:[%s7164_s4 + $0x4d0] sm:$0xff]  ;;  %v3523_v7 = vor.u32 %v3926_v42, %v3520_v10  ;;  %v721_v42 = vmul.f32 %v4667_v56, %v553_v19  ;;  %v714_v10 = vmul.f32 %v4678_v1, %v546_v36 }
 0x148   :  { %v723_v54 = vmul.f32 %v4680_v2, %v555_v6  ;;  %v390_v56 = vadd.f32 %v5261_v11, %v389_v18  ;;  %v716_v36 = vmul.f32 %v4688_v17, %v548_v12  ;;  %v724_v1 = vmul.f32 %v4688_v17, %v556_v8 }
 0x149   :  { %2090 = vmatpush.bf16.msra.mxu1 %v3523_v7  ;;  %v397_v9 = vand.u32 2147483648, %v5217_v14  ;;  %v1747_v6 = vpop.f32.mrf.mxu3  ;;  %v349_v17 = vsel %vm5362_vm9, %v5241_v47, %v345_v57  ;;  %v395_v8 = vand.u32 2147483647, %v5217_v14  ;;  %v1632_v44 = vpop.f32.mrf.mxu1  ;;  %v5404_v57 = vpack.c.bf16 %v722_v45, %v714_v10 }
 0x14a   :  { %v364_v14 = vsel %vm5374_vm10, %v5249_v38, %v360_v37  ;;  %vm381_vm1 = vcmp.eq.f32.partialorder %v380_v32, 8.507059e+37 }
 0x14b   :  { %7279 = vst [vmem:[#allocation18_spill] sm:$0xff] %v5404_v57  ;;  %v398_v45 = vor.u32 1.1754944e-38, %v397_v9  ;;  %vm396_vm2 = vcmp.eq.f32.partialorder %v395_v8, 8.507059e+37 }
 0x14c   :  { %v1688_v19 = vpop.f32.mrf.mxu2  ;;  %v1573_v7 = vpop.f32.mrf.mxu0  ;;  %1671 = vmatmul.bf16.gmra.mxu1 %v5404_v57 }
 0x14d   :  { %v1689_v18 = vadd.f32 %v1688_v19, %v1630_v30  ;;  %v5394_v30 = vpack.c.bf16 %v721_v42, %v713_v33  ;;  %v1633_v50 = vadd.f32 %v1632_v44, %v1573_v7  ;;  %v5406_v19 = vpack.c.bf16 %v723_v54, %v715_v60  ;;  %v407_v7 = vld [vmem:[%s7164_s4 + $0x30] sm:$0xff] }
 0x14e   :  { %v379_v33 = vsel %vm5388_vm11, %v5257_v39, %v375_v55  ;;  %v394_v42 = vsel %vm5398_vm13, %v5261_v11, %v390_v56  ;;  %v7282_v44 = vand.u32 2147483647, %v5181_v3  ;;  %v368_v54 = vor.u32 1.1754944e-38, %v367_v48 }
 0x14f   :  { %7276 = vst [vmem:[#allocation17_spill] sm:$0xff] %v5394_v30  ;;  %v5402_v47 = vadd.f32 %v1747_v6, %v1689_v18  ;;  %1612 = vmatmul.bf16.gmra.mxu0 %v5394_v30  ;;  %v5418_v18 = vpack.c.bf16 %v724_v1, %v716_v36  ;;  %v383_v60 = vor.u32 1.1754944e-38, %v382_v29  ;;  %v7283_v39 = vand.u32 2147483647, %v5198_v40  ;;  %v413_v40 = vld [vmem:[%s7164_s4 + $0x60] sm:$0xff]  ;;  %v406_v1 = vld [vmem:[%s7164_s4 + $0x28] sm:$0xff] }
 0x150   :  { %7280 = vst [vmem:[#allocation19_spill] sm:$0xff] %v5406_v19  ;;  %vm351_vm14 = vcmp.eq.f32.partialorder %v7282_v44, 8.507059e+37  ;;  %v399_v3 = vsel %vm396_vm2, %v398_v45, %v394_v42  ;;  %v414_v6 = vld [vmem:[%s7164_s4 + $0x68] sm:$0xff]  ;;  %v416_v45 = vld [vmem:[%s7164_s4 + $0x78] sm:$0xff] }
 0x151   :  { %7281 = vst [vmem:[#allocation20_spill] sm:$0xff] %v5418_v18  ;;  %1730 = vmatmul.bf16.gmra.mxu2 %v5406_v19  ;;  %v354_v38 = vsel %vm351_vm14, %v5315_v51, %v349_v17  ;;  %vm366_vm15 = vcmp.eq.f32.partialorder %v7283_v39, 8.507059e+37  ;;  %1789 = vmatmul.bf16.gmra.mxu3 %v5418_v18  ;;  %v384_v37 = vsel %vm381_vm1, %v383_v60, %v379_v33  ;;  %v1750_v56 = vpop.f32.mrf.mxu3  ;;  %v405_v51 = vld [vmem:[%s7164_s4 + $0x20] sm:$0xff]  ;;  %v5443_v29 = vperm.slane %v399_v3, 0  ;;  %v1634_v9 = vpop.f32.mrf.mxu1  ;;  %v415_v17 = vld [vmem:[%s7164_s4 + $0x70] sm:$0xff] }
 0x152   :  { %v369_v11 = vsel %vm366_vm15, %v368_v54, %v364_v14  ;;  %v5428_v48 = vperm.slane %v354_v38, 0  ;;  %v5441_v32 = vperm.slane %v384_v37, 0  ;;  %v3576_v14 = vld [vmem:[%s7163_s3 + $0x168] sm:$0xf0]  ;;  %v3908_v33 = vld [vmem:[%s7163_s3 + $0x64] sm:$0xf] }
 0x153   :  { %v5439_v2 = vperm.slane %v369_v11, 0  ;;  %v3448_v44 = vld [vmem:[%s7163_s3 + $0x68] sm:$0xf0]  ;;  %v3956_v54 = vld [vmem:[%s7163_s3 + $0x1e4] sm:$0xf] }
 0x154   :  { %v1691_v10 = vpop.f32.mrf.mxu2  ;;  %v1575_v36 = vpop.f32.mrf.mxu0  ;;  %v3640_v60 = vld [vmem:[%s7163_s3 + $0x1e8] sm:$0xf0]  ;;  %v3451_v38 = vor.u32 %v3908_v33, %v3448_v44  ;;  %v3924_v11 = vld [vmem:[%s7163_s3 + $0xe4] sm:$0xf]  ;;  %v573_v3 = vmul.f32 %v5428_v48, %v405_v51  ;;  %v576_v33 = vmul.f32 %v5443_v29, %v408_v35  ;;  %v584_v44 = vmul.f32 %v5443_v29, %v416_v45 }
 0x155   :  { %v1692_v55 = vadd.f32 %v1691_v10, %v1633_v50  ;;  %v1635_v8 = vadd.f32 %v1634_v9, %v1575_v36  ;;  %v3940_v50 = vld [vmem:[%s7163_s3 + $0x164] sm:$0xf]  ;;  %v3643_v39 = vor.u32 %v3956_v54, %v3640_v60  ;;  %v3512_v37 = vld [vmem:[%s7163_s3 + $0xe8] sm:$0xf0]  ;;  %v581_v10 = vmul.f32 %v5428_v48, %v413_v40 }
 0x156   :  { %v3579_v42 = vor.u32 %v3940_v50, %v3576_v14  ;;  %v582_v36 = vmul.f32 %v5439_v2, %v414_v6  ;;  %v575_v9 = vmul.f32 %v5441_v32, %v407_v7  ;;  %v583_v50 = vmul.f32 %v5441_v32, %v415_v17  ;;  %2032 = vmatpush.bf16.msra.mxu0 %v3451_v38 }
 0x157   :  { %v5454_v12 = vadd.f32 %v1750_v56, %v1692_v55  ;;  %v574_v55 = vmul.f32 %v5439_v2, %v406_v1  ;;  %v3515_v56 = vor.u32 %v3924_v11, %v3512_v37  ;;  %2209 = vmatpush.bf16.msra.mxu3 %v3643_v39  ;;  %v5503_v38 = vpack.c.bf16 %v584_v44, %v576_v33  ;;  %v421_v11 = vld [vmem:[%s7164_s4 + $0xa0] sm:$0xff]  ;;  %v3568_v33 = vld [vmem:[%s7163_s3 + $0x158] sm:$0xf0]  ;;  %v3906_v44 = vld [vmem:[%s7163_s3 + $0x54] sm:$0xf] }
 0x158   :  { %2150 = vmatpush.bf16.msra.mxu2 %v3579_v42  ;;  %v5494_v42 = vpack.c.bf16 %v581_v10, %v573_v3  ;;  %v5500_v17 = vpack.c.bf16 %v583_v50, %v575_v9  ;;  %v429_v37 = vld [vmem:[%s7164_s4 + $0xe0] sm:$0xff]  ;;  %v422_v3 = vld [vmem:[%s7164_s4 + $0xa8] sm:$0xff] }
 0x159   :  { %2091 = vmatpush.bf16.msra.mxu1 %v3515_v56  ;;  %v1752_v40 = vpop.f32.mrf.mxu3  ;;  %v1637_v1 = vpop.f32.mrf.mxu1  ;;  %v5498_v7 = vpack.c.bf16 %v582_v36, %v574_v55  ;;  %7287 = vst [vmem:[#allocation24_spill] sm:$0xff] %v5503_v38  ;;  %v430_v55 = vld [vmem:[%s7164_s4 + $0xe8] sm:$0xff]  ;;  %v423_v56 = vld [vmem:[%s7164_s4 + $0xb0] sm:$0xff] }
 0x15a   :  { %7284 = vst [vmem:[#allocation21_spill] sm:$0xff] %v5494_v42  ;;  %v431_v36 = vld [vmem:[%s7164_s4 + $0xf0] sm:$0xff] }
 0x15b   :  { %7285 = vst [vmem:[#allocation22_spill] sm:$0xff] %v5498_v7 }
 0x15c   :  { %v1693_v14 = vpop.f32.mrf.mxu2  ;;  %v1578_v54 = vpop.f32.mrf.mxu0  ;;  %7286 = vst [vmem:[#allocation23_spill] sm:$0xff] %v5500_v17  ;;  %1862 = vmatmul.bf16.vlgmr.msrb.gmra.mxu1 %v5498_v7 }
 0x15d   :  { %v1694_v51 = vadd.f32 %v1693_v14, %v1635_v8  ;;  %v1638_v6 = vadd.f32 %v1637_v1, %v1578_v54  ;;  %v3938_v14 = vld [vmem:[%s7163_s3 + $0x154] sm:$0xf]  ;;  %v3632_v1 = vld [vmem:[%s7163_s3 + $0x1d8] sm:$0xf0] }
 0x15e   :  { %v3954_v54 = vld [vmem:[%s7163_s3 + $0x1d4] sm:$0xf] }
 0x15f   :  { %v5496_v60 = vadd.f32 %v1752_v40, %v1694_v51  ;;  %1803 = vmatmul.bf16.vlgmr.msrb.gmra.mxu0 %v5494_v42  ;;  %v3571_v51 = vor.u32 %v3938_v14, %v3568_v33  ;;  %v3440_v40 = vld [vmem:[%s7163_s3 + $0x58] sm:$0xf0]  ;;  %v590_v14 = vmul.f32 %v5439_v2, %v422_v3  ;;  %v598_v33 = vmul.f32 %v5439_v2, %v430_v55 }
 0x161   :  { %1921 = vmatmul.bf16.vlgmr.msrb.gmra.mxu2 %v5500_v17  ;;  %3876 = vmatmul.msk.bf16.vlgmr.msrb.gmra.mxu3 %vm207_vm0, %v5503_v38  ;;  %v1755_v45 = vpop.f32.mrf.mxu3  ;;  %v1639_v10 = vpop.f32.mrf.mxu1  ;;  %v591_v38 = vmul.f32 %v5441_v32, %v423_v56  ;;  %v599_v17 = vmul.f32 %v5441_v32, %v431_v36  ;;  %v3922_v36 = vld [vmem:[%s7163_s3 + $0xd4] sm:$0xf] }
 0x162   :  { %2151 = vmatpush.bf16.msra.mxu2 %v3571_v51  ;;  %v5565_v51 = vpack.c.bf16 %v598_v33, %v590_v14  ;;  %v445_v14 = vld [vmem:[%s7164_s4 + $0x160] sm:$0xff]  ;;  %v438_v33 = vld [vmem:[%s7164_s4 + $0x128] sm:$0xff] }
 0x163   :  { %v5567_v56 = vpack.c.bf16 %v599_v17, %v591_v38 }
 0x164   :  { %v1696_v8 = vpop.f32.mrf.mxu2  ;;  %v1580_v39 = vpop.f32.mrf.mxu0  ;;  %7289 = vst [vmem:[#allocation26_spill] sm:$0xff] %v5565_v51 }
 0x165   :  { %v1697_v35 = vadd.f32 %v1696_v8, %v1638_v6  ;;  %v1640_v50 = vadd.f32 %v1639_v10, %v1580_v39  ;;  %v424_v6 = vld [vmem:[%s7164_s4 + $0xb8] sm:$0xff]  ;;  %v589_v39 = vmul.f32 %v5428_v48, %v421_v11  ;;  %v597_v10 = vmul.f32 %v5428_v48, %v429_v37  ;;  %7290 = vst [vmem:[#allocation27_spill] sm:$0xff] %v5567_v56 }
 0x166   :  { %v432_v8 = vld [vmem:[%s7164_s4 + $0xf8] sm:$0xff]  ;;  %v592_v42 = vmul.f32 %v5443_v29, %v424_v6 }
 0x167   :  { %v5527_v9 = vadd.f32 %v1755_v45, %v1697_v35  ;;  %v3443_v35 = vor.u32 %v3906_v44, %v3440_v40  ;;  %v3635_v45 = vor.u32 %v3954_v54, %v3632_v1  ;;  %v600_v44 = vmul.f32 %v5443_v29, %v432_v8 }
 0x168   :  { %v5561_v1 = vpack.c.bf16 %v597_v10, %v589_v39 }
 0x169   :  { %2033 = vmatpush.bf16.msra.mxu0 %v3443_v35  ;;  %2210 = vmatpush.bf16.msra.mxu3 %v3635_v45  ;;  %v1757_v11 = vpop.f32.mrf.mxu3  ;;  %v1642_v37 = vpop.f32.mrf.mxu1 }
 0x16a   :  { %7288 = vst [vmem:[#allocation25_spill] sm:$0xff] %v5561_v1 }
 0x16c   :  { %v1698_v7 = vpop.f32.mrf.mxu2  ;;  %v1583_v54 = vpop.f32.mrf.mxu0  ;;  %1867 = vmatmul.bf16.gmra.mxu1 %v5565_v51 }
 0x16d   :  { %v1699_v40 = vadd.f32 %v1698_v7, %v1640_v50  ;;  %v1643_v55 = vadd.f32 %v1642_v37, %v1583_v54  ;;  %v3504_v7 = vld [vmem:[%s7163_s3 + $0xd8] sm:$0xf0]  ;;  %v5576_v50 = vpack.c.bf16 %v600_v44, %v592_v42  ;;  %v437_v42 = vld [vmem:[%s7164_s4 + $0x120] sm:$0xff]  ;;  %v446_v44 = vld [vmem:[%s7164_s4 + $0x168] sm:$0xff] }
 0x16e   :  { %v3507_v6 = vor.u32 %v3922_v36, %v3504_v7  ;;  %v440_v54 = vld [vmem:[%s7164_s4 + $0x138] sm:$0xff]  ;;  %v613_v36 = vmul.f32 %v5428_v48, %v445_v14  ;;  %v606_v7 = vmul.f32 %v5439_v2, %v438_v33 }
 0x16f   :  { %v5563_v3 = vadd.f32 %v1757_v11, %v1699_v40  ;;  %1808 = vmatmul.bf16.gmra.mxu0 %v5561_v1  ;;  %7291 = vst [vmem:[#allocation28_spill] sm:$0xff] %v5576_v50  ;;  %v439_v40 = vld [vmem:[%s7164_s4 + $0x130] sm:$0xff]  ;;  %v448_v37 = vld [vmem:[%s7164_s4 + $0x178] sm:$0xff] }
 0x170   :  { %2092 = vmatpush.bf16.msra.mxu1 %v3507_v6  ;;  %v447_v11 = vld [vmem:[%s7164_s4 + $0x170] sm:$0xff]  ;;  %v614_v6 = vmul.f32 %v5439_v2, %v446_v44 }
 0x171   :  { %1926 = vmatmul.bf16.gmra.mxu2 %v5567_v56  ;;  %3877 = vmatmul.msk.bf16.gmra.mxu3 %vm207_vm0, %v5576_v50  ;;  %v1760_v8 = vpop.f32.mrf.mxu3  ;;  %v1644_v45 = vpop.f32.mrf.mxu1 }
 0x172   :  { %v5620_v18 = vpack.c.bf16 %v614_v6, %v606_v7  ;;  %v3496_v7 = vld [vmem:[%s7163_s3 + $0xc8] sm:$0xf0] }
 0x174   :  { %v1701_v17 = vpop.f32.mrf.mxu2  ;;  %v1585_v35 = vpop.f32.mrf.mxu0  ;;  %7293 = vst [vmem:[#allocation30_spill] sm:$0xff] %v5620_v18 }
 0x175   :  { %v1702_v38 = vadd.f32 %v1701_v17, %v1643_v55  ;;  %v1645_v10 = vadd.f32 %v1644_v45, %v1585_v35  ;;  %v605_v55 = vmul.f32 %v5428_v48, %v437_v42  ;;  %v607_v17 = vmul.f32 %v5441_v32, %v439_v40  ;;  %v3936_v40 = vld [vmem:[%s7163_s3 + $0x144] sm:$0xf] }
 0x176   :  { %v608_v35 = vmul.f32 %v5443_v29, %v440_v54  ;;  %v616_v45 = vmul.f32 %v5443_v29, %v448_v37  ;;  %v3624_v54 = vld [vmem:[%s7163_s3 + $0x1c8] sm:$0xf0] }
 0x177   :  { %v5582_v39 = vadd.f32 %v1760_v8, %v1702_v38  ;;  %v615_v38 = vmul.f32 %v5441_v32, %v447_v11  ;;  %v5616_v42 = vpack.c.bf16 %v613_v36, %v605_v55  ;;  %v3904_v11 = vld [vmem:[%s7163_s3 + $0x44] sm:$0xf] }
 0x178   :  { %v3920_v36 = vld [vmem:[%s7163_s3 + $0xc4] sm:$0xf] }
 0x179   :  { %v1762_v56 = vpop.f32.mrf.mxu3  ;;  %v1647_v1 = vpop.f32.mrf.mxu1  ;;  %7292 = vst [vmem:[#allocation29_spill] sm:$0xff] %v5616_v42  ;;  %v5622_v44 = vpack.c.bf16 %v615_v38, %v607_v17  ;;  %v3499_v6 = vor.u32 %v3920_v36, %v3496_v7 }
 0x17b   :  { %7294 = vst [vmem:[#allocation31_spill] sm:$0xff] %v5622_v44  ;;  %2093 = vmatpush.bf16.msra.mxu1 %v3499_v6 }
 0x17c   :  { %v1703_v8 = vpop.f32.mrf.mxu2  ;;  %v1588_v51 = vpop.f32.mrf.mxu0  ;;  %1872 = vmatmul.bf16.gmra.mxu1 %v5620_v18 }
 0x17d   :  { %v1704_v50 = vadd.f32 %v1703_v8, %v1645_v10  ;;  %v1648_v33 = vadd.f32 %v1647_v1, %v1588_v51  ;;  %v3560_v10 = vld [vmem:[%s7163_s3 + $0x148] sm:$0xf0] }
 0x17e   :  { %v3563_v1 = vor.u32 %v3936_v40, %v3560_v10  ;;  %v3432_v51 = vld [vmem:[%s7163_s3 + $0x48] sm:$0xf0] }
 0x17f   :  { %v5618_v14 = vadd.f32 %v1762_v56, %v1704_v50  ;;  %1813 = vmatmul.bf16.gmra.mxu0 %v5616_v42  ;;  %v5634_v56 = vpack.c.bf16 %v616_v45, %v608_v35  ;;  %v3952_v50 = vld [vmem:[%s7163_s3 + $0x1c4] sm:$0xf]  ;;  %v3435_v37 = vor.u32 %v3904_v11, %v3432_v51  ;;  %v454_v51 = vld [vmem:[%s7164_s4 + $0x1a8] sm:$0xff] }
 0x180   :  { %v3627_v55 = vor.u32 %v3952_v50, %v3624_v54  ;;  %2152 = vmatpush.bf16.msra.mxu2 %v3563_v1  ;;  %v453_v11 = vld [vmem:[%s7164_s4 + $0x1a0] sm:$0xff]  ;;  %v455_v50 = vld [vmem:[%s7164_s4 + $0x1b0] sm:$0xff]  ;;  %v622_v6 = vmul.f32 %v5439_v2, %v454_v51 }
 0x181   :  { %7295 = vst [vmem:[#allocation32_spill] sm:$0xff] %v5634_v56  ;;  %1931 = vmatmul.bf16.gmra.mxu2 %v5622_v44  ;;  %3878 = vmatmul.msk.bf16.gmra.mxu3 %vm207_vm0, %v5634_v56  ;;  %v1765_v8 = vpop.f32.mrf.mxu3  ;;  %v1649_v45 = vpop.f32.mrf.mxu1  ;;  %v461_v1 = vld [vmem:[%s7164_s4 + $0x1e0] sm:$0xff]  ;;  %v463_v54 = vld [vmem:[%s7164_s4 + $0x1f0] sm:$0xff]  ;;  %v621_v36 = vmul.f32 %v5428_v48, %v453_v11 }
 0x182   :  { %2034 = vmatpush.bf16.msra.mxu0 %v3435_v37  ;;  %2211 = vmatpush.bf16.msra.mxu3 %v3627_v55  ;;  %v456_v37 = vld [vmem:[%s7164_s4 + $0x1b8] sm:$0xff]  ;;  %v629_v7 = vmul.f32 %v5428_v48, %v461_v1 }
 0x183   :  { %v464_v55 = vld [vmem:[%s7164_s4 + $0x1f8] sm:$0xff] }
 0x184   :  { %v1706_v17 = vpop.f32.mrf.mxu2  ;;  %v1590_v35 = vpop.f32.mrf.mxu0  ;;  %v632_v56 = vmul.f32 %v5443_v29, %v464_v55  ;;  %v5689_v11 = vpack.c.bf16 %v629_v7, %v621_v36 }
 0x185   :  { %v1707_v38 = vadd.f32 %v1706_v17, %v1648_v33  ;;  %v1650_v10 = vadd.f32 %v1649_v45, %v1590_v35  ;;  %v462_v33 = vld [vmem:[%s7164_s4 + $0x1e8] sm:$0xff]  ;;  %v624_v45 = vmul.f32 %v5443_v29, %v456_v37 }
 0x186   :  { %v630_v17 = vmul.f32 %v5439_v2, %v462_v33  ;;  %7296 = vst [vmem:[#allocation33_spill] sm:$0xff] %v5689_v11 }
 0x187   :  { %v5655_v40 = vadd.f32 %v1765_v8, %v1707_v38  ;;  %v623_v38 = vmul.f32 %v5441_v32, %v455_v50  ;;  %v631_v8 = vmul.f32 %v5441_v32, %v463_v54  ;;  %v5698_v50 = vpack.c.bf16 %v632_v56, %v624_v45  ;;  %v3424_v56 = vld [vmem:[%s7163_s3 + $0x38] sm:$0xf0] }
 0x188   :  { %v5693_v57 = vpack.c.bf16 %v630_v17, %v622_v6  ;;  %v3616_v54 = vld [vmem:[%s7163_s3 + $0x1b8] sm:$0xf0] }
 0x189   :  { %v1767_v18 = vpop.f32.mrf.mxu3  ;;  %v1652_v19 = vpop.f32.mrf.mxu1  ;;  %v5695_v33 = vpack.c.bf16 %v631_v8, %v623_v38  ;;  %7299 = vst [vmem:[#allocation36_spill] sm:$0xff] %v5698_v50  ;;  %v469_v8 = vld [vmem:[%s7164_s4 + $0x220] sm:$0xff] }
 0x18a   :  { %7297 = vst [vmem:[#allocation34_spill] sm:$0xff] %v5693_v57 }
 0x18b   :  { %7298 = vst [vmem:[#allocation35_spill] sm:$0xff] %v5695_v33 }
 0x18c   :  { %v1708_v35 = vpop.f32.mrf.mxu2  ;;  %v1593_v42 = vpop.f32.mrf.mxu0  ;;  %1877 = vmatmul.bf16.gmra.mxu1 %v5693_v57 }
 0x18d   :  { %v1709_v44 = vadd.f32 %v1708_v35, %v1650_v10  ;;  %v1653_v51 = vadd.f32 %v1652_v19, %v1593_v42  ;;  %v3552_v19 = vld [vmem:[%s7163_s3 + $0x138] sm:$0xf0]  ;;  %v3902_v42 = vld [vmem:[%s7163_s3 + $0x34] sm:$0xf]  ;;  %v477_v35 = vld [vmem:[%s7164_s4 + $0x260] sm:$0xff] }
 0x18e   :  { %v3950_v10 = vld [vmem:[%s7163_s3 + $0x1b4] sm:$0xf]  ;;  %v3427_v55 = vor.u32 %v3902_v42, %v3424_v56  ;;  %v3488_v42 = vld [vmem:[%s7163_s3 + $0xb8] sm:$0xf0] }
 0x18f   :  { %v5691_v1 = vadd.f32 %v1767_v18, %v1709_v44  ;;  %1818 = vmatmul.bf16.gmra.mxu0 %v5689_v11  ;;  %v3934_v18 = vld [vmem:[%s7163_s3 + $0x134] sm:$0xf]  ;;  %v3619_v36 = vor.u32 %v3950_v10, %v3616_v54 }
 0x190   :  { %v3555_v44 = vor.u32 %v3934_v18, %v3552_v19  ;;  %2035 = vmatpush.bf16.msra.mxu0 %v3427_v55  ;;  %v3918_v19 = vld [vmem:[%s7163_s3 + $0xb4] sm:$0xf]  ;;  %v480_v55 = vld [vmem:[%s7164_s4 + $0x278] sm:$0xff] }
 0x191   :  { %1936 = vmatmul.bf16.gmra.mxu2 %v5695_v33  ;;  %3879 = vmatmul.msk.bf16.gmra.mxu3 %vm207_vm0, %v5698_v50  ;;  %v1770_v6 = vpop.f32.mrf.mxu3  ;;  %v1654_v38 = vpop.f32.mrf.mxu1  ;;  %v471_v56 = vld [vmem:[%s7164_s4 + $0x230] sm:$0xff]  ;;  %v3491_v54 = vor.u32 %v3918_v19, %v3488_v42  ;;  %v648_v33 = vmul.f32 %v5443_v29, %v480_v55  ;;  %v494_v55 = vld [vmem:[%s7164_s4 + $0x2e8] sm:$0xff] }
 0x192   :  { %2153 = vmatpush.bf16.msra.mxu2 %v3555_v44  ;;  %2212 = vmatpush.bf16.msra.mxu3 %v3619_v36  ;;  %v478_v44 = vld [vmem:[%s7164_s4 + $0x268] sm:$0xff]  ;;  %v479_v10 = vld [vmem:[%s7164_s4 + $0x270] sm:$0xff]  ;;  %v637_v36 = vmul.f32 %v5428_v48, %v469_v8  ;;  %v662_v20 = vmul.f32 %v5439_v2, %v494_v55 }
 0x193   :  { %2094 = vmatpush.bf16.msra.mxu1 %v3491_v54  ;;  %v647_v19 = vmul.f32 %v5441_v32, %v479_v10 }
 0x194   :  { %v1711_v37 = vpop.f32.mrf.mxu2  ;;  %v1595_v17 = vpop.f32.mrf.mxu0 }
 0x195   :  { %v1712_v7 = vadd.f32 %v1711_v37, %v1653_v51  ;;  %v1655_v18 = vadd.f32 %v1654_v38, %v1595_v17  ;;  %v470_v51 = vld [vmem:[%s7164_s4 + $0x228] sm:$0xff]  ;;  %v472_v37 = vld [vmem:[%s7164_s4 + $0x238] sm:$0xff]  ;;  %v646_v17 = vmul.f32 %v5439_v2, %v478_v44  ;;  %v639_v38 = vmul.f32 %v5441_v32, %v471_v56 }
 0x196   :  { %v640_v50 = vmul.f32 %v5443_v29, %v472_v37 }
 0x197   :  { %v5728_v45 = vadd.f32 %v1770_v6, %v1712_v7  ;;  %v645_v7 = vmul.f32 %v5428_v48, %v477_v35  ;;  %v638_v6 = vmul.f32 %v5439_v2, %v470_v51  ;;  %v5768_v44 = vpack.c.bf16 %v647_v19, %v639_v38  ;;  %v488_v38 = vld [vmem:[%s7164_s4 + $0x2b8] sm:$0xff]  ;;  %v3932_v19 = vld [vmem:[%s7163_s3 + $0x124] sm:$0xf] }
 0x198   :  { %v5771_v56 = vpack.c.bf16 %v648_v33, %v640_v50  ;;  %v493_v33 = vld [vmem:[%s7164_s4 + $0x2e0] sm:$0xff]  ;;  %v486_v50 = vld [vmem:[%s7164_s4 + $0x2a8] sm:$0xff] }
 0x199   :  { %v1772_v11 = vpop.f32.mrf.mxu3  ;;  %v1657_v8 = vpop.f32.mrf.mxu1  ;;  %v5762_v46 = vpack.c.bf16 %v645_v7, %v637_v36  ;;  %v5766_v54 = vpack.c.bf16 %v646_v17, %v638_v6  ;;  %7302 = vst [vmem:[#allocation39_spill] sm:$0xff] %v5768_v44  ;;  %v487_v36 = vld [vmem:[%s7164_s4 + $0x2b0] sm:$0xff] }
 0x19a   :  { %7303 = vst [vmem:[#allocation40_spill] sm:$0xff] %v5771_v56  ;;  %v495_v7 = vld [vmem:[%s7164_s4 + $0x2f0] sm:$0xff] }
 0x19b   :  { %7300 = vst [vmem:[#allocation37_spill] sm:$0xff] %v5762_v46 }
 0x19c   :  { %v1713_v42 = vpop.f32.mrf.mxu2  ;;  %v1598_v30 = vpop.f32.mrf.mxu0  ;;  %7301 = vst [vmem:[#allocation38_spill] sm:$0xff] %v5766_v54  ;;  %1882 = vmatmul.bf16.gmra.mxu1 %v5766_v54  ;;  %v661_v54 = vmul.f32 %v5428_v48, %v493_v33 }
 0x19d   :  { %v1714_v57 = vadd.f32 %v1713_v42, %v1655_v18  ;;  %v1658_v51 = vadd.f32 %v1657_v8, %v1598_v30  ;;  %v485_v30 = vld [vmem:[%s7164_s4 + $0x2a0] sm:$0xff]  ;;  %v3544_v42 = vld [vmem:[%s7163_s3 + $0x128] sm:$0xf0] }
 0x19e   :  { %v3900_v8 = vld [vmem:[%s7163_s3 + $0x24] sm:$0xf] }
 0x19f   :  { %v5764_v35 = vadd.f32 %v1772_v11, %v1714_v57  ;;  %1823 = vmatmul.bf16.gmra.mxu0 %v5762_v46  ;;  %v654_v46 = vmul.f32 %v5439_v2, %v486_v50 }
 0x1a1   :  { %1941 = vmatmul.bf16.gmra.mxu2 %v5768_v44  ;;  %3880 = vmatmul.msk.bf16.gmra.mxu3 %vm207_vm0, %v5771_v56  ;;  %v1775_v57 = vpop.f32.mrf.mxu3  ;;  %v1659_v37 = vpop.f32.mrf.mxu1  ;;  %v653_v44 = vmul.f32 %v5428_v48, %v485_v30 }
 0x1a4   :  { %v1716_v18 = vpop.f32.mrf.mxu2  ;;  %v1600_v11 = vpop.f32.mrf.mxu0 }
 0x1a5   :  { %v1717_v10 = vadd.f32 %v1716_v18, %v1658_v51  ;;  %v1660_v17 = vadd.f32 %v1659_v37, %v1600_v11  ;;  %v3547_v51 = vor.u32 %v3932_v19, %v3544_v42  ;;  %v3416_v18 = vld [vmem:[%s7163_s3 + $0x28] sm:$0xf0]  ;;  %v496_v11 = vld [vmem:[%s7164_s4 + $0x2f8] sm:$0xff]  ;;  %v3916_v19 = vld [vmem:[%s7163_s3 + $0xa4] sm:$0xf] }
 0x1a6   :  { %v3419_v37 = vor.u32 %v3900_v8, %v3416_v18  ;;  %v3480_v42 = vld [vmem:[%s7163_s3 + $0xa8] sm:$0xf0]  ;;  %v655_v8 = vmul.f32 %v5441_v32, %v487_v36  ;;  %v663_v18 = vmul.f32 %v5441_v32, %v495_v7  ;;  %v664_v53 = vmul.f32 %v5443_v29, %v496_v11  ;;  %v503_v11 = vld [vmem:[%s7164_s4 + $0x330] sm:$0xff] }
 0x1a7   :  { %v5795_v6 = vadd.f32 %v1775_v57, %v1717_v10  ;;  %v3948_v10 = vld [vmem:[%s7163_s3 + $0x1a4] sm:$0xf]  ;;  %v3608_v57 = vld [vmem:[%s7163_s3 + $0x1a8] sm:$0xf0]  ;;  %2154 = vmatpush.bf16.msra.mxu2 %v3547_v51  ;;  %v3483_v43 = vor.u32 %v3916_v19, %v3480_v42  ;;  %v5835_v51 = vpack.c.bf16 %v661_v54, %v653_v44  ;;  %v5839_v36 = vpack.c.bf16 %v662_v20, %v654_v46 }
 0x1a8   :  { %v3611_v56 = vor.u32 %v3948_v10, %v3608_v57  ;;  %2036 = vmatpush.bf16.msra.mxu0 %v3419_v37  ;;  %v656_v57 = vmul.f32 %v5443_v29, %v488_v38  ;;  %v5841_v7 = vpack.c.bf16 %v663_v18, %v655_v8  ;;  %v502_v20 = vld [vmem:[%s7164_s4 + $0x328] sm:$0xff]  ;;  %v511_v37 = vld [vmem:[%s7164_s4 + $0x370] sm:$0xff] }
 0x1a9   :  { %2095 = vmatpush.bf16.msra.mxu1 %v3483_v43  ;;  %v1777_v33 = vpop.f32.mrf.mxu3  ;;  %v1662_v50 = vpop.f32.mrf.mxu1  ;;  %7304 = vst [vmem:[#allocation41_spill] sm:$0xff] %v5835_v51  ;;  %v510_v38 = vld [vmem:[%s7164_s4 + $0x368] sm:$0xff]  ;;  %v3930_v18 = vld [vmem:[%s7163_s3 + $0x114] sm:$0xf] }
 0x1aa   :  { %2213 = vmatpush.bf16.msra.mxu3 %v3611_v56  ;;  %7305 = vst [vmem:[#allocation42_spill] sm:$0xff] %v5839_v36  ;;  %v5844_v56 = vpack.c.bf16 %v664_v53, %v656_v57  ;;  %v509_v53 = vld [vmem:[%s7164_s4 + $0x360] sm:$0xff]  ;;  %v3898_v57 = vld [vmem:[%s7163_s3 + $0x14] sm:$0xf] }
 0x1ab   :  { %7306 = vst [vmem:[#allocation43_spill] sm:$0xff] %v5841_v7 }
 0x1ac   :  { %v1718_v10 = vpop.f32.mrf.mxu2  ;;  %v1603_v49 = vpop.f32.mrf.mxu0  ;;  %7307 = vst [vmem:[#allocation44_spill] sm:$0xff] %v5844_v56  ;;  %1887 = vmatmul.bf16.gmra.mxu1 %v5839_v36  ;;  %v679_v36 = vmul.f32 %v5441_v32, %v511_v37  ;;  %v3914_v37 = vld [vmem:[%s7163_s3 + $0x94] sm:$0xf] }
 0x1ad   :  { %v1719_v30 = vadd.f32 %v1718_v10, %v1660_v17  ;;  %v1663_v55 = vadd.f32 %v1662_v50, %v1603_v49  ;;  %v501_v49 = vld [vmem:[%s7164_s4 + $0x320] sm:$0xff]  ;;  %v3536_v10 = vld [vmem:[%s7163_s3 + $0x118] sm:$0xf0]  ;;  %v3946_v50 = vld [vmem:[%s7163_s3 + $0x194] sm:$0xf] }
 0x1af   :  { %v5837_v19 = vadd.f32 %v1777_v33, %v1719_v30  ;;  %1828 = vmatmul.bf16.gmra.mxu0 %v5835_v51  ;;  %v3539_v30 = vor.u32 %v3930_v18, %v3536_v10  ;;  %v3408_v33 = vld [vmem:[%s7163_s3 + $0x18] sm:$0xf0]  ;;  %v677_v18 = vmul.f32 %v5428_v48, %v509_v53  ;;  %v670_v10 = vmul.f32 %v5439_v2, %v502_v20 }
 0x1b1   :  { %1946 = vmatmul.bf16.gmra.mxu2 %v5841_v7  ;;  %3881 = vmatmul.msk.bf16.gmra.mxu3 %vm207_vm0, %v5844_v56  ;;  %v1780_v44 = vpop.f32.mrf.mxu3  ;;  %v1664_v46 = vpop.f32.mrf.mxu1  ;;  %v678_v56 = vmul.f32 %v5439_v2, %v510_v38  ;;  %v671_v7 = vmul.f32 %v5441_v32, %v503_v11 }
 0x1b2   :  { %2155 = vmatpush.bf16.msra.mxu2 %v3539_v30 }
 0x1b3   :  { %v5906_v30 = vpack.c.bf16 %v678_v56, %v670_v10  ;;  %v5908_v11 = vpack.c.bf16 %v679_v36, %v671_v7  ;;  %v518_v10 = vld [vmem:[%s7164_s4 + $0x3a8] sm:$0xff] }
 0x1b4   :  { %v1721_v43 = vpop.f32.mrf.mxu2  ;;  %v1605_v17 = vpop.f32.mrf.mxu0 }
 0x1b5   :  { %v1722_v54 = vadd.f32 %v1721_v43, %v1663_v55  ;;  %v1665_v8 = vadd.f32 %v1664_v46, %v1605_v17  ;;  %v3600_v55 = vld [vmem:[%s7163_s3 + $0x198] sm:$0xf0]  ;;  %v669_v46 = vmul.f32 %v5428_v48, %v501_v49  ;;  %7309 = vst [vmem:[#allocation46_spill] sm:$0xff] %v5906_v30 }
 0x1b6   :  { %v504_v43 = vld [vmem:[%s7164_s4 + $0x338] sm:$0xff]  ;;  %v3603_v17 = vor.u32 %v3946_v50, %v3600_v55  ;;  %7310 = vst [vmem:[#allocation47_spill] sm:$0xff] %v5908_v11 }
 0x1b7   :  { %v5868_v42 = vadd.f32 %v1780_v44, %v1722_v54  ;;  %v512_v54 = vld [vmem:[%s7164_s4 + $0x378] sm:$0xff]  ;;  %v3411_v44 = vor.u32 %v3898_v57, %v3408_v33  ;;  %v672_v52 = vmul.f32 %v5443_v29, %v504_v43  ;;  %v5902_v55 = vpack.c.bf16 %v677_v18, %v669_v46  ;;  %v525_v18 = vld [vmem:[%s7164_s4 + $0x3e0] sm:$0xff] }
 0x1b8   :  { %2214 = vmatpush.bf16.msra.mxu3 %v3603_v17  ;;  %v680_v57 = vmul.f32 %v5443_v29, %v512_v54 }
 0x1b9   :  { %2037 = vmatpush.bf16.msra.mxu0 %v3411_v44  ;;  %v1782_v49 = vpop.f32.mrf.mxu3  ;;  %v1667_v53 = vpop.f32.mrf.mxu1  ;;  %7308 = vst [vmem:[#allocation45_spill] sm:$0xff] %v5902_v55 }
 0x1bc   :  { %v1723_v51 = vpop.f32.mrf.mxu2  ;;  %v1608_v50 = vpop.f32.mrf.mxu0  ;;  %1892 = vmatmul.bf16.gmra.mxu1 %v5906_v30 }
 0x1bd   :  { %v1724_v33 = vadd.f32 %v1723_v51, %v1665_v8  ;;  %v1668_v38 = vadd.f32 %v1667_v53, %v1608_v50  ;;  %v3472_v51 = vld [vmem:[%s7163_s3 + $0x98] sm:$0xf0]  ;;  %v5917_v8 = vpack.c.bf16 %v680_v57, %v672_v52  ;;  %v517_v52 = vld [vmem:[%s7164_s4 + $0x3a0] sm:$0xff]  ;;  %v526_v57 = vld [vmem:[%s7164_s4 + $0x3e8] sm:$0xff] }
 0x1be   :  { %v3475_v43 = vor.u32 %v3914_v37, %v3472_v51  ;;  %v520_v50 = vld [vmem:[%s7164_s4 + $0x3b8] sm:$0xff]  ;;  %v693_v37 = vmul.f32 %v5428_v48, %v525_v18  ;;  %v686_v51 = vmul.f32 %v5439_v2, %v518_v10 }
 0x1bf   :  { %v5904_v20 = vadd.f32 %v1782_v49, %v1724_v33  ;;  %1833 = vmatmul.bf16.gmra.mxu0 %v5902_v55  ;;  %7311 = vst [vmem:[#allocation48_spill] sm:$0xff] %v5917_v8  ;;  %v519_v33 = vld [vmem:[%s7164_s4 + $0x3b0] sm:$0xff]  ;;  %v528_v53 = vld [vmem:[%s7164_s4 + $0x3f8] sm:$0xff] }
 0x1c0   :  { %2096 = vmatpush.bf16.msra.mxu1 %v3475_v43  ;;  %v527_v49 = vld [vmem:[%s7164_s4 + $0x3f0] sm:$0xff]  ;;  %v694_v43 = vmul.f32 %v5439_v2, %v526_v57 }
 0x1c1   :  { %1951 = vmatmul.bf16.gmra.mxu2 %v5908_v11  ;;  %3882 = vmatmul.msk.bf16.gmra.mxu3 %vm207_vm0, %v5917_v8  ;;  %v1785_v56 = vpop.f32.mrf.mxu3  ;;  %v1669_v44 = vpop.f32.mrf.mxu1 }
 0x1c4   :  { %v1726_v36 = vpop.f32.mrf.mxu2  ;;  %v1610_v54 = vpop.f32.mrf.mxu0 }
 0x1c5   :  { %v1727_v7 = vadd.f32 %v1726_v36, %v1668_v38  ;;  %v1670_v46 = vadd.f32 %v1669_v44, %v1610_v54  ;;  %v685_v38 = vmul.f32 %v5428_v48, %v517_v52  ;;  %v687_v36 = vmul.f32 %v5441_v32, %v519_v33  ;;  %v3928_v33 = vld [vmem:[%s7163_s3 + $0x104] sm:$0xf] }
 0x1c6   :  { %v688_v54 = vmul.f32 %v5443_v29, %v520_v50  ;;  %v696_v44 = vmul.f32 %v5443_v29, %v528_v53  ;;  %v3592_v53 = vld [vmem:[%s7163_s3 + $0x188] sm:$0xf0] }
 0x1c7   :  { %v5923_v17 = vadd.f32 %v1785_v56, %v1727_v7  ;;  %v695_v7 = vmul.f32 %v5441_v32, %v527_v49  ;;  %v5957_v52 = vpack.c.bf16 %v693_v37, %v685_v38  ;;  %v3912_v37 = vld [vmem:[%s7163_s3 + $0x84] sm:$0xf] }
 0x1c8   :  { %v5972_v49 = vpack.c.bf16 %v696_v44, %v688_v54 }
 0x1c9   :  { %7312 = vst [vmem:[#allocation49_spill] sm:$0xff] %v5923_v17  ;;  %v1787_v11 = vpop.f32.mrf.mxu3  ;;  %v1672_v55 = vpop.f32.mrf.mxu1  ;;  %v5961_v17 = vpack.c.bf16 %v694_v43, %v686_v51  ;;  %v5963_v57 = vpack.c.bf16 %v695_v7, %v687_v36  ;;  %v3464_v51 = vld [vmem:[%s7163_s3 + $0x88] sm:$0xf0] }
 0x1ca   :  { %7313 = vst [vmem:[#allocation50_spill] sm:$0xff] %v5957_v52  ;;  %v3467_v43 = vor.u32 %v3912_v37, %v3464_v51 }
 0x1cb   :  { %7314 = vst [vmem:[#allocation51_spill] sm:$0xff] %v5961_v17 }
 0x1cc   :  { %v1728_v56 = vpop.f32.mrf.mxu2  ;;  %v1613_v30 = vpop.f32.mrf.mxu0  ;;  %7315 = vst [vmem:[#allocation52_spill] sm:$0xff] %v5963_v57  ;;  %1897 = vmatmul.bf16.gmra.mxu1 %v5961_v17 }
 0x1cd   :  { %v1729_v8 = vadd.f32 %v1728_v56, %v1670_v46  ;;  %v1673_v10 = vadd.f32 %v1672_v55, %v1613_v30  ;;  %v3528_v46 = vld [vmem:[%s7163_s3 + $0x108] sm:$0xf0]  ;;  %7316 = vst [vmem:[#allocation53_spill] sm:$0xff] %v5972_v49  ;;  %v3896_v55 = vld [vmem:[%s7163_s3 + $0x4] sm:$0xf]  ;;  %2097 = vmatpush.bf16.msra.mxu1 %v3467_v43 }
 0x1ce   :  { %v3531_v50 = vor.u32 %v3928_v33, %v3528_v46  ;;  %v3400_v30 = vld [vmem:[%s7163_s3 + $0x8] sm:$0xf0] }
 0x1cf   :  { %v5959_v18 = vadd.f32 %v1787_v11, %v1729_v8  ;;  %1838 = vmatmul.bf16.gmra.mxu0 %v5957_v52  ;;  %v3944_v11 = vld [vmem:[%s7163_s3 + $0x184] sm:$0xf]  ;;  %v3403_v8 = vor.u32 %v3896_v55, %v3400_v30  ;;  %v534_v30 = vld [vmem:[%s7164_s4 + $0x428] sm:$0xff] }
 0x1d0   :  { %2156 = vmatpush.bf16.msra.mxu2 %v3531_v50  ;;  %v3595_v38 = vor.u32 %v3944_v11, %v3592_v53  ;;  %v533_v50 = vld [vmem:[%s7164_s4 + $0x420] sm:$0xff]  ;;  %v535_v11 = vld [vmem:[%s7164_s4 + $0x430] sm:$0xff]  ;;  %v536_v53 = vld [vmem:[%s7164_s4 + $0x438] sm:$0xff]  ;;  %v702_v43 = vmul.f32 %v5439_v2, %v534_v30 }
 0x1d1   :  { %1956 = vmatmul.bf16.gmra.mxu2 %v5963_v57  ;;  %3883 = vmatmul.msk.bf16.gmra.mxu3 %vm207_vm0, %v5972_v49  ;;  %v1674_v44 = vpop.f32.mrf.mxu1  ;;  %v541_v55 = vld [vmem:[%s7164_s4 + $0x460] sm:$0xff]  ;;  %v701_v37 = vmul.f32 %v5428_v48, %v533_v50 }
 0x1d2   :  { %2038 = vmatpush.bf16.msra.mxu0 %v3403_v8  ;;  %2215 = vmatpush.bf16.msra.mxu3 %v3595_v38  ;;  %v543_v8 = vld [vmem:[%s7164_s4 + $0x470] sm:$0xff]  ;;  %v544_v38 = vld [vmem:[%s7164_s4 + $0x478] sm:$0xff]  ;;  %v709_v51 = vmul.f32 %v5428_v48, %v541_v55 }
 0x1d3   :  { %v712_v49 = vmul.f32 %v5443_v29, %v544_v38 }
 0x1d4   :  { %v1731_v36 = vpop.f32.mrf.mxu2  ;;  %v1790_v56 = vpop.f32.mrf.mxu3  ;;  %v6031_v55 = vpack.c.bf16 %v709_v51, %v701_v37 }
 0x1d5   :  { %v1732_v7 = vadd.f32 %v1731_v36, %v1673_v10  ;;  %v1615_v54 = vpop.f32.mrf.mxu0  ;;  %v542_v10 = vld [vmem:[%s7164_s4 + $0x468] sm:$0xff] }
 0x1d6   :  { %v1675_v46 = vadd.f32 %v1674_v44, %v1615_v54  ;;  %v710_v36 = vmul.f32 %v5439_v2, %v542_v10  ;;  %v704_v44 = vmul.f32 %v5443_v29, %v536_v53 }
 0x1d7   :  { %v5996_v33 = vadd.f32 %v1790_v56, %v1732_v7  ;;  %v703_v7 = vmul.f32 %v5441_v32, %v535_v11  ;;  %v711_v56 = vmul.f32 %v5441_v32, %v543_v8 }
 0x1d8   :  { %v6035_v10 = vpack.c.bf16 %v710_v36, %v702_v43  ;;  %v6040_v53 = vpack.c.bf16 %v712_v49, %v704_v44  ;;  %v3712_v49 = vld [vmem:[%s7163_s3 + $0x278] sm:$0xf0]  ;;  %v549_v44 = vld [vmem:[%s7164_s4 + $0x4a0] sm:$0xff] }
 0x1d9   :  { %7317 = vst [vmem:[#allocation54_spill] sm:$0xff] %v5996_v33  ;;  %v1863_v33 = vpop.f32.mrf.mxu1  ;;  %v6037_v11 = vpack.c.bf16 %v711_v56, %v703_v7 }
 0x1da   :  { %7318 = vst [vmem:[#allocation55_spill] sm:$0xff] %v6035_v10 }
 0x1db   :  { %7319 = vst [vmem:[#allocation56_spill] sm:$0xff] %v6037_v11 }
 0x1dc   :  { %v1733_v54 = vpop.f32.mrf.mxu2  ;;  %v1792_v17 = vpop.f32.mrf.mxu3  ;;  %7320 = vst [vmem:[#allocation57_spill] sm:$0xff] %v6040_v53  ;;  %1902 = vmatmul.bf16.gmra.mxu1 %v6035_v10 }
 0x1dd   :  { %v1734_v57 = vadd.f32 %v1733_v54, %v1675_v46  ;;  %v1804_v52 = vpop.f32.mrf.mxu0  ;;  %v3872_v46 = vld [vmem:[%s7163_s3 + $0x3b8] sm:$0xf0] }
 0x1de   :  { %v1805_v50 = vadd.f32 %v1804_v52, %v5317_v5  ;;  %v4006_v5 = vld [vmem:[%s7163_s3 + $0x374] sm:$0xf] }
 0x1df   :  { %v6033_v30 = vadd.f32 %v1792_v17, %v1734_v57  ;;  %1843 = vmatmul.bf16.gmra.mxu0 %v6031_v55  ;;  %v3840_v17 = vld [vmem:[%s7163_s3 + $0x378] sm:$0xf0]  ;;  %v3974_v52 = vld [vmem:[%s7163_s3 + $0x274] sm:$0xf] }
 0x1e0   :  { %v1864_v8 = vadd.f32 %v1863_v33, %v1805_v50  ;;  %v3843_v57 = vor.u32 %v4006_v5, %v3840_v17  ;;  %v4014_v33 = vld [vmem:[%s7163_s3 + $0x3b4] sm:$0xf]  ;;  %v3715_v37 = vor.u32 %v3974_v52, %v3712_v49  ;;  %v557_v50 = vld [vmem:[%s7164_s4 + $0x4e0] sm:$0xff]  ;;  %v3776_v17 = vld [vmem:[%s7163_s3 + $0x2f8] sm:$0xf0] }
 0x1e1   :  { %1961 = vmatmul.bf16.gmra.mxu2 %v6037_v11  ;;  %3884 = vmatmul.msk.bf16.gmra.mxu3 %vm207_vm0, %v6040_v53  ;;  %v3875_v51 = vor.u32 %v4014_v33, %v3872_v46  ;;  %v1865_v54 = vpop.f32.mrf.mxu1  ;;  %v551_v49 = vld [vmem:[%s7164_s4 + $0x4b0] sm:$0xff] }
 0x1e2   :  { %2385 = vmatpush.bf16.msrb.mxu2 %v3843_v57  ;;  %2267 = vmatpush.bf16.msrb.mxu0 %v3715_v37  ;;  %v558_v57 = vld [vmem:[%s7164_s4 + $0x4e8] sm:$0xff]  ;;  %v559_v33 = vld [vmem:[%s7164_s4 + $0x4f0] sm:$0xff]  ;;  %v560_v37 = vld [vmem:[%s7164_s4 + $0x4f8] sm:$0xff] }
 0x1e3   :  { %2448 = vmatpush.bf16.msrb.mxu3 %v3875_v51  ;;  %v717_v51 = vmul.f32 %v5428_v48, %v549_v44 }
 0x1e4   :  { %v1922_v38 = vpop.f32.mrf.mxu2  ;;  %v1981_v36 = vpop.f32.mrf.mxu3 }
 0x1e5   :  { %v1923_v43 = vadd.f32 %v1922_v38, %v1864_v8  ;;  %v1806_v7 = vpop.f32.mrf.mxu0  ;;  %v550_v8 = vld [vmem:[%s7164_s4 + $0x4a8] sm:$0xff]  ;;  %v552_v38 = vld [vmem:[%s7164_s4 + $0x4b8] sm:$0xff] }
 0x1e6   :  { %v1807_v56 = vadd.f32 %v1806_v7, %v5402_v47  ;;  %v3990_v47 = vld [vmem:[%s7163_s3 + $0x2f4] sm:$0xf]  ;;  %v726_v7 = vmul.f32 %v5439_v2, %v558_v57 }
 0x1e7   :  { %v6071_v5 = vadd.f32 %v1981_v36, %v1923_v43  ;;  %v3779_v46 = vor.u32 %v3990_v47, %v3776_v17  ;;  %v725_v43 = vmul.f32 %v5428_v48, %v557_v50  ;;  %v718_v36 = vmul.f32 %v5439_v2, %v550_v8 }
 0x1e8   :  { %v1866_v52 = vadd.f32 %v1865_v54, %v1807_v56  ;;  %v719_v56 = vmul.f32 %v5441_v32, %v551_v49  ;;  %v727_v54 = vmul.f32 %v5441_v32, %v559_v33  ;;  %v720_v17 = vmul.f32 %v5443_v29, %v552_v38 }
 0x1e9   :  { %7321 = vst [vmem:[#allocation58_spill] sm:$0xff] %v6071_v5  ;;  %2326 = vmatpush.bf16.msrb.mxu1 %v3779_v46  ;;  %v728_v5 = vmul.f32 %v5443_v29, %v560_v37  ;;  %v1868_v48 = vpop.f32.mrf.mxu1  ;;  %v6106_v50 = vpack.c.bf16 %v725_v43, %v717_v51  ;;  %v6110_v2 = vpack.c.bf16 %v726_v7, %v718_v36  ;;  %v3832_v46 = vld [vmem:[%s7163_s3 + $0x368] sm:$0xf0]  ;;  %v3972_v51 = vld [vmem:[%s7163_s3 + $0x264] sm:$0xf] }
 0x1ea   :  { %v6112_v57 = vpack.c.bf16 %v727_v54, %v719_v56  ;;  %v3988_v43 = vld [vmem:[%s7163_s3 + $0x2e4] sm:$0xf]  ;;  %v3768_v7 = vld [vmem:[%s7163_s3 + $0x2e8] sm:$0xf0] }
 0x1eb   :  { %v6115_v49 = vpack.c.bf16 %v728_v5, %v720_v17  ;;  %v4004_v5 = vld [vmem:[%s7163_s3 + $0x364] sm:$0xf]  ;;  %v3771_v56 = vor.u32 %v3988_v43, %v3768_v7 }
 0x1ec   :  { %v1924_v47 = vpop.f32.mrf.mxu2  ;;  %v1983_v11 = vpop.f32.mrf.mxu3  ;;  %1907 = vmatmul.bf16.gmra.mxu1 %v6110_v2  ;;  %v3835_v37 = vor.u32 %v4004_v5, %v3832_v46 }
 0x1ed   :  { %v1925_v53 = vadd.f32 %v1924_v47, %v1866_v52  ;;  %v1809_v10 = vpop.f32.mrf.mxu0  ;;  %2327 = vmatpush.bf16.msrb.mxu1 %v3771_v56 }
 0x1ee   :  { %v1810_v44 = vadd.f32 %v1809_v10, %v5454_v12  ;;  %2386 = vmatpush.bf16.msrb.mxu2 %v3835_v37  ;;  %v4012_v37 = vld [vmem:[%s7163_s3 + $0x3a4] sm:$0xf] }
 0x1ef   :  { %v6108_v8 = vadd.f32 %v1983_v11, %v1925_v53  ;;  %1848 = vmatmul.bf16.gmra.mxu0 %v6106_v50 }
 0x1f0   :  { %v1869_v32 = vadd.f32 %v1868_v48, %v1810_v44 }
 0x1f1   :  { %1966 = vmatmul.bf16.gmra.mxu2 %v6112_v57  ;;  %3885 = vmatmul.msk.bf16.gmra.mxu3 %vm207_vm0, %v6115_v49  ;;  %v1870_v52 = vpop.f32.mrf.mxu1 }
 0x1f4   :  { %v1927_v29 = vpop.f32.mrf.mxu2  ;;  %v1986_v10 = vpop.f32.mrf.mxu3 }
 0x1f5   :  { %v1928_v12 = vadd.f32 %v1927_v29, %v1869_v32  ;;  %v1811_v11 = vpop.f32.mrf.mxu0 }
 0x1f6   :  { %v1812_v53 = vadd.f32 %v1811_v11, %v5496_v60  ;;  %v3704_v60 = vld [vmem:[%s7163_s3 + $0x268] sm:$0xf0] }
 0x1f7   :  { %v6122_v33 = vadd.f32 %v1986_v10, %v1928_v12  ;;  %v3707_v36 = vor.u32 %v3972_v51, %v3704_v60  ;;  %v3864_v51 = vld [vmem:[%s7163_s3 + $0x3a8] sm:$0xf0] }
 0x1f8   :  { %v1871_v38 = vadd.f32 %v1870_v52, %v1812_v53  ;;  %v3867_v43 = vor.u32 %v4012_v37, %v3864_v51 }
 0x1f9   :  { %2268 = vmatpush.bf16.msrb.mxu0 %v3707_v36  ;;  %v1873_v32 = vpop.f32.mrf.mxu1 }
 0x1fa   :  { %2449 = vmatpush.bf16.msrb.mxu3 %v3867_v43 }
 0x1fc   :  { %v1929_v54 = vpop.f32.mrf.mxu2  ;;  %v1988_v17 = vpop.f32.mrf.mxu3  ;;  %2098 = vmatmul.bf16.vlgmr.msra.gmra.mxu1 %v4745_v13  ;;  %v3824_v13 = vld [vmem:[%s7163_s3 + $0x358] sm:$0xf0] }
 0x1fd   :  { %v1930_v47 = vadd.f32 %v1929_v54, %v1871_v38  ;;  %v1814_v44 = vpop.f32.mrf.mxu0 }
 0x1fe   :  { %v1815_v48 = vadd.f32 %v1814_v44, %v5527_v9 }
 0x1ff   :  { %v6143_v29 = vadd.f32 %v1988_v17, %v1930_v47  ;;  %2039 = vmatmul.bf16.vlgmr.msra.gmra.mxu0 %v4736_v62  ;;  %v4002_v62 = vld [vmem:[%s7163_s3 + $0x354] sm:$0xf] }
 0x200   :  { %v1874_v12 = vadd.f32 %v1873_v32, %v1815_v48  ;;  %v3986_v48 = vld [vmem:[%s7163_s3 + $0x2d4] sm:$0xf]  ;;  %v3760_v32 = vld [vmem:[%s7163_s3 + $0x2d8] sm:$0xf0] }
 0x201   :  { %2157 = vmatmul.bf16.vlgmr.msra.gmra.mxu2 %v4747_v15  ;;  %2216 = vmatmul.bf16.vlgmr.msra.gmra.mxu3 %v4749_v61  ;;  %v1875_v46 = vpop.f32.mrf.mxu1  ;;  %v3970_v15 = vld [vmem:[%s7163_s3 + $0x254] sm:$0xf]  ;;  %v3827_v61 = vor.u32 %v4002_v62, %v3824_v13 }
 0x203   :  { %2387 = vmatpush.bf16.msrb.mxu2 %v3827_v61 }
 0x204   :  { %v1932_v10 = vpop.f32.mrf.mxu2  ;;  %v1991_v53 = vpop.f32.mrf.mxu3 }
 0x205   :  { %v1933_v11 = vadd.f32 %v1932_v10, %v1874_v12  ;;  %v1816_v52 = vpop.f32.mrf.mxu0  ;;  %v3763_v10 = vor.u32 %v3986_v48, %v3760_v32 }
 0x206   :  { %v1817_v5 = vadd.f32 %v1816_v52, %v5563_v3  ;;  %v3696_v3 = vld [vmem:[%s7163_s3 + $0x258] sm:$0xf0] }
 0x207   :  { %v6150_v9 = vadd.f32 %v1991_v53, %v1933_v11  ;;  %v3699_v60 = vor.u32 %v3970_v15, %v3696_v3  ;;  %2328 = vmatpush.bf16.msrb.mxu1 %v3763_v10 }
 0x208   :  { %v1876_v38 = vadd.f32 %v1875_v46, %v1817_v5 }
 0x209   :  { %2269 = vmatpush.bf16.msrb.mxu0 %v3699_v60  ;;  %v1878_v17 = vpop.f32.mrf.mxu1  ;;  %v3968_v60 = vld [vmem:[%s7163_s3 + $0x244] sm:$0xf] }
 0x20c   :  { %v1934_v36 = vpop.f32.mrf.mxu2  ;;  %v1993_v56 = vpop.f32.mrf.mxu3  ;;  %2103 = vmatmul.bf16.gmra.mxu1 %v4831_v27 }
 0x20d   :  { %v1935_v7 = vadd.f32 %v1934_v36, %v1876_v38  ;;  %v1819_v54 = vpop.f32.mrf.mxu0  ;;  %v3752_v36 = vld [vmem:[%s7163_s3 + $0x2c8] sm:$0xf0] }
 0x20e   :  { %v1820_v47 = vadd.f32 %v1819_v54, %v5582_v39 }
 0x20f   :  { %v6171_v44 = vadd.f32 %v1993_v56, %v1935_v7  ;;  %2044 = vmatmul.bf16.gmra.mxu0 %v4829_v23 }
 0x210   :  { %v1879_v12 = vadd.f32 %v1878_v17, %v1820_v47 }
 0x211   :  { %2162 = vmatmul.bf16.gmra.mxu2 %v4833_v28  ;;  %2221 = vmatmul.bf16.gmra.mxu3 %v4836_v63  ;;  %v1880_v46 = vpop.f32.mrf.mxu1  ;;  %v4000_v63 = vld [vmem:[%s7163_s3 + $0x344] sm:$0xf] }
 0x214   :  { %v1937_v39 = vpop.f32.mrf.mxu2  ;;  %v1996_v53 = vpop.f32.mrf.mxu3 }
 0x215   :  { %v1938_v11 = vadd.f32 %v1937_v39, %v1879_v12  ;;  %v1821_v52 = vpop.f32.mrf.mxu0 }
 0x216   :  { %v1822_v5 = vadd.f32 %v1821_v52, %v5618_v14  ;;  %v3816_v14 = vld [vmem:[%s7163_s3 + $0x348] sm:$0xf0] }
 0x217   :  { %v6184_v38 = vadd.f32 %v1996_v53, %v1938_v11  ;;  %v3819_v51 = vor.u32 %v4000_v63, %v3816_v14 }
 0x218   :  { %v1881_v62 = vadd.f32 %v1880_v46, %v1822_v5  ;;  %v3966_v46 = vld [vmem:[%s7163_s3 + $0x234] sm:$0xf] }
 0x219   :  { %v1883_v28 = vpop.f32.mrf.mxu1  ;;  %2388 = vmatpush.bf16.msrb.mxu2 %v3819_v51  ;;  %v3744_v51 = vld [vmem:[%s7163_s3 + $0x2b8] sm:$0xf0] }
 0x21c   :  { %v1939_v13 = vpop.f32.mrf.mxu2  ;;  %v1998_v15 = vpop.f32.mrf.mxu3  ;;  %2108 = vmatmul.bf16.gmra.mxu1 %v4887_v34 }
 0x21d   :  { %v1940_v23 = vadd.f32 %v1939_v13, %v1881_v62  ;;  %v1824_v61 = vpop.f32.mrf.mxu0 }
 0x21e   :  { %v1825_v27 = vadd.f32 %v1824_v61, %v5655_v40  ;;  %v3688_v40 = vld [vmem:[%s7163_s3 + $0x248] sm:$0xf0] }
 0x21f   :  { %v6187_v3 = vadd.f32 %v1998_v15, %v1940_v23  ;;  %2049 = vmatmul.bf16.gmra.mxu0 %v4885_v58  ;;  %v3691_v43 = vor.u32 %v3968_v60, %v3688_v40  ;;  %v3984_v58 = vld [vmem:[%s7163_s3 + $0x2c4] sm:$0xf] }
 0x220   :  { %v1884_v37 = vadd.f32 %v1883_v28, %v1825_v27  ;;  %v3755_v7 = vor.u32 %v3984_v58, %v3752_v36 }
 0x221   :  { %2167 = vmatmul.bf16.gmra.mxu2 %v4889_v59  ;;  %2226 = vmatmul.bf16.gmra.mxu3 %v4892_v0  ;;  %v1885_v17 = vpop.f32.mrf.mxu1 }
 0x222   :  { %2270 = vmatpush.bf16.msrb.mxu0 %v3691_v43  ;;  %2329 = vmatpush.bf16.msrb.mxu1 %v3755_v7 }
 0x224   :  { %v1942_v56 = vpop.f32.mrf.mxu2  ;;  %v2001_v47 = vpop.f32.mrf.mxu3 }
 0x225   :  { %v1943_v54 = vadd.f32 %v1942_v56, %v1884_v37  ;;  %v1826_v34 = vpop.f32.mrf.mxu0  ;;  %v3982_v37 = vld [vmem:[%s7163_s3 + $0x2b4] sm:$0xf] }
 0x226   :  { %v1827_v59 = vadd.f32 %v1826_v34, %v5691_v1  ;;  %v3998_v1 = vld [vmem:[%s7163_s3 + $0x334] sm:$0xf]  ;;  %v3747_v40 = vor.u32 %v3982_v37, %v3744_v51 }
 0x227   :  { %v6212_v0 = vadd.f32 %v2001_v47, %v1943_v54 }
 0x228   :  { %v1886_v48 = vadd.f32 %v1885_v17, %v1827_v59  ;;  %2330 = vmatpush.bf16.msrb.mxu1 %v3747_v40  ;;  %v3792_v40 = vld [vmem:[%s7163_s3 + $0x318] sm:$0xf0] }
 0x229   :  { %v1888_v53 = vpop.f32.mrf.mxu1 }
 0x22c   :  { %v1944_v32 = vpop.f32.mrf.mxu2  ;;  %v2003_v10 = vpop.f32.mrf.mxu3  ;;  %2113 = vmatmul.bf16.gmra.mxu1 %v4937_v21  ;;  %v4010_v21 = vld [vmem:[%s7163_s3 + $0x394] sm:$0xf] }
 0x22d   :  { %v1945_v12 = vadd.f32 %v1944_v32, %v1886_v48  ;;  %v1829_v39 = vpop.f32.mrf.mxu0 }
 0x22e   :  { %v1830_v11 = vadd.f32 %v1829_v39, %v5728_v45  ;;  %v3808_v45 = vld [vmem:[%s7163_s3 + $0x338] sm:$0xf0]  ;;  %v3980_v39 = vld [vmem:[%s7163_s3 + $0x2a4] sm:$0xf] }
 0x22f   :  { %v6215_v52 = vadd.f32 %v2003_v10, %v1945_v12  ;;  %2054 = vmatmul.bf16.gmra.mxu0 %v4935_v16  ;;  %v3811_v62 = vor.u32 %v3998_v1, %v3808_v45  ;;  %v3680_v16 = vld [vmem:[%s7163_s3 + $0x238] sm:$0xf0]  ;;  %v3996_v10 = vld [vmem:[%s7163_s3 + $0x324] sm:$0xf] }
 0x230   :  { %v1889_v5 = vadd.f32 %v1888_v53, %v1830_v11  ;;  %v3683_v13 = vor.u32 %v3966_v46, %v3680_v16  ;;  %v3736_v53 = vld [vmem:[%s7163_s3 + $0x2a8] sm:$0xf0] }
 0x231   :  { %2172 = vmatmul.bf16.gmra.mxu2 %v4939_v22  ;;  %2231 = vmatmul.bf16.gmra.mxu3 %v4942_v4  ;;  %v3856_v22 = vld [vmem:[%s7163_s3 + $0x398] sm:$0xf0]  ;;  %v1890_v63 = vpop.f32.mrf.mxu1 }
 0x232   :  { %v3859_v23 = vor.u32 %v4010_v21, %v3856_v22  ;;  %2389 = vmatpush.bf16.msrb.mxu2 %v3811_v62  ;;  %2271 = vmatpush.bf16.msrb.mxu0 %v3683_v13  ;;  %v7322_v13 = vld [vmem:[#allocation2_spill] sm:$0xff] }
 0x234   :  { %v1947_v4 = vpop.f32.mrf.mxu2  ;;  %v2006_v61 = vpop.f32.mrf.mxu3  ;;  %2450 = vmatpush.bf16.msrb.mxu3 %v3859_v23  ;;  %v7323_v23 = vld [vmem:[#allocation3_spill] sm:$0xff] }
 0x235   :  { %v1948_v15 = vadd.f32 %v1947_v4, %v1889_v5  ;;  %v1831_v27 = vpop.f32.mrf.mxu0  ;;  %v3739_v5 = vor.u32 %v3980_v39, %v3736_v53  ;;  %v7327_v39 = vld [vmem:[#allocation6_spill] sm:$0xff]  ;;  %v7329_v53 = vld [vmem:[#allocation8_spill] sm:$0xff] }
 0x236   :  { %v1832_v28 = vadd.f32 %v1831_v27, %v5764_v35 }
 0x237   :  { %v6240_v14 = vadd.f32 %v2006_v61, %v1948_v15  ;;  %2331 = vmatpush.bf16.msrb.mxu1 %v3739_v5  ;;  %v7324_v15 = vld [vmem:[#allocation4_spill] sm:$0xff] }
 0x238   :  { %v1891_v60 = vadd.f32 %v1890_v63, %v1832_v28 }
 0x239   :  { %v1893_v56 = vpop.f32.mrf.mxu1 }
 0x23c   :  { %v1949_v43 = vpop.f32.mrf.mxu2  ;;  %v2008_v36 = vpop.f32.mrf.mxu3  ;;  %2118 = vmatmul.bf16.gmra.mxu1 %v5005_v25 }
 0x23d   :  { %v1950_v58 = vadd.f32 %v1949_v43, %v1891_v60  ;;  %v1834_v35 = vpop.f32.mrf.mxu0  ;;  %v3962_v43 = vld [vmem:[%s7163_s3 + $0x214] sm:$0xf] }
 0x23e   :  { %v1835_v7 = vadd.f32 %v1834_v35, %v5795_v6  ;;  %v3848_v35 = vld [vmem:[%s7163_s3 + $0x388] sm:$0xf0] }
 0x23f   :  { %v6249_v54 = vadd.f32 %v2008_v36, %v1950_v58  ;;  %2059 = vmatmul.bf16.gmra.mxu0 %v5003_v24  ;;  %v3800_v24 = vld [vmem:[%s7163_s3 + $0x328] sm:$0xf0]  ;;  %v4008_v36 = vld [vmem:[%s7163_s3 + $0x384] sm:$0xf] }
 0x240   :  { %v1894_v47 = vadd.f32 %v1893_v56, %v1835_v7  ;;  %v3851_v56 = vor.u32 %v4008_v36, %v3848_v35  ;;  %v7333_v36 = vld [vmem:[#allocation11_spill] sm:$0xff] }
 0x241   :  { %2177 = vmatmul.bf16.gmra.mxu2 %v5007_v31  ;;  %2236 = vmatmul.bf16.gmra.mxu3 %v5010_v26  ;;  %v1895_v12 = vpop.f32.mrf.mxu1  ;;  %v3803_v31 = vor.u32 %v3996_v10, %v3800_v24  ;;  %v3964_v26 = vld [vmem:[%s7163_s3 + $0x224] sm:$0xf]  ;;  %v3978_v24 = vld [vmem:[%s7163_s3 + $0x294] sm:$0xf] }
 0x242   :  { %2451 = vmatpush.bf16.msrb.mxu3 %v3851_v56  ;;  %v3976_v56 = vld [vmem:[%s7163_s3 + $0x284] sm:$0xf] }
 0x243   :  { %2390 = vmatpush.bf16.msrb.mxu2 %v3803_v31 }
 0x244   :  { %v1952_v34 = vpop.f32.mrf.mxu2  ;;  %v2011_v17 = vpop.f32.mrf.mxu3 }
 0x245   :  { %v1953_v59 = vadd.f32 %v1952_v34, %v1894_v47  ;;  %v1836_v48 = vpop.f32.mrf.mxu0 }
 0x246   :  { %v1837_v32 = vadd.f32 %v1836_v48, %v5837_v19  ;;  %v3672_v19 = vld [vmem:[%s7163_s3 + $0x228] sm:$0xf0]  ;;  %v7325_v48 = vld [vmem:[#allocation49_spill] sm:$0xff] }
 0x247   :  { %v6256_v6 = vadd.f32 %v2011_v17, %v1953_v59  ;;  %v3675_v11 = vor.u32 %v3964_v26, %v3672_v19  ;;  %v7326_v26 = vld [vmem:[#allocation5_spill] sm:$0xff] }
 0x248   :  { %v1896_v25 = vadd.f32 %v1895_v12, %v1837_v32 }
 0x249   :  { %2272 = vmatpush.bf16.msrb.mxu0 %v3675_v11  ;;  %v1898_v21 = vpop.f32.mrf.mxu1  ;;  %v7328_v11 = vld [vmem:[#allocation7_spill] sm:$0xff] }
 0x24c   :  { %v1954_v1 = vpop.f32.mrf.mxu2  ;;  %v2013_v46 = vpop.f32.mrf.mxu3  ;;  %2123 = vmatmul.bf16.gmra.mxu1 %v7322_v13 }
 0x24d   :  { %v1955_v45 = vadd.f32 %v1954_v1, %v1896_v25  ;;  %v1839_v62 = vpop.f32.mrf.mxu0  ;;  %v3728_v25 = vld [vmem:[%s7163_s3 + $0x298] sm:$0xf0] }
 0x24e   :  { %v1840_v16 = vadd.f32 %v1839_v62, %v5868_v42  ;;  %v3731_v19 = vor.u32 %v3978_v24, %v3728_v25 }
 0x24f   :  { %v6277_v22 = vadd.f32 %v2013_v46, %v1955_v45  ;;  %2064 = vmatmul.bf16.gmra.mxu0 %v5065_v41  ;;  %v3994_v41 = vld [vmem:[%s7163_s3 + $0x314] sm:$0xf] }
 0x250   :  { %v1899_v4 = vadd.f32 %v1898_v21, %v1840_v16  ;;  %v3795_v58 = vor.u32 %v3994_v41, %v3792_v40  ;;  %2332 = vmatpush.bf16.msrb.mxu1 %v3731_v19  ;;  %v7331_v40 = vld [vmem:[#allocation9_spill] sm:$0xff] }
 0x251   :  { %2182 = vmatmul.bf16.gmra.mxu2 %v7323_v23  ;;  %2241 = vmatmul.bf16.gmra.mxu3 %v7324_v15  ;;  %v1900_v51 = vpop.f32.mrf.mxu1 }
 0x252   :  { %2391 = vmatpush.bf16.msrb.mxu2 %v3795_v58  ;;  %v3656_v58 = vld [vmem:[%s7163_s3 + $0x208] sm:$0xf0] }
 0x254   :  { %v1957_v61 = vpop.f32.mrf.mxu2  ;;  %v2016_v28 = vpop.f32.mrf.mxu3 }
 0x255   :  { %v1958_v27 = vadd.f32 %v1957_v61, %v1899_v4  ;;  %v1841_v63 = vpop.f32.mrf.mxu0 }
 0x256   :  { %v1842_v37 = vadd.f32 %v1841_v63, %v5904_v20  ;;  %v3664_v20 = vld [vmem:[%s7163_s3 + $0x218] sm:$0xf0] }
 0x257   :  { %v6284_v42 = vadd.f32 %v2016_v28, %v1958_v27  ;;  %v3667_v7 = vor.u32 %v3962_v43, %v3664_v20  ;;  %v7330_v27 = vld [vmem:[#allocation54_spill] sm:$0xff] }
 0x258   :  { %v1901_v60 = vadd.f32 %v1900_v51, %v1842_v37  ;;  %v3992_v51 = vld [vmem:[%s7163_s3 + $0x304] sm:$0xf] }
 0x259   :  { %2273 = vmatpush.bf16.msrb.mxu0 %v3667_v7  ;;  %v1903_v12 = vpop.f32.mrf.mxu1  ;;  %v7332_v20 = vld [vmem:[#allocation10_spill] sm:$0xff]  ;;  %v7334_v7 = vld [vmem:[#allocation12_spill] sm:$0xff] }
 0x25c   :  { %v1959_v47 = vpop.f32.mrf.mxu2  ;;  %v2018_v59 = vpop.f32.mrf.mxu3  ;;  %2128 = vmatmul.bf16.gmra.mxu1 %v7327_v39 }
 0x25d   :  { %v1960_v34 = vadd.f32 %v1959_v47, %v1901_v60  ;;  %v1844_v17 = vpop.f32.mrf.mxu0  ;;  %v3960_v60 = vld [vmem:[%s7163_s3 + $0x204] sm:$0xf]  ;;  %v3720_v47 = vld [vmem:[%s7163_s3 + $0x288] sm:$0xf0] }
 0x25e   :  { %v1845_v32 = vadd.f32 %v1844_v17, %v7325_v48  ;;  %v3659_v35 = vor.u32 %v3960_v60, %v3656_v58  ;;  %v7340_v58 = vld [vmem:[#allocation18_spill] sm:$0xff] }
 0x25f   :  { %v6305_v10 = vadd.f32 %v2018_v59, %v1960_v34  ;;  %2069 = vmatmul.bf16.gmra.mxu0 %v7326_v26  ;;  %v3723_v34 = vor.u32 %v3976_v56, %v3720_v47 }
 0x260   :  { %v1904_v31 = vadd.f32 %v1903_v12, %v1845_v32  ;;  %2274 = vmatpush.bf16.msrb.mxu0 %v3659_v35 }
 0x261   :  { %2187 = vmatmul.bf16.gmra.mxu2 %v7328_v11  ;;  %2246 = vmatmul.bf16.gmra.mxu3 %v7329_v53  ;;  %v1905_v16 = vpop.f32.mrf.mxu1 }
 0x262   :  { %2333 = vmatpush.bf16.msrb.mxu1 %v3723_v34 }
 0x264   :  { %v1962_v5 = vpop.f32.mrf.mxu2  ;;  %v2021_v45 = vpop.f32.mrf.mxu3 }
 0x265   :  { %v1963_v1 = vadd.f32 %v1962_v5, %v1904_v31  ;;  %v1846_v46 = vpop.f32.mrf.mxu0 }
 0x266   :  { %v1847_v62 = vadd.f32 %v1846_v46, %v5959_v18  ;;  %v3784_v18 = vld [vmem:[%s7163_s3 + $0x308] sm:$0xf0]  ;;  %v7336_v46 = vld [vmem:[#allocation14_spill] sm:$0xff] }
 0x267   :  { %v6318_v21 = vadd.f32 %v2021_v45, %v1963_v1  ;;  %v3787_v43 = vor.u32 %v3992_v51, %v3784_v18  ;;  %v7335_v45 = vld [vmem:[#allocation13_spill] sm:$0xff] }
 0x268   :  { %v1906_v4 = vadd.f32 %v1905_v16, %v1847_v62  ;;  %v7337_v62 = vld [vmem:[#allocation15_spill] sm:$0xff]  ;;  %v7338_v16 = vld [vmem:[#allocation16_spill] sm:$0xff] }
 0x269   :  { %v1908_v63 = vpop.f32.mrf.mxu1  ;;  %2392 = vmatpush.bf16.msrb.mxu2 %v3787_v43  ;;  %v7339_v43 = vld [vmem:[#allocation17_spill] sm:$0xff] }
 0x26c   :  { %v1964_v13 = vpop.f32.mrf.mxu2  ;;  %v2023_v15 = vpop.f32.mrf.mxu3  ;;  %2133 = vmatmul.bf16.gmra.mxu1 %v7332_v20  ;;  %v7341_v20 = vld [vmem:[#allocation19_spill] sm:$0xff] }
 0x26d   :  { %v1965_v23 = vadd.f32 %v1964_v13, %v1906_v4  ;;  %v1849_v61 = vpop.f32.mrf.mxu0 }
 0x26e   :  { %v1850_v28 = vadd.f32 %v1849_v61, %v7330_v27 }
 0x26f   :  { %v6321_v37 = vadd.f32 %v2023_v15, %v1965_v23  ;;  %2074 = vmatmul.bf16.gmra.mxu0 %v7331_v40 }
 0x270   :  { %v1909_v41 = vadd.f32 %v1908_v63, %v1850_v28 }
 0x271   :  { %2192 = vmatmul.bf16.gmra.mxu2 %v7333_v36  ;;  %2251 = vmatmul.bf16.gmra.mxu3 %v7334_v7  ;;  %v1910_v24 = vpop.f32.mrf.mxu1  ;;  %v7342_v36 = vld [vmem:[#allocation20_spill] sm:$0xff] }
 0x274   :  { %v1967_v59 = vpop.f32.mrf.mxu2  ;;  %v2026_v48 = vpop.f32.mrf.mxu3 }
 0x275   :  { %v1968_v17 = vadd.f32 %v1967_v59, %v1909_v41  ;;  %v1851_v32 = vpop.f32.mrf.mxu0 }
 0x276   :  { %v1852_v12 = vadd.f32 %v1851_v32, %v6033_v30 }
 0x277   :  { %v6346_v25 = vadd.f32 %v2026_v48, %v1968_v17 }
 0x278   :  { %v1911_v31 = vadd.f32 %v1910_v24, %v1852_v12 }
 0x279   :  { %v2099_v53 = vpop.f32.mrf.mxu1 }
 0x27c   :  { %v1969_v26 = vpop.f32.mrf.mxu2  ;;  %v2028_v39 = vpop.f32.mrf.mxu3  ;;  %2138 = vmatmul.bf16.gmra.mxu1 %v7336_v46 }
 0x27d   :  { %v1970_v19 = vadd.f32 %v1969_v26, %v1911_v31  ;;  %v2040_v11 = vpop.f32.mrf.mxu0 }
 0x27e   :  { %v2100_v1 = vadd.f32 %v2099_v53, %v2040_v11  ;;  %v7344_v11 = vld [vmem:[#allocation22_spill] sm:$0xff]  ;;  %v7345_v53 = vld [vmem:[#allocation23_spill] sm:$0xff] }
 0x27f   :  { %v6348_v5 = vadd.f32 %v2028_v39, %v1970_v19  ;;  %2079 = vmatmul.bf16.gmra.mxu0 %v7335_v45  ;;  %v7343_v39 = vld [vmem:[#allocation21_spill] sm:$0xff] }
 0x281   :  { %2197 = vmatmul.bf16.gmra.mxu2 %v7337_v62  ;;  %2256 = vmatmul.bf16.gmra.mxu3 %v7338_v16  ;;  %v2101_v15 = vpop.f32.mrf.mxu1 }
 0x284   :  { %v2158_v30 = vpop.f32.mrf.mxu2  ;;  %v2217_v13 = vpop.f32.mrf.mxu3 }
 0x285   :  { %v2159_v4 = vadd.f32 %v2158_v30, %v2100_v1  ;;  %v2042_v23 = vpop.f32.mrf.mxu0  ;;  %v7346_v1 = vld [vmem:[#allocation24_spill] sm:$0xff] }
 0x286   :  { %v2102_v27 = vadd.f32 %v2101_v15, %v2042_v23 }
 0x287   :  { %v6354_v61 = vadd.f32 %v2217_v13, %v2159_v4 }
 0x289   :  { %v2104_v60 = vpop.f32.mrf.mxu1 }
 0x28c   :  { %v2160_v28 = vpop.f32.mrf.mxu2  ;;  %v2219_v51 = vpop.f32.mrf.mxu3  ;;  %2143 = vmatmul.bf16.gmra.mxu1 %v7340_v58  ;;  %v7350_v58 = vld [vmem:[#allocation28_spill] sm:$0xff] }
 0x28d   :  { %v2161_v63 = vadd.f32 %v2160_v28, %v2102_v27  ;;  %v2045_v18 = vpop.f32.mrf.mxu0 }
 0x28e   :  { %v2105_v40 = vadd.f32 %v2104_v60, %v2045_v18  ;;  %v7347_v60 = vld [vmem:[#allocation25_spill] sm:$0xff] }
 0x28f   :  { %v6356_v41 = vadd.f32 %v2219_v51, %v2161_v63  ;;  %2084 = vmatmul.bf16.gmra.mxu0 %v7339_v43  ;;  %v7349_v43 = vld [vmem:[#allocation27_spill] sm:$0xff] }
 0x291   :  { %2202 = vmatmul.bf16.gmra.mxu2 %v7341_v20  ;;  %2261 = vmatmul.bf16.gmra.mxu3 %v7342_v36  ;;  %v2106_v34 = vpop.f32.mrf.mxu1 }
 0x294   :  { %v2163_v35 = vpop.f32.mrf.mxu2  ;;  %v2222_v56 = vpop.f32.mrf.mxu3 }
 0x295   :  { %v2164_v7 = vadd.f32 %v2163_v35, %v2105_v40  ;;  %v2047_v47 = vpop.f32.mrf.mxu0  ;;  %v7348_v40 = vld [vmem:[#allocation26_spill] sm:$0xff] }
 0x296   :  { %v2107_v17 = vadd.f32 %v2106_v34, %v2047_v47 }
 0x297   :  { %v6362_v59 = vadd.f32 %v2222_v56, %v2164_v7 }
 0x299   :  { %v2109_v31 = vpop.f32.mrf.mxu1 }
 0x29c   :  { %v2165_v48 = vpop.f32.mrf.mxu2  ;;  %v2224_v12 = vpop.f32.mrf.mxu3  ;;  %2334 = vmatmul.bf16.vlgmr.msrb.gmra.mxu1 %v7344_v11  ;;  %v7352_v11 = vld [vmem:[#allocation30_spill] sm:$0xff] }
 0x29d   :  { %v2166_v32 = vadd.f32 %v2165_v48, %v2107_v17  ;;  %v2050_v24 = vpop.f32.mrf.mxu0 }
 0x29e   :  { %v2110_v19 = vadd.f32 %v2109_v31, %v2050_v24 }
 0x29f   :  { %v6364_v26 = vadd.f32 %v2224_v12, %v2166_v32  ;;  %2275 = vmatmul.bf16.vlgmr.msrb.gmra.mxu0 %v7343_v39  ;;  %v7351_v39 = vld [vmem:[#allocation29_spill] sm:$0xff] }
 0x2a1   :  { %2393 = vmatmul.bf16.vlgmr.msrb.gmra.mxu2 %v7345_v53  ;;  %3886 = vmatmul.msk.bf16.vlgmr.msrb.gmra.mxu3 %vm207_vm0, %v7346_v1  ;;  %v2111_v30 = vpop.f32.mrf.mxu1  ;;  %v7353_v53 = vld [vmem:[#allocation31_spill] sm:$0xff]  ;;  %v7354_v1 = vld [vmem:[#allocation32_spill] sm:$0xff] }
 0x2a4   :  { %v2168_v45 = vpop.f32.mrf.mxu2  ;;  %v2227_v62 = vpop.f32.mrf.mxu3 }
 0x2a5   :  { %v2169_v46 = vadd.f32 %v2168_v45, %v2110_v19  ;;  %v2052_v16 = vpop.f32.mrf.mxu0 }
 0x2a6   :  { %v2112_v13 = vadd.f32 %v2111_v30, %v2052_v16 }
 0x2a7   :  { %v6371_v4 = vadd.f32 %v2227_v62, %v2169_v46 }
 0x2a9   :  { %v2114_v63 = vpop.f32.mrf.mxu1 }
 0x2ac   :  { %v2170_v23 = vpop.f32.mrf.mxu2  ;;  %v2229_v27 = vpop.f32.mrf.mxu3  ;;  %2339 = vmatmul.bf16.gmra.mxu1 %v7348_v40 }
 0x2ad   :  { %v2171_v15 = vadd.f32 %v2170_v23, %v2112_v13  ;;  %v2055_v28 = vpop.f32.mrf.mxu0 }
 0x2ae   :  { %v2115_v18 = vadd.f32 %v2114_v63, %v2055_v28 }
 0x2af   :  { %v6373_v51 = vadd.f32 %v2229_v27, %v2171_v15  ;;  %2280 = vmatmul.bf16.gmra.mxu0 %v7347_v60 }
 0x2b1   :  { %2398 = vmatmul.bf16.gmra.mxu2 %v7349_v43  ;;  %3887 = vmatmul.msk.bf16.gmra.mxu3 %vm207_vm0, %v7350_v58  ;;  %v2116_v56 = vpop.f32.mrf.mxu1  ;;  %v7355_v43 = vld [vmem:[#allocation33_spill] sm:$0xff]  ;;  %v7356_v58 = vld [vmem:[#allocation34_spill] sm:$0xff] }
 0x2b4   :  { %v2173_v20 = vpop.f32.mrf.mxu2  ;;  %v2232_v35 = vpop.f32.mrf.mxu3 }
 0x2b5   :  { %v2174_v36 = vadd.f32 %v2173_v20, %v2115_v18  ;;  %v2057_v7 = vpop.f32.mrf.mxu0  ;;  %v7357_v20 = vld [vmem:[#allocation35_spill] sm:$0xff] }
 0x2b6   :  { %v2117_v34 = vadd.f32 %v2116_v56, %v2057_v7 }
 0x2b7   :  { %v6380_v47 = vadd.f32 %v2232_v35, %v2174_v36  ;;  %v7358_v36 = vld [vmem:[#allocation36_spill] sm:$0xff] }
 0x2b9   :  { %v2119_v24 = vpop.f32.mrf.mxu1 }
 0x2bc   :  { %v2175_v17 = vpop.f32.mrf.mxu2  ;;  %v2234_v32 = vpop.f32.mrf.mxu3  ;;  %2344 = vmatmul.bf16.gmra.mxu1 %v7352_v11 }
 0x2bd   :  { %v2176_v48 = vadd.f32 %v2175_v17, %v2117_v34  ;;  %v2060_v12 = vpop.f32.mrf.mxu0 }
 0x2be   :  { %v2120_v19 = vadd.f32 %v2119_v24, %v2060_v12 }
 0x2bf   :  { %v6382_v31 = vadd.f32 %v2234_v32, %v2176_v48  ;;  %2285 = vmatmul.bf16.gmra.mxu0 %v7351_v39 }
 0x2c1   :  { %2403 = vmatmul.bf16.gmra.mxu2 %v7353_v53  ;;  %3888 = vmatmul.msk.bf16.gmra.mxu3 %vm207_vm0, %v7354_v1  ;;  %v2121_v30 = vpop.f32.mrf.mxu1 }
 0x2c4   :  { %v2178_v45 = vpop.f32.mrf.mxu2  ;;  %v2237_v62 = vpop.f32.mrf.mxu3 }
 0x2c5   :  { %v2179_v46 = vadd.f32 %v2178_v45, %v2120_v19  ;;  %v2062_v16 = vpop.f32.mrf.mxu0  ;;  %v7359_v45 = vld [vmem:[#allocation37_spill] sm:$0xff] }
 0x2c6   :  { %v2122_v23 = vadd.f32 %v2121_v30, %v2062_v16  ;;  %v7362_v16 = vld [vmem:[#allocation40_spill] sm:$0xff] }
 0x2c7   :  { %v6389_v13 = vadd.f32 %v2237_v62, %v2179_v46  ;;  %v7360_v46 = vld [vmem:[#allocation38_spill] sm:$0xff]  ;;  %v7361_v62 = vld [vmem:[#allocation39_spill] sm:$0xff] }
 0x2c9   :  { %v2124_v18 = vpop.f32.mrf.mxu1 }
 0x2cc   :  { %v2180_v15 = vpop.f32.mrf.mxu2  ;;  %v2239_v28 = vpop.f32.mrf.mxu3  ;;  %2349 = vmatmul.bf16.gmra.mxu1 %v7356_v58 }
 0x2cd   :  { %v2181_v27 = vadd.f32 %v2180_v15, %v2122_v23  ;;  %v2065_v63 = vpop.f32.mrf.mxu0 }
 0x2ce   :  { %v2125_v40 = vadd.f32 %v2124_v18, %v2065_v63 }
 0x2cf   :  { %v6391_v60 = vadd.f32 %v2239_v28, %v2181_v27  ;;  %2290 = vmatmul.bf16.gmra.mxu0 %v7355_v43 }
 0x2d1   :  { %2408 = vmatmul.bf16.gmra.mxu2 %v7357_v20  ;;  %3889 = vmatmul.msk.bf16.gmra.mxu3 %vm207_vm0, %v7358_v36  ;;  %v2126_v17 = vpop.f32.mrf.mxu1 }
 0x2d4   :  { %v2183_v35 = vpop.f32.mrf.mxu2  ;;  %v2242_v56 = vpop.f32.mrf.mxu3 }
 0x2d5   :  { %v2184_v7 = vadd.f32 %v2183_v35, %v2125_v40  ;;  %v2067_v34 = vpop.f32.mrf.mxu0 }
 0x2d6   :  { %v2127_v32 = vadd.f32 %v2126_v17, %v2067_v34  ;;  %v7364_v34 = vld [vmem:[#allocation42_spill] sm:$0xff]  ;;  %v7365_v17 = vld [vmem:[#allocation43_spill] sm:$0xff] }
 0x2d7   :  { %v6398_v48 = vadd.f32 %v2242_v56, %v2184_v7  ;;  %v7363_v56 = vld [vmem:[#allocation41_spill] sm:$0xff] }
 0x2d9   :  { %v2129_v11 = vpop.f32.mrf.mxu1 }
 0x2dc   :  { %v2185_v12 = vpop.f32.mrf.mxu2  ;;  %v2244_v19 = vpop.f32.mrf.mxu3  ;;  %2354 = vmatmul.bf16.gmra.mxu1 %v7360_v46 }
 0x2dd   :  { %v2186_v24 = vadd.f32 %v2185_v12, %v2127_v32  ;;  %v2070_v39 = vpop.f32.mrf.mxu0  ;;  %v7366_v32 = vld [vmem:[#allocation44_spill] sm:$0xff] }
 0x2de   :  { %v2130_v1 = vadd.f32 %v2129_v11, %v2070_v39 }
 0x2df   :  { %v6400_v53 = vadd.f32 %v2244_v19, %v2186_v24  ;;  %2295 = vmatmul.bf16.gmra.mxu0 %v7359_v45 }
 0x2e1   :  { %2413 = vmatmul.bf16.gmra.mxu2 %v7361_v62  ;;  %3890 = vmatmul.msk.bf16.gmra.mxu3 %vm207_vm0, %v7362_v16  ;;  %v2131_v28 = vpop.f32.mrf.mxu1 }
 0x2e4   :  { %v2188_v30 = vpop.f32.mrf.mxu2  ;;  %v2247_v15 = vpop.f32.mrf.mxu3 }
 0x2e5   :  { %v2189_v23 = vadd.f32 %v2188_v30, %v2130_v1  ;;  %v2072_v27 = vpop.f32.mrf.mxu0 }
 0x2e6   :  { %v2132_v18 = vadd.f32 %v2131_v28, %v2072_v27  ;;  %v7367_v28 = vld [vmem:[#allocation45_spill] sm:$0xff] }
 0x2e7   :  { %v6407_v63 = vadd.f32 %v2247_v15, %v2189_v23 }
 0x2e9   :  { %v2134_v36 = vpop.f32.mrf.mxu1 }
 0x2ec   :  { %v2190_v40 = vpop.f32.mrf.mxu2  ;;  %v2249_v58 = vpop.f32.mrf.mxu3  ;;  %2359 = vmatmul.bf16.gmra.mxu1 %v7364_v34 }
 0x2ed   :  { %v2191_v43 = vadd.f32 %v2190_v40, %v2132_v18  ;;  %v2075_v20 = vpop.f32.mrf.mxu0  ;;  %v7368_v18 = vld [vmem:[#allocation46_spill] sm:$0xff]  ;;  %v7369_v40 = vld [vmem:[#allocation47_spill] sm:$0xff] }
 0x2ee   :  { %v2135_v7 = vadd.f32 %v2134_v36, %v2075_v20 }
 0x2ef   :  { %v6409_v35 = vadd.f32 %v2249_v58, %v2191_v43  ;;  %2300 = vmatmul.bf16.gmra.mxu0 %v7363_v56  ;;  %v7370_v43 = vld [vmem:[#allocation48_spill] sm:$0xff] }
 0x2f1   :  { %2418 = vmatmul.bf16.gmra.mxu2 %v7365_v17  ;;  %3891 = vmatmul.msk.bf16.gmra.mxu3 %vm207_vm0, %v7366_v32  ;;  %v2136_v11 = vpop.f32.mrf.mxu1 }
 0x2f4   :  { %v2193_v12 = vpop.f32.mrf.mxu2  ;;  %v2252_v19 = vpop.f32.mrf.mxu3 }
 0x2f5   :  { %v2194_v24 = vadd.f32 %v2193_v12, %v2135_v7  ;;  %v2077_v39 = vpop.f32.mrf.mxu0 }
 0x2f6   :  { %v2137_v45 = vadd.f32 %v2136_v11, %v2077_v39 }
 0x2f7   :  { %v6416_v1 = vadd.f32 %v2252_v19, %v2194_v24 }
 0x2f9   :  { %v2139_v23 = vpop.f32.mrf.mxu1 }
 0x2fc   :  { %v2195_v46 = vpop.f32.mrf.mxu2  ;;  %v2254_v16 = vpop.f32.mrf.mxu3  ;;  %2364 = vmatmul.bf16.gmra.mxu1 %v7368_v18 }
 0x2fd   :  { %v2196_v62 = vadd.f32 %v2195_v46, %v2137_v45  ;;  %v2080_v30 = vpop.f32.mrf.mxu0  ;;  %v7371_v46 = vld [vmem:[#allocation50_spill] sm:$0xff] }
 0x2fe   :  { %v2140_v27 = vadd.f32 %v2139_v23, %v2080_v30  ;;  %v7374_v30 = vld [vmem:[#allocation53_spill] sm:$0xff] }
 0x2ff   :  { %v6418_v15 = vadd.f32 %v2254_v16, %v2196_v62  ;;  %2305 = vmatmul.bf16.gmra.mxu0 %v7367_v28  ;;  %v7372_v62 = vld [vmem:[#allocation51_spill] sm:$0xff]  ;;  %v7373_v16 = vld [vmem:[#allocation52_spill] sm:$0xff] }
 0x301   :  { %2423 = vmatmul.bf16.gmra.mxu2 %v7369_v40  ;;  %3892 = vmatmul.msk.bf16.gmra.mxu3 %vm207_vm0, %v7370_v43  ;;  %v2141_v56 = vpop.f32.mrf.mxu1 }
 0x304   :  { %v2198_v58 = vpop.f32.mrf.mxu2  ;;  %v2257_v36 = vpop.f32.mrf.mxu3 }
 0x305   :  { %v2199_v20 = vadd.f32 %v2198_v58, %v2140_v27  ;;  %v2082_v7 = vpop.f32.mrf.mxu0 }
 0x306   :  { %v2142_v17 = vadd.f32 %v2141_v56, %v2082_v7 }
 0x307   :  { %v6425_v34 = vadd.f32 %v2257_v36, %v2199_v20 }
 0x309   :  { %v2144_v39 = vpop.f32.mrf.mxu1 }
 0x30c   :  { %v2200_v32 = vpop.f32.mrf.mxu2  ;;  %v2259_v24 = vpop.f32.mrf.mxu3  ;;  %2369 = vmatmul.bf16.gmra.mxu1 %v7372_v62 }
 0x30d   :  { %v2201_v12 = vadd.f32 %v2200_v32, %v2142_v17  ;;  %v2085_v19 = vpop.f32.mrf.mxu0 }
 0x30e   :  { %v2145_v45 = vadd.f32 %v2144_v39, %v2085_v19  ;;  %v7376_v19 = vld [vmem:[#allocation56_spill] sm:$0xff]  ;;  %v7377_v39 = vld [vmem:[#allocation57_spill] sm:$0xff] }
 0x30f   :  { %v6427_v11 = vadd.f32 %v2259_v24, %v2201_v12  ;;  %2310 = vmatmul.bf16.gmra.mxu0 %v7371_v46  ;;  %v7375_v24 = vld [vmem:[#allocation55_spill] sm:$0xff] }
 0x311   :  { %2428 = vmatmul.bf16.gmra.mxu2 %v7373_v16  ;;  %3893 = vmatmul.msk.bf16.gmra.mxu3 %vm207_vm0, %v7374_v30  ;;  %v2146_v40 = vpop.f32.mrf.mxu1 }
 0x314   :  { %v2203_v23 = vpop.f32.mrf.mxu2  ;;  %v2262_v28 = vpop.f32.mrf.mxu3 }
 0x315   :  { %v2204_v27 = vadd.f32 %v2203_v23, %v2145_v45  ;;  %v2087_v18 = vpop.f32.mrf.mxu0 }
 0x316   :  { %v2147_v58 = vadd.f32 %v2146_v40, %v2087_v18 }
 0x317   :  { %v6434_v43 = vadd.f32 %v2262_v28, %v2204_v27  ;;  %v7378_v28 = vld [vmem:[#allocation58_spill] sm:$0xff] }
 0x319   :  { %v2335_v17 = vpop.f32.mrf.mxu1 }
 0x31c   :  { %v2205_v20 = vpop.f32.mrf.mxu2  ;;  %v2264_v7 = vpop.f32.mrf.mxu3  ;;  %2374 = vmatmul.bf16.gmra.mxu1 %v7375_v24 }
 0x31d   :  { %v2206_v36 = vadd.f32 %v2205_v20, %v2147_v58  ;;  %v2276_v56 = vpop.f32.mrf.mxu0 }
 0x31e   :  { %v2277_v12 = vadd.f32 %v2276_v56, %v6354_v61 }
 0x31f   :  { %v6436_v32 = vadd.f32 %v2264_v7, %v2206_v36  ;;  %2315 = vmatmul.bf16.gmra.mxu0 %v6031_v55 }
 0x320   :  { %v2336_v45 = vadd.f32 %v2335_v17, %v2277_v12 }
 0x321   :  { %2433 = vmatmul.bf16.gmra.mxu2 %v7376_v19  ;;  %3894 = vmatmul.msk.bf16.gmra.mxu3 %vm207_vm0, %v7377_v39  ;;  %v2337_v23 = vpop.f32.mrf.mxu1 }
 0x324   :  { %v2394_v46 = vpop.f32.mrf.mxu2  ;;  %v2453_v16 = vpop.f32.mrf.mxu3 }
 0x325   :  { %v2395_v62 = vadd.f32 %v2394_v46, %v2336_v45  ;;  %v2278_v30 = vpop.f32.mrf.mxu0 }
 0x326   :  { %v2279_v61 = vadd.f32 %v2278_v30, %v6356_v41 }
 0x327   :  { %v6444_v27 = vadd.f32 %v2453_v16, %v2395_v62 }
 0x328   :  { %v2338_v40 = vadd.f32 %v2337_v23, %v2279_v61 }
 0x329   :  { %v2504_v55 = vsel %vm2503_vm3, %v6444_v27, 0.0  ;;  %v2340_v56 = vpop.f32.mrf.mxu1 }
 0x32a   :  { %v2505_v18 = vadd.f32 %v2504_v55, %v7378_v28 }
 0x32c   :  { %v2396_v58 = vpop.f32.mrf.mxu2  ;;  %2506 = vadd.xlane.f32.xlu2 %v2505_v18  ;;  %v2455_v36 = vpop.f32.mrf.mxu3  ;;  %2379 = vmatmul.bf16.gmra.mxu1 %v6110_v2 }
 0x32d   :  { %v2397_v20 = vadd.f32 %v2396_v58, %v2338_v40  ;;  %v2281_v7 = vpop.f32.mrf.mxu0 }
 0x32e   :  { %v2282_v12 = vadd.f32 %v2281_v7, %v6362_v59 }
 0x32f   :  { %v6450_v17 = vadd.f32 %v2455_v36, %v2397_v20  ;;  %2320 = vmatmul.bf16.gmra.mxu0 %v6106_v50 }
 0x330   :  { %v2341_v19 = vadd.f32 %v2340_v56, %v2282_v12 }
 0x331   :  { %2438 = vmatmul.bf16.gmra.mxu2 %v6112_v57  ;;  %v2508_v41 = vsel %vm2503_vm3, %v6450_v17, 0.0  ;;  %3895 = vmatmul.msk.bf16.gmra.mxu3 %vm207_vm0, %v6115_v49  ;;  %v2342_v62 = vpop.f32.mrf.mxu1 }
 0x332   :  { %v2509_v24 = vadd.f32 %v2508_v41, %v6108_v8 }
 0x334   :  { %v2399_v39 = vpop.f32.mrf.mxu2  ;;  %2510 = vadd.xlane.f32.xlu0 %v2509_v24  ;;  %v2458_v46 = vpop.f32.mrf.mxu3 }
 0x335   :  { %v2400_v45 = vadd.f32 %v2399_v39, %v2341_v19  ;;  %v2283_v59 = vpop.f32.mrf.mxu0 }
 0x336   :  { %v2284_v2 = vadd.f32 %v2283_v59, %v6364_v26 }
 0x337   :  { %v6461_v50 = vadd.f32 %v2458_v46, %v2400_v45 }
 0x338   :  { %v2343_v30 = vadd.f32 %v2342_v62, %v2284_v2 }
 0x339   :  { %v2512_v57 = vsel %vm2503_vm3, %v6461_v50, 0.0  ;;  %v2345_v18 = vpop.f32.mrf.mxu1 }
 0x33a   :  { %v2513_v16 = vadd.f32 %v2512_v57, %v6122_v33 }
 0x33c   :  { %v2401_v49 = vpop.f32.mrf.mxu2  ;;  %2514 = vadd.xlane.f32.xlu1 %v2513_v16  ;;  %v2460_v61 = vpop.f32.mrf.mxu3 }
 0x33d   :  { %v2402_v23 = vadd.f32 %v2401_v49, %v2343_v30  ;;  %v2286_v55 = vpop.f32.mrf.mxu0 }
 0x33e   :  { %v2287_v58 = vadd.f32 %v2286_v55, %v6371_v4 }
 0x33f   :  { %v6467_v40 = vadd.f32 %v2460_v61, %v2402_v23 }
 0x340   :  { %v2346_v36 = vadd.f32 %v2345_v18, %v2287_v58 }
 0x341   :  { %v2516_v20 = vsel %vm2503_vm3, %v6467_v40, 0.0  ;;  %v2347_v24 = vpop.f32.mrf.mxu1 }
 0x342   :  { %v2517_v26 = vadd.f32 %v2516_v20, %v6143_v29 }
 0x344   :  { %v2404_v7 = vpop.f32.mrf.mxu2  ;;  %2518 = vadd.xlane.f32.xlu2 %v2517_v26  ;;  %v2463_v12 = vpop.f32.mrf.mxu3 }
 0x345   :  { %v2405_v56 = vadd.f32 %v2404_v7, %v2346_v36  ;;  %v2288_v41 = vpop.f32.mrf.mxu0 }
 0x346   :  { %v2289_v39 = vadd.f32 %v2288_v41, %v6373_v51 }
 0x347   :  { %v6473_v19 = vadd.f32 %v2463_v12, %v2405_v56 }
 0x348   :  { %v2348_v46 = vadd.f32 %v2347_v24, %v2289_v39 }
 0x349   :  { %v2520_v45 = vsel %vm2503_vm3, %v6473_v19, 0.0  ;;  %v2350_v16 = vpop.f32.mrf.mxu1 }
 0x34a   :  { %v2521_v4 = vadd.f32 %v2520_v45, %v6150_v9 }
 0x34c   :  { %v2406_v59 = vpop.f32.mrf.mxu2  ;;  %2522 = vadd.xlane.f32.xlu2 %v2521_v4  ;;  %v2465_v2 = vpop.f32.mrf.mxu3 }
 0x34d   :  { %v2407_v62 = vadd.f32 %v2406_v59, %v2348_v46  ;;  %v2291_v57 = vpop.f32.mrf.mxu0 }
 0x34e   :  { %v2292_v49 = vadd.f32 %v2291_v57, %v6380_v47 }
 0x34f   :  { %v6479_v30 = vadd.f32 %v2465_v2, %v2407_v62 }
 0x350   :  { %v2351_v61 = vadd.f32 %v2350_v16, %v2292_v49 }
 0x351   :  { %v2524_v23 = vsel %vm2503_vm3, %v6479_v30, 0.0  ;;  %v2352_v26 = vpop.f32.mrf.mxu1 }
 0x352   :  { %v2525_v51 = vadd.f32 %v2524_v23, %v6171_v44 }
 0x354   :  { %v2409_v55 = vpop.f32.mrf.mxu2  ;;  %2526 = vadd.xlane.f32.xlu0 %v2525_v51  ;;  %v2468_v58 = vpop.f32.mrf.mxu3 }
 0x355   :  { %v2410_v18 = vadd.f32 %v2409_v55, %v2351_v61  ;;  %v2293_v20 = vpop.f32.mrf.mxu0 }
 0x356   :  { %v2294_v7 = vadd.f32 %v2293_v20, %v6382_v31  ;;  %v6503_v20 = vpop.permute.xlu0 %3211 }
 0x357   :  { %v6485_v36 = vadd.f32 %v2468_v58, %v2410_v18 }
 0x358   :  { %v2353_v12 = vadd.f32 %v2352_v26, %v2294_v7 }
 0x359   :  { %v2528_v56 = vsel %vm2503_vm3, %v6485_v36, 0.0  ;;  %v2355_v4 = vpop.f32.mrf.mxu1 }
 0x35a   :  { %v2529_v47 = vadd.f32 %v2528_v56, %v6184_v38 }
 0x35c   :  { %v2411_v41 = vpop.f32.mrf.mxu2  ;;  %2530 = vadd.xlane.f32.xlu1 %v2529_v47  ;;  %v2470_v39 = vpop.f32.mrf.mxu3 }
 0x35d   :  { %v2412_v24 = vadd.f32 %v2411_v41, %v2353_v12  ;;  %v2296_v45 = vpop.f32.mrf.mxu0  ;;  %v6505_v12 = vpop.permute.xlu2 %3216 }
 0x35e   :  { %v2297_v59 = vadd.f32 %v2296_v45, %v6389_v13 }
 0x35f   :  { %v6491_v46 = vadd.f32 %v2470_v39, %v2412_v24 }
 0x360   :  { %v2356_v2 = vadd.f32 %v2355_v4, %v2297_v59  ;;  %v6513_v59 = vpop.permute.xlu1 %3206 }
 0x361   :  { %v2532_v62 = vsel %vm2503_vm3, %v6491_v46, 0.0  ;;  %v2357_v51 = vpop.f32.mrf.mxu1 }
 0x362   :  { %v2533_v31 = vadd.f32 %v2532_v62, %v6187_v3 }
 0x364   :  { %v2414_v57 = vpop.f32.mrf.mxu2  ;;  %2534 = vadd.xlane.f32.xlu2 %v2533_v31  ;;  %v2473_v49 = vpop.f32.mrf.mxu3 }
 0x365   :  { %v2415_v16 = vadd.f32 %v2414_v57, %v2356_v2  ;;  %v2298_v23 = vpop.f32.mrf.mxu0 }
 0x366   :  { %v2299_v55 = vadd.f32 %v2298_v23, %v6391_v60 }
 0x367   :  { %v6497_v61 = vadd.f32 %v2473_v49, %v2415_v16  ;;  %v6515_v16 = vpop.permute.xlu0 %3226 }
 0x368   :  { %v2358_v58 = vadd.f32 %v2357_v51, %v2299_v55  ;;  %v6520_v51 = vpop.permute.xlu2 %3231 }
 0x369   :  { %v2536_v18 = vsel %vm2503_vm3, %v6497_v61, 0.0  ;;  %v2360_v41 = vpop.f32.mrf.mxu1 }
 0x36a   :  { %v2537_v13 = vadd.f32 %v2536_v18, %v6212_v0 }
 0x36c   :  { %v2416_v26 = vpop.f32.mrf.mxu2  ;;  %2538 = vadd.xlane.f32.xlu0 %v2537_v13  ;;  %v2475_v56 = vpop.f32.mrf.mxu3 }
 0x36d   :  { %v2417_v7 = vadd.f32 %v2416_v26, %v2358_v58  ;;  %v2301_v47 = vpop.f32.mrf.mxu0 }
 0x36e   :  { %v2302_v60 = vadd.f32 %v2301_v47, %v6398_v48  ;;  %v6525_v47 = vpop.permute.xlu1 %3221 }
 0x36f   :  { %v6507_v24 = vadd.f32 %v2475_v56, %v2417_v7 }
 0x370   :  { %v2361_v4 = vadd.f32 %v2360_v41, %v2302_v60 }
 0x371   :  { %v2540_v39 = vsel %vm2503_vm3, %v6507_v24, 0.0  ;;  %v2362_v49 = vpop.f32.mrf.mxu1 }
 0x372   :  { %v2541_v45 = vadd.f32 %v2540_v39, %v6215_v52  ;;  %v6530_v39 = vpop.permute.xlu0 %3241 }
 0x374   :  { %v2419_v62 = vpop.f32.mrf.mxu2  ;;  %2542 = vadd.xlane.f32.xlu1 %v2541_v45  ;;  %v2478_v2 = vpop.f32.mrf.mxu3 }
 0x375   :  { %v2420_v31 = vadd.f32 %v2419_v62, %v2361_v4  ;;  %v2303_v57 = vpop.f32.mrf.mxu0  ;;  %v6534_v4 = vpop.permute.xlu2 %3246 }
 0x376   :  { %v2304_v48 = vadd.f32 %v2303_v57, %v6400_v53  ;;  %7379 = vst [vmem:[#allocation2_spill] sm:$0xff] %v6534_v4 }
 0x377   :  { %v6517_v23 = vadd.f32 %v2478_v2, %v2420_v31 }
 0x378   :  { %v2363_v13 = vadd.f32 %v2362_v49, %v2304_v48 }
 0x379   :  { %v2544_v55 = vsel %vm2503_vm3, %v6517_v23, 0.0  ;;  %v2365_v41 = vpop.f32.mrf.mxu1 }
 0x37a   :  { %v2545_v18 = vadd.f32 %v2544_v55, %v6240_v14 }
 0x37c   :  { %v2421_v58 = vpop.f32.mrf.mxu2  ;;  %2546 = vadd.xlane.f32.xlu2 %v2545_v18  ;;  %v2480_v7 = vpop.f32.mrf.mxu3 }
 0x37d   :  { %v2422_v26 = vadd.f32 %v2421_v58, %v2363_v13  ;;  %v2306_v56 = vpop.f32.mrf.mxu0  ;;  %v6540_v13 = vpop.permute.xlu1 %3236 }
 0x37e   :  { %v2307_v53 = vadd.f32 %v2306_v56, %v6407_v63 }
 0x37f   :  { %v6527_v60 = vadd.f32 %v2480_v7, %v2422_v26  ;;  %v6544_v26 = vpop.permute.xlu0 %3256 }
 0x380   :  { %v2366_v31 = vadd.f32 %v2365_v41, %v2307_v53  ;;  %7380 = vst [vmem:[#allocation3_spill] sm:$0xff] %v6544_v26  ;;  %v6547_v41 = vpop.permute.xlu2 %3261 }
 0x381   :  { %v2548_v45 = vsel %vm2503_vm3, %v6527_v60, 0.0  ;;  %v2367_v55 = vpop.f32.mrf.mxu1  ;;  %7381 = vst [vmem:[#allocation4_spill] sm:$0xff] %v6547_v41 }
 0x382   :  { %v2549_v62 = vadd.f32 %v2548_v45, %v6249_v54 }
 0x384   :  { %v2424_v2 = vpop.f32.mrf.mxu2  ;;  %2550 = vadd.xlane.f32.xlu0 %v2549_v62  ;;  %v2483_v49 = vpop.f32.mrf.mxu3 }
 0x385   :  { %v2425_v57 = vadd.f32 %v2424_v2, %v2366_v31  ;;  %v2308_v48 = vpop.f32.mrf.mxu0 }
 0x386   :  { %v2309_v63 = vadd.f32 %v2308_v48, %v6409_v35  ;;  %v6554_v48 = vpop.permute.xlu1 %3251 }
 0x387   :  { %v6537_v18 = vadd.f32 %v2483_v49, %v2425_v57  ;;  %7382 = vst [vmem:[#allocation49_spill] sm:$0xff] %v6554_v48 }
 0x388   :  { %v2368_v56 = vadd.f32 %v2367_v55, %v2309_v63  ;;  %v6557_v63 = vpop.permute.xlu0 %3271 }
 0x389   :  { %v2552_v58 = vsel %vm2503_vm3, %v6537_v18, 0.0  ;;  %v2370_v2 = vpop.f32.mrf.mxu1  ;;  %7383 = vst [vmem:[#allocation5_spill] sm:$0xff] %v6557_v63 }
 0x38a   :  { %v2553_v7 = vadd.f32 %v2552_v58, %v6256_v6 }
 0x38c   :  { %v2426_v53 = vpop.f32.mrf.mxu2  ;;  %2554 = vadd.xlane.f32.xlu1 %v2553_v7  ;;  %v2485_v62 = vpop.f32.mrf.mxu3 }
 0x38d   :  { %v2427_v45 = vadd.f32 %v2426_v53, %v2368_v56  ;;  %v2311_v31 = vpop.f32.mrf.mxu0 }
 0x38e   :  { %v2312_v35 = vadd.f32 %v2311_v31, %v6416_v1 }
 0x38f   :  { %v6549_v57 = vadd.f32 %v2485_v62, %v2427_v45  ;;  %v6559_v45 = vpop.permute.xlu2 %3276 }
 0x390   :  { %v2371_v55 = vadd.f32 %v2370_v2, %v2312_v35  ;;  %7384 = vst [vmem:[#allocation6_spill] sm:$0xff] %v6559_v45  ;;  %v6567_v35 = vpop.permute.xlu1 %3266  ;;  %v6569_v26 = vpop.permute.xlu0 %3286 }
 0x391   :  { %v2556_v49 = vsel %vm2503_vm3, %v6549_v57, 0.0  ;;  %v2372_v4 = vpop.f32.mrf.mxu1  ;;  %7385 = vst [vmem:[#allocation7_spill] sm:$0xff] %v6569_v26 }
 0x392   :  { %v2557_v58 = vadd.f32 %v2556_v49, %v6277_v22 }
 0x394   :  { %v2429_v41 = vpop.f32.mrf.mxu2  ;;  %2558 = vadd.xlane.f32.xlu2 %v2557_v58  ;;  %v2488_v56 = vpop.f32.mrf.mxu3 }
 0x395   :  { %v2430_v7 = vadd.f32 %v2429_v41, %v2371_v55  ;;  %v2313_v53 = vpop.f32.mrf.mxu0 }
 0x396   :  { %v2314_v1 = vadd.f32 %v2313_v53, %v6418_v15 }
 0x397   :  { %v6561_v62 = vadd.f32 %v2488_v56, %v2430_v7 }
 0x398   :  { %v2373_v2 = vadd.f32 %v2372_v4, %v2314_v1  ;;  %v6588_v26 = vpop.permute.xlu1 %3281 }
 0x399   :  { %v2560_v31 = vsel %vm2503_vm3, %v6561_v62, 0.0  ;;  %v2375_v48 = vpop.f32.mrf.mxu1  ;;  %7386 = vst [vmem:[#allocation8_spill] sm:$0xff] %v6588_v26 }
 0x39a   :  { %v2561_v49 = vadd.f32 %v2560_v31, %v6284_v42 }
 0x39c   :  { %v2431_v63 = vpop.f32.mrf.mxu2  ;;  %2562 = vadd.xlane.f32.xlu0 %v2561_v49  ;;  %v2490_v58 = vpop.f32.mrf.mxu3 }
 0x39d   :  { %v2432_v41 = vadd.f32 %v2431_v63, %v2373_v2  ;;  %v2316_v55 = vpop.f32.mrf.mxu0 }
 0x39e   :  { %v2317_v15 = vadd.f32 %v2316_v55, %v6425_v34 }
 0x39f   :  { %v6571_v7 = vadd.f32 %v2490_v58, %v2432_v41  ;;  %v2507_v56 = vpop.xlane.xlu2 %2506 }
 0x3a0   :  { %v2584_v53 = vmul.f32 0.0051020407, %v2507_v56  ;;  %v2376_v49 = vadd.f32 %v2375_v48, %v2317_v15 }
 0x3a1   :  { %v2564_v31 = vsel %vm2503_vm3, %v6571_v7, 0.0  ;;  %v2377_v45 = vpop.f32.mrf.mxu1 }
 0x3a2   :  { %v6577_v4 = vsub.f32 %v7378_v28, %v2584_v53  ;;  %v6580_v1 = vsub.f32 %v6444_v27, %v2584_v53  ;;  %v2565_v63 = vadd.f32 %v2564_v31, %v6305_v10 }
 0x3a4   :  { %v2434_v2 = vpop.f32.mrf.mxu2  ;;  %2566 = vadd.xlane.f32.xlu1 %v2565_v63  ;;  %v2644_v41 = vmul.f32 %v6577_v4, %v6577_v4  ;;  %v2645_v34 = vmul.f32 %v6580_v1, %v6580_v1  ;;  %v2493_v55 = vpop.f32.mrf.mxu3 }
 0x3a5   :  { %v2435_v58 = vadd.f32 %v2434_v2, %v2376_v49  ;;  %v2318_v56 = vpop.f32.mrf.mxu0 }
 0x3a6   :  { %v2684_v28 = vsel %vm2503_vm3, %v2645_v34, 0.0  ;;  %v2319_v48 = vadd.f32 %v2318_v56, %v6427_v11 }
 0x3a7   :  { %v6590_v27 = vadd.f32 %v2493_v55, %v2435_v58  ;;  %v2511_v15 = vpop.xlane.xlu0 %2510  ;;  %v2685_v53 = vadd.f32 %v2684_v28, %v2644_v41 }
 0x3a8   :  { %v2585_v31 = vmul.f32 0.0051020407, %v2511_v15  ;;  %v2378_v26 = vadd.f32 %v2377_v45, %v2319_v48 }
 0x3a9   :  { %2686 = vadd.xlane.f32.xlu0 %v2685_v53  ;;  %v2568_v63 = vsel %vm2503_vm3, %v6590_v27, 0.0  ;;  %v2380_v45 = vpop.f32.mrf.mxu1 }
 0x3aa   :  { %v6596_v49 = vsub.f32 %v6108_v8, %v2585_v31  ;;  %v6599_v2 = vsub.f32 %v6450_v17, %v2585_v31  ;;  %v2569_v34 = vadd.f32 %v2568_v63, %v6318_v21 }
 0x3ac   :  { %v2436_v58 = vpop.f32.mrf.mxu2  ;;  %2570 = vadd.xlane.f32.xlu2 %v2569_v34  ;;  %v2646_v11 = vmul.f32 %v6596_v49, %v6596_v49  ;;  %v2647_v41 = vmul.f32 %v6599_v2, %v6599_v2  ;;  %v2495_v56 = vpop.f32.mrf.mxu3 }
 0x3ad   :  { %v2437_v55 = vadd.f32 %v2436_v58, %v2378_v26  ;;  %v2321_v28 = vpop.f32.mrf.mxu0 }
 0x3ae   :  { %v2688_v8 = vsel %vm2503_vm3, %v2647_v41, 0.0  ;;  %v2322_v17 = vadd.f32 %v2321_v28, %v6434_v43 }
 0x3af   :  { %v6607_v15 = vadd.f32 %v2495_v56, %v2437_v55  ;;  %v2515_v53 = vpop.xlane.xlu1 %2514  ;;  %v2689_v31 = vadd.f32 %v2688_v8, %v2646_v11 }
 0x3b0   :  { %v2586_v48 = vmul.f32 0.0051020407, %v2515_v53  ;;  %v2381_v41 = vadd.f32 %v2380_v45, %v2322_v17 }
 0x3b1   :  { %2690 = vadd.xlane.f32.xlu1 %v2689_v31  ;;  %v2572_v63 = vsel %vm2503_vm3, %v6607_v15, 0.0 }
 0x3b2   :  { %v6613_v34 = vsub.f32 %v6122_v33, %v2586_v48  ;;  %v6616_v26 = vsub.f32 %v6461_v50, %v2586_v48  ;;  %v2573_v58 = vadd.f32 %v2572_v63, %v6321_v37  ;;  %v2382_v63 = vpop.f32.mrf.mxu1 }
 0x3b4   :  { %v2439_v55 = vpop.f32.mrf.mxu2  ;;  %2574 = vadd.xlane.f32.xlu0 %v2573_v58  ;;  %v2648_v43 = vmul.f32 %v6613_v34, %v6613_v34  ;;  %v2649_v11 = vmul.f32 %v6616_v26, %v6616_v26  ;;  %v2498_v28 = vpop.f32.mrf.mxu3 }
 0x3b5   :  { %v2440_v56 = vadd.f32 %v2439_v55, %v2381_v41  ;;  %v2323_v8 = vpop.f32.mrf.mxu0 }
 0x3b6   :  { %v2692_v33 = vsel %vm2503_vm3, %v2649_v11, 0.0  ;;  %v2324_v50 = vadd.f32 %v2323_v8, %v6436_v32 }
 0x3b7   :  { %v6624_v53 = vadd.f32 %v2498_v28, %v2440_v56  ;;  %v2519_v31 = vpop.xlane.xlu2 %2518  ;;  %v2693_v48 = vadd.f32 %v2692_v33, %v2648_v43 }
 0x3b8   :  { %v2587_v17 = vmul.f32 0.0051020407, %v2519_v31  ;;  %v2383_v11 = vadd.f32 %v2382_v63, %v2324_v50 }
 0x3b9   :  { %2694 = vadd.xlane.f32.xlu2 %v2693_v48  ;;  %v2576_v45 = vsel %vm2503_vm3, %v6624_v53, 0.0 }
 0x3ba   :  { %v6630_v58 = vsub.f32 %v6143_v29, %v2587_v17  ;;  %v6633_v41 = vsub.f32 %v6467_v40, %v2587_v17  ;;  %v2577_v55 = vadd.f32 %v2576_v45, %v6346_v25 }
 0x3bc   :  { %v2441_v56 = vpop.f32.mrf.mxu2  ;;  %2578 = vadd.xlane.f32.xlu1 %v2577_v55  ;;  %v2650_v32 = vmul.f32 %v6630_v58, %v6630_v58  ;;  %v2651_v43 = vmul.f32 %v6633_v41, %v6633_v41  ;;  %v2500_v8 = vpop.f32.mrf.mxu3 }
 0x3bd   :  { %v2442_v28 = vadd.f32 %v2441_v56, %v2383_v11 }
 0x3be   :  { %v2696_v33 = vsel %vm2503_vm3, %v2651_v43, 0.0 }
 0x3bf   :  { %v6641_v29 = vadd.f32 %v2500_v8, %v2442_v28  ;;  %v2523_v31 = vpop.xlane.xlu2 %2522  ;;  %v2697_v40 = vadd.f32 %v2696_v33, %v2650_v32 }
 0x3c0   :  { %v2588_v48 = vmul.f32 0.0051020407, %v2523_v31 }
 0x3c1   :  { %2698 = vadd.xlane.f32.xlu0 %v2697_v40  ;;  %v2580_v50 = vsel %vm2503_vm3, %v6641_v29, 0.0 }
 0x3c2   :  { %v6646_v17 = vsub.f32 %v6150_v9, %v2588_v48  ;;  %v6649_v45 = vsub.f32 %v6473_v19, %v2588_v48  ;;  %v2581_v63 = vadd.f32 %v2580_v50, %v6348_v5 }
 0x3c4   :  { %2582 = vadd.xlane.f32.xlu2 %v2581_v63  ;;  %v2652_v55 = vmul.f32 %v6646_v17, %v6646_v17  ;;  %v2653_v11 = vmul.f32 %v6649_v45, %v6649_v45 }
 0x3c6   :  { %v2700_v56 = vsel %vm2503_vm3, %v2653_v11, 0.0 }
 0x3c7   :  { %v2527_v32 = vpop.xlane.xlu0 %2526  ;;  %v2701_v43 = vadd.f32 %v2700_v56, %v2652_v55 }
 0x3c8   :  { %v2589_v28 = vmul.f32 0.0051020407, %v2527_v32 }
 0x3c9   :  { %2702 = vadd.xlane.f32.xlu1 %v2701_v43 }
 0x3ca   :  { %v6658_v9 = vsub.f32 %v6171_v44, %v2589_v28  ;;  %v6661_v19 = vsub.f32 %v6479_v30, %v2589_v28 }
 0x3cc   :  { %v2654_v8 = vmul.f32 %v6658_v9, %v6658_v9  ;;  %v2655_v33 = vmul.f32 %v6661_v19, %v6661_v19 }
 0x3ce   :  { %v2704_v31 = vsel %vm2503_vm3, %v2655_v33, 0.0 }
 0x3cf   :  { %v2531_v40 = vpop.xlane.xlu1 %2530  ;;  %v2705_v48 = vadd.f32 %v2704_v31, %v2654_v8 }
 0x3d0   :  { %v2590_v50 = vmul.f32 0.0051020407, %v2531_v40 }
 0x3d1   :  { %2706 = vadd.xlane.f32.xlu2 %v2705_v48 }
 0x3d2   :  { %v6669_v63 = vsub.f32 %v6184_v38, %v2590_v50  ;;  %v6672_v44 = vsub.f32 %v6485_v36, %v2590_v50 }
 0x3d4   :  { %v2656_v30 = vmul.f32 %v6669_v63, %v6669_v63  ;;  %v2657_v55 = vmul.f32 %v6672_v44, %v6672_v44 }
 0x3d6   :  { %v2708_v11 = vsel %vm2503_vm3, %v2657_v55, 0.0 }
 0x3d7   :  { %v2535_v56 = vpop.xlane.xlu2 %2534  ;;  %v2709_v32 = vadd.f32 %v2708_v11, %v2656_v30 }
 0x3d8   :  { %v2591_v43 = vmul.f32 0.0051020407, %v2535_v56 }
 0x3d9   :  { %2710 = vadd.xlane.f32.xlu0 %v2709_v32 }
 0x3da   :  { %v6680_v28 = vsub.f32 %v6187_v3, %v2591_v43  ;;  %v6683_v38 = vsub.f32 %v6491_v46, %v2591_v43 }
 0x3dc   :  { %v2658_v36 = vmul.f32 %v6680_v28, %v6680_v28  ;;  %v2659_v8 = vmul.f32 %v6683_v38, %v6683_v38 }
 0x3de   :  { %v2712_v33 = vsel %vm2503_vm3, %v2659_v8, 0.0 }
 0x3df   :  { %v2539_v31 = vpop.xlane.xlu0 %2538  ;;  %v2713_v40 = vadd.f32 %v2712_v33, %v2658_v36 }
 0x3e0   :  { %v2592_v48 = vmul.f32 0.0051020407, %v2539_v31 }
 0x3e1   :  { %2714 = vadd.xlane.f32.xlu1 %v2713_v40 }
 0x3e2   :  { %v6691_v50 = vsub.f32 %v6212_v0, %v2592_v48  ;;  %v6694_v3 = vsub.f32 %v6497_v61, %v2592_v48 }
 0x3e4   :  { %v2660_v46 = vmul.f32 %v6691_v50, %v6691_v50  ;;  %v2661_v30 = vmul.f32 %v6694_v3, %v6694_v3 }
 0x3e6   :  { %v2716_v55 = vsel %vm2503_vm3, %v2661_v30, 0.0 }
 0x3e7   :  { %v2543_v11 = vpop.xlane.xlu1 %2542  ;;  %v2717_v56 = vadd.f32 %v2716_v55, %v2660_v46 }
 0x3e8   :  { %v2593_v32 = vmul.f32 0.0051020407, %v2543_v11 }
 0x3e9   :  { %2718 = vadd.xlane.f32.xlu2 %v2717_v56 }
 0x3ea   :  { %v6702_v43 = vsub.f32 %v6215_v52, %v2593_v32  ;;  %v6705_v0 = vsub.f32 %v6507_v24, %v2593_v32 }
 0x3ec   :  { %v2662_v61 = vmul.f32 %v6702_v43, %v6702_v43  ;;  %v2663_v36 = vmul.f32 %v6705_v0, %v6705_v0 }
 0x3ee   :  { %v2720_v8 = vsel %vm2503_vm3, %v2663_v36, 0.0 }
 0x3ef   :  { %v2547_v33 = vpop.xlane.xlu2 %2546  ;;  %v2721_v31 = vadd.f32 %v2720_v8, %v2662_v61 }
 0x3f0   :  { %v2594_v40 = vmul.f32 0.0051020407, %v2547_v33 }
 0x3f1   :  { %2722 = vadd.xlane.f32.xlu0 %v2721_v31 }
 0x3f2   :  { %v6713_v48 = vsub.f32 %v6240_v14, %v2594_v40  ;;  %v6716_v52 = vsub.f32 %v6517_v23, %v2594_v40 }
 0x3f4   :  { %v2664_v24 = vmul.f32 %v6713_v48, %v6713_v48  ;;  %v2665_v46 = vmul.f32 %v6716_v52, %v6716_v52 }
 0x3f6   :  { %v2724_v30 = vsel %vm2503_vm3, %v2665_v46, 0.0 }
 0x3f7   :  { %v2551_v55 = vpop.xlane.xlu0 %2550  ;;  %v2725_v11 = vadd.f32 %v2724_v30, %v2664_v24 }
 0x3f8   :  { %v2595_v56 = vmul.f32 0.0051020407, %v2551_v55 }
 0x3f9   :  { %2726 = vadd.xlane.f32.xlu1 %v2725_v11 }
 0x3fa   :  { %v6724_v32 = vsub.f32 %v6249_v54, %v2595_v56  ;;  %v6727_v14 = vsub.f32 %v6527_v60, %v2595_v56 }
 0x3fc   :  { %v2666_v23 = vmul.f32 %v6724_v32, %v6724_v32  ;;  %v2667_v61 = vmul.f32 %v6727_v14, %v6727_v14 }
 0x3fe   :  { %v2728_v36 = vsel %vm2503_vm3, %v2667_v61, 0.0 }
 0x3ff   :  { %v2555_v8 = vpop.xlane.xlu1 %2554  ;;  %v2729_v33 = vadd.f32 %v2728_v36, %v2666_v23 }
 0x400   :  { %v2596_v31 = vmul.f32 0.0051020407, %v2555_v8 }
 0x401   :  { %2730 = vadd.xlane.f32.xlu2 %v2729_v33 }
 0x402   :  { %v6735_v40 = vsub.f32 %v6256_v6, %v2596_v31  ;;  %v6738_v54 = vsub.f32 %v6537_v18, %v2596_v31 }
 0x404   :  { %v2668_v60 = vmul.f32 %v6735_v40, %v6735_v40  ;;  %v2669_v24 = vmul.f32 %v6738_v54, %v6738_v54 }
 0x406   :  { %v2732_v46 = vsel %vm2503_vm3, %v2669_v24, 0.0 }
 0x407   :  { %v2559_v30 = vpop.xlane.xlu2 %2558  ;;  %v2733_v55 = vadd.f32 %v2732_v46, %v2668_v60 }
 0x408   :  { %v2597_v11 = vmul.f32 0.0051020407, %v2559_v30 }
 0x409   :  { %2734 = vadd.xlane.f32.xlu0 %v2733_v55 }
 0x40a   :  { %v6746_v56 = vsub.f32 %v6277_v22, %v2597_v11  ;;  %v6749_v6 = vsub.f32 %v6549_v57, %v2597_v11 }
 0x40c   :  { %v2670_v18 = vmul.f32 %v6746_v56, %v6746_v56  ;;  %v2671_v23 = vmul.f32 %v6749_v6, %v6749_v6 }
 0x40e   :  { %v2736_v61 = vsel %vm2503_vm3, %v2671_v23, 0.0 }
 0x40f   :  { %v2563_v36 = vpop.xlane.xlu0 %2562  ;;  %v2737_v8 = vadd.f32 %v2736_v61, %v2670_v18 }
 0x410   :  { %v2598_v33 = vmul.f32 0.0051020407, %v2563_v36 }
 0x411   :  { %2738 = vadd.xlane.f32.xlu1 %v2737_v8 }
 0x412   :  { %v6757_v31 = vsub.f32 %v6284_v42, %v2598_v33  ;;  %v6760_v22 = vsub.f32 %v6561_v62, %v2598_v33 }
 0x414   :  { %7387 = vst [vmem:[#allocation54_spill] sm:$0xff] %v6760_v22  ;;  %v2672_v57 = vmul.f32 %v6757_v31, %v6757_v31  ;;  %v2673_v60 = vmul.f32 %v6760_v22, %v6760_v22 }
 0x416   :  { %v2740_v24 = vsel %vm2503_vm3, %v2673_v60, 0.0 }
 0x417   :  { %v2567_v46 = vpop.xlane.xlu1 %2566  ;;  %v2741_v30 = vadd.f32 %v2740_v24, %v2672_v57 }
 0x418   :  { %v2599_v55 = vmul.f32 0.0051020407, %v2567_v46 }
 0x419   :  { %2742 = vadd.xlane.f32.xlu2 %v2741_v30 }
 0x41a   :  { %v6768_v11 = vsub.f32 %v6305_v10, %v2599_v55  ;;  %v6771_v42 = vsub.f32 %v6571_v7, %v2599_v55 }
 0x41c   :  { %7388 = vst [vmem:[#allocation9_spill] sm:$0xff] %v6768_v11  ;;  %v2687_v62 = vpop.xlane.xlu0 %2686  ;;  %v2674_v18 = vmul.f32 %v6768_v11, %v6768_v11  ;;  %v2675_v23 = vmul.f32 %v6771_v42, %v6771_v42 }
 0x41d   :  { %7389 = vst [vmem:[#allocation10_spill] sm:$0xff] %v6771_v42  ;;  %v2764_v61 = vmul.f32 0.0051020407, %v2687_v62 }
 0x41e   :  { %v2744_v36 = vsel %vm2503_vm3, %v2675_v23, 0.0 }
 0x41f   :  { %v2571_v8 = vpop.xlane.xlu2 %2570  ;;  %v2745_v33 = vadd.f32 %v2744_v36, %v2674_v18  ;;  %v6778_v60 = vadd.f32 0.001, %v2764_v61 }
 0x420   :  { %v2600_v57 = vmul.f32 0.0051020407, %v2571_v8 }
 0x421   :  { %2746 = vadd.xlane.f32.xlu0 %v2745_v33  ;;  %4052 = vrsqrt.f32 %v6778_v60  ;;  %vm2810_vm4 = vweird.f32 %v6778_v60 }
 0x422   :  { %v6781_v10 = vsub.f32 %v6318_v21, %v2600_v57  ;;  %v6784_v7 = vsub.f32 %v6590_v27, %v2600_v57 }
 0x424   :  { %v2691_v24 = vpop.xlane.xlu1 %2690  ;;  %v2676_v46 = vmul.f32 %v6781_v10, %v6781_v10  ;;  %v2677_v30 = vmul.f32 %v6784_v7, %v6784_v7 }
 0x425   :  { %v2765_v55 = vmul.f32 0.0051020407, %v2691_v24 }
 0x426   :  { %v2748_v62 = vsel %vm2503_vm3, %v2677_v30, 0.0 }
 0x427   :  { %v6792_v18 = vadd.f32 0.001, %v2765_v55  ;;  %v2575_v23 = vpop.xlane.xlu0 %2574  ;;  %v2749_v21 = vadd.f32 %v2748_v62, %v2676_v46  ;;  %v6801_v8 = vpop.eup %4052 }
 0x428   :  { %v2601_v61 = vmul.f32 0.0051020407, %v2575_v23  ;;  %vm2811_vm0 = vweird.f32 %v6801_v8 }
 0x429   :  { %2750 = vadd.xlane.f32.xlu1 %v2749_v21  ;;  %4054 = vrsqrt.f32 %v6792_v18  ;;  %vm2812_vm5 = vmor %vm2810_vm4, %vm2811_vm0  ;;  %vm2820_vm7 = vweird.f32 %v6792_v18 }
 0x42a   :  { %v6795_v27 = vsub.f32 %v6321_v37, %v2601_v61  ;;  %v6798_v36 = vsub.f32 %v6607_v15, %v2601_v61  ;;  %v2805_v37 = vmul.f32 %v6801_v8, %v6778_v60 }
 0x42c   :  { %7390 = vst [vmem:[#allocation11_spill] sm:$0xff] %v6795_v27  ;;  %v2678_v33 = vmul.f32 %v6795_v27, %v6795_v27  ;;  %v2679_v57 = vmul.f32 %v6798_v36, %v6798_v36  ;;  %v2695_v24 = vpop.xlane.xlu2 %2694 }
 0x42d   :  { %7391 = vst [vmem:[#allocation12_spill] sm:$0xff] %v6798_v36  ;;  %v2766_v15 = vmul.f32 0.0051020407, %v2695_v24  ;;  %v2806_v36 = vmul.f32 %v6801_v8, %v2805_v37 }
 0x42e   :  { %v2752_v46 = vsel %vm2503_vm3, %v2679_v57, 0.0 }
 0x42f   :  { %v2579_v30 = vpop.xlane.xlu1 %2578  ;;  %v2753_v55 = vadd.f32 %v2752_v46, %v2678_v33  ;;  %v6810_v23 = vpop.eup %4054  ;;  %v6821_v27 = vadd.f32 0.001, %v2766_v15  ;;  %v2807_v37 = vmul.f32 0.5, %v2806_v36 }
 0x430   :  { %v2602_v62 = vmul.f32 0.0051020407, %v2579_v30  ;;  %v2815_v57 = vmul.f32 %v6810_v23, %v6792_v18  ;;  %vm2821_vm6 = vweird.f32 %v6810_v23 }
 0x431   :  { %2754 = vadd.xlane.f32.xlu2 %v2753_v55  ;;  %4056 = vrsqrt.f32 %v6821_v27  ;;  %vm2822_vm8 = vmor %vm2820_vm7, %vm2821_vm6  ;;  %vm2830_vm1 = vweird.f32 %v6821_v27 }
 0x432   :  { %v6813_v21 = vsub.f32 %v6346_v25, %v2602_v62  ;;  %v6816_v61 = vsub.f32 %v6624_v53, %v2602_v62  ;;  %v2816_v62 = vmul.f32 %v6810_v23, %v2815_v57 }
 0x434   :  { %7392 = vst [vmem:[#allocation13_spill] sm:$0xff] %v6813_v21  ;;  %v2699_v42 = vpop.xlane.xlu0 %2698  ;;  %v2680_v33 = vmul.f32 %v6813_v21, %v6813_v21  ;;  %v2681_v24 = vmul.f32 %v6816_v61, %v6816_v61 }
 0x435   :  { %7393 = vst [vmem:[#allocation14_spill] sm:$0xff] %v6816_v61  ;;  %v2767_v46 = vmul.f32 0.0051020407, %v2699_v42 }
 0x436   :  { %v2756_v25 = vsel %vm2503_vm3, %v2681_v24, 0.0  ;;  %v2808_v24 = vsub.f32 1.5, %v2807_v37 }
 0x437   :  { %v6828_v30 = vadd.f32 0.001, %v2767_v46  ;;  %v2583_v53 = vpop.xlane.xlu2 %2582  ;;  %v2757_v55 = vadd.f32 %v2756_v25, %v2680_v33  ;;  %v2817_v46 = vmul.f32 0.5, %v2816_v62  ;;  %v6843_v25 = vpop.eup %4056 }
 0x438   :  { %v2603_v15 = vmul.f32 0.0051020407, %v2583_v53  ;;  %v2809_v62 = vmul.f32 %v6801_v8, %v2808_v24  ;;  %v3004_v24 = vld [vmem:[%s7165_s5] sm:$0xff]  ;;  %vm2831_vm14 = vweird.f32 %v6843_v25 }
 0x439   :  { %4058 = vrsqrt.f32 %v6828_v30  ;;  %2758 = vadd.xlane.f32.xlu0 %v2757_v55  ;;  %vm2840_vm10 = vweird.f32 %v6828_v30  ;;  %vm2832_vm2 = vmor %vm2830_vm1, %vm2831_vm14 }
 0x43a   :  { %v6834_v21 = vsub.f32 %v6348_v5, %v2603_v15  ;;  %v6837_v42 = vsub.f32 %v6641_v29, %v2603_v15  ;;  %v2818_v29 = vsub.f32 1.5, %v2817_v46  ;;  %v2825_v15 = vmul.f32 %v6843_v25, %v6821_v27 }
 0x43b   :  { %v2813_v46 = vsel %vm2812_vm5, %v6801_v8, %v2809_v62  ;;  %v3005_v8 = vld [vmem:[%s7165_s5 + $0x8] sm:$0xff] }
 0x43c   :  { %7394 = vst [vmem:[#allocation15_spill] sm:$0xff] %v6834_v21  ;;  %v2703_v61 = vpop.xlane.xlu1 %2702  ;;  %v2682_v36 = vmul.f32 %v6834_v21, %v6834_v21  ;;  %v2683_v57 = vmul.f32 %v6837_v42, %v6837_v42 }
 0x43d   :  { %7395 = vst [vmem:[#allocation16_spill] sm:$0xff] %v6837_v42  ;;  %v2768_v33 = vmul.f32 0.0051020407, %v2703_v61  ;;  %v3024_v42 = vmul.f32 %v3004_v24, %v2813_v46 }
 0x43e   :  { %v2760_v53 = vsel %vm2503_vm3, %v2683_v57, 0.0 }
 0x43f   :  { %v6846_v55 = vpop.eup %4058  ;;  %v2788_v5 = vadd.f32 0.001, %v2768_v33  ;;  %v2761_v11 = vadd.f32 %v2760_v53, %v2682_v36  ;;  %v2819_v33 = vmul.f32 %v6810_v23, %v2818_v29  ;;  %v2826_v53 = vmul.f32 %v6843_v25, %v2825_v15 }
 0x440   :  { %v2835_v37 = vmul.f32 %v6846_v55, %v6828_v30  ;;  %vm2841_vm9 = vweird.f32 %v6846_v55  ;;  %v3007_v30 = vld [vmem:[%s7165_s5 + $0x18] sm:$0xff] }
 0x441   :  { %4060 = vrsqrt.f32 %v2788_v5  ;;  %2762 = vadd.xlane.f32.xlu1 %v2761_v11  ;;  %v2823_v22 = vsel %vm2822_vm8, %v6810_v23, %v2819_v33  ;;  %v2827_v62 = vmul.f32 0.5, %v2826_v53  ;;  %vm6871_vm12 = vmor %vm2840_vm10, %vm2841_vm9  ;;  %vm2850_vm13 = vweird.f32 %v2788_v5 }
 0x442   :  { %v2836_v61 = vmul.f32 %v6846_v55, %v2835_v37  ;;  %v3025_v15 = vmul.f32 %v3005_v8, %v2823_v22 }
 0x443   :  { %v2828_v46 = vsub.f32 1.5, %v2827_v62 }
 0x444   :  { %v2837_v36 = vmul.f32 0.5, %v2836_v61  ;;  %v2707_v57 = vpop.xlane.xlu2 %2706 }
 0x445   :  { %v2769_v11 = vmul.f32 0.0051020407, %v2707_v57 }
 0x446   :  { %v2838_v21 = vsub.f32 1.5, %v2837_v36 }
 0x447   :  { %v4061_v60 = vpop.eup %4060  ;;  %v2789_v37 = vadd.f32 0.001, %v2769_v11 }
 0x448   :  { %v2845_v61 = vmul.f32 %v4061_v60, %v2788_v5  ;;  %v2839_v11 = vmul.f32 %v6846_v55, %v2838_v21  ;;  %vm2851_vm11 = vweird.f32 %v4061_v60  ;;  %v3008_v21 = vld [vmem:[%s7165_s5 + $0x20] sm:$0xff]  ;;  %v2829_v5 = vmul.f32 %v6843_v25, %v2828_v46 }
 0x449   :  { %4062 = vrsqrt.f32 %v2789_v37  ;;  %3046 = vperm.xlu2 %4019, %v3024_v42   ;;  %vm2852_vm15 = vmor %vm2850_vm13, %vm2851_vm11  ;;  %vm2860_vm4 = vweird.f32 %v2789_v37 }
 0x44a   :  { %v2846_v29 = vmul.f32 %v4061_v60, %v2845_v61  ;;  %v2843_v61 = vsel %vm6871_vm12, %v6846_v55, %v2839_v11  ;;  %v2833_v11 = vsel %vm2832_vm2, %v6843_v25, %v2829_v5  ;;  %v3009_v5 = vld [vmem:[%s7165_s5 + $0x28] sm:$0xff] }
 0x44c   :  { %v2847_v18 = vmul.f32 0.5, %v2846_v29  ;;  %v2711_v57 = vpop.xlane.xlu0 %2710 }
 0x44d   :  { %v2770_v36 = vmul.f32 0.0051020407, %v2711_v57  ;;  %3051 = vperm.xlu0 %4017, %v3025_v15   ;;  %v3027_v15 = vmul.f32 %v3007_v30, %v2843_v61 }
 0x44e   :  { %v2848_v23 = vsub.f32 1.5, %v2847_v18 }
 0x44f   :  { %v4063_v24 = vpop.eup %4062  ;;  %v2790_v42 = vadd.f32 0.001, %v2770_v36  ;;  %v3006_v36 = vld [vmem:[%s7165_s5 + $0x10] sm:$0xff] }
 0x450   :  { %v2855_v22 = vmul.f32 %v4063_v24, %v2789_v37  ;;  %v2849_v53 = vmul.f32 %v4061_v60, %v2848_v23  ;;  %vm2861_vm0 = vweird.f32 %v4063_v24  ;;  %v3010_v37 = vld [vmem:[%s7165_s5 + $0x30] sm:$0xff] }
 0x451   :  { %4064 = vrsqrt.f32 %v2790_v42  ;;  %vm2862_vm5 = vmor %vm2860_vm4, %vm2861_vm0  ;;  %vm2870_vm7 = vweird.f32 %v2790_v42 }
 0x452   :  { %v2856_v8 = vmul.f32 %v4063_v24, %v2855_v22  ;;  %v2853_v62 = vsel %vm2852_vm15, %v4061_v60, %v2849_v53  ;;  %v3026_v22 = vmul.f32 %v3006_v36, %v2833_v11 }
 0x453   :  { %v3028_v29 = vmul.f32 %v3008_v21, %v2853_v62 }
 0x454   :  { %v2857_v18 = vmul.f32 0.5, %v2856_v8  ;;  %v2715_v57 = vpop.xlane.xlu1 %2714 }
 0x455   :  { %v2771_v55 = vmul.f32 0.0051020407, %v2715_v57  ;;  %3066 = vperm.xlu2 %4019, %v3028_v29   ;;  %3061 = vperm.xlu0 %4017, %v3027_v15  }
 0x456   :  { %v2858_v23 = vsub.f32 1.5, %v2857_v18 }
 0x457   :  { %v4065_v46 = vpop.eup %4064  ;;  %v2791_v33 = vadd.f32 0.001, %v2771_v55 }
 0x458   :  { %v2865_v60 = vmul.f32 %v4065_v46, %v2790_v42  ;;  %v2859_v27 = vmul.f32 %v4063_v24, %v2858_v23  ;;  %vm2871_vm6 = vweird.f32 %v4065_v46 }
 0x459   :  { %4066 = vrsqrt.f32 %v2791_v33  ;;  %vm2872_vm8 = vmor %vm2870_vm7, %vm2871_vm6  ;;  %vm2880_vm10 = vweird.f32 %v2791_v33 }
 0x45a   :  { %v2866_v53 = vmul.f32 %v4065_v46, %v2865_v60  ;;  %3056 = vperm.xlu1 %4018, %v3026_v22   ;;  %v2863_v25 = vsel %vm2862_vm5, %v4063_v24, %v2859_v27 }
 0x45b   :  { %v3029_v18 = vmul.f32 %v3009_v5, %v2863_v25 }
 0x45c   :  { %v2867_v21 = vmul.f32 0.5, %v2866_v53  ;;  %v2719_v61 = vpop.xlane.xlu2 %2718 }
 0x45d   :  { %v2772_v30 = vmul.f32 0.0051020407, %v2719_v61  ;;  %v3011_v61 = vld [vmem:[%s7165_s5 + $0x38] sm:$0xff] }
 0x45e   :  { %v2868_v8 = vsub.f32 1.5, %v2867_v21 }
 0x45f   :  { %v4067_v62 = vpop.eup %4066  ;;  %v2792_v29 = vadd.f32 0.001, %v2772_v30 }
 0x460   :  { %v2875_v15 = vmul.f32 %v4067_v62, %v2791_v33  ;;  %v2869_v57 = vmul.f32 %v4065_v46, %v2868_v8  ;;  %vm2881_vm9 = vweird.f32 %v4067_v62 }
 0x461   :  { %4068 = vrsqrt.f32 %v2792_v29  ;;  %vm2882_vm11 = vmor %vm2880_vm10, %vm2881_vm9  ;;  %vm2890_vm13 = vweird.f32 %v2792_v29 }
 0x462   :  { %v2876_v55 = vmul.f32 %v4067_v62, %v2875_v15  ;;  %3071 = vperm.xlu1 %4018, %v3029_v18   ;;  %v2873_v24 = vsel %vm2872_vm8, %v4065_v46, %v2869_v57 }
 0x463   :  { %v3030_v11 = vmul.f32 %v3010_v37, %v2873_v24  ;;  %v3012_v24 = vld [vmem:[%s7165_s5 + $0x40] sm:$0xff] }
 0x464   :  { %v2877_v36 = vmul.f32 0.5, %v2876_v55  ;;  %v2723_v23 = vpop.xlane.xlu0 %2722 }
 0x465   :  { %v2773_v60 = vmul.f32 0.0051020407, %v2723_v23  ;;  %3076 = vperm.xlu0 %4017, %v3030_v11  }
 0x466   :  { %v2878_v22 = vsub.f32 1.5, %v2877_v36 }
 0x467   :  { %v4069_v42 = vpop.eup %4068  ;;  %v2793_v27 = vadd.f32 0.001, %v2773_v60 }
 0x468   :  { %v2885_v53 = vmul.f32 %v4069_v42, %v2792_v29  ;;  %v2879_v21 = vmul.f32 %v4067_v62, %v2878_v22  ;;  %vm2891_vm12 = vweird.f32 %v4069_v42 }
 0x469   :  { %4070 = vrsqrt.f32 %v2793_v27  ;;  %vm2892_vm14 = vmor %vm2890_vm13, %vm2891_vm12  ;;  %vm2900_vm1 = vweird.f32 %v2793_v27 }
 0x46a   :  { %v2886_v30 = vmul.f32 %v4069_v42, %v2885_v53  ;;  %v2883_v46 = vsel %vm2882_vm11, %v4067_v62, %v2879_v21 }
 0x46b   :  { %v3031_v25 = vmul.f32 %v3011_v61, %v2883_v46  ;;  %v3013_v46 = vld [vmem:[%s7165_s5 + $0x48] sm:$0xff] }
 0x46c   :  { %v2887_v5 = vmul.f32 0.5, %v2886_v30  ;;  %v2727_v8 = vpop.xlane.xlu1 %2726 }
 0x46d   :  { %v2774_v15 = vmul.f32 0.0051020407, %v2727_v8  ;;  %3081 = vperm.xlu2 %4019, %v3031_v25  }
 0x46e   :  { %v2888_v18 = vsub.f32 1.5, %v2887_v5 }
 0x46f   :  { %v4071_v57 = vpop.eup %4070  ;;  %v2794_v37 = vadd.f32 0.001, %v2774_v15 }
 0x470   :  { %v2895_v33 = vmul.f32 %v4071_v57, %v2793_v27  ;;  %v2889_v55 = vmul.f32 %v4069_v42, %v2888_v18  ;;  %vm2901_vm15 = vweird.f32 %v4071_v57 }
 0x471   :  { %4072 = vrsqrt.f32 %v2794_v37  ;;  %vm2902_vm2 = vmor %vm2900_vm1, %vm2901_vm15  ;;  %vm2910_vm4 = vweird.f32 %v2794_v37 }
 0x472   :  { %v2896_v11 = vmul.f32 %v4071_v57, %v2895_v33  ;;  %v2893_v62 = vsel %vm2892_vm14, %v4069_v42, %v2889_v55 }
 0x473   :  { %v3032_v36 = vmul.f32 %v3012_v24, %v2893_v62  ;;  %v3014_v62 = vld [vmem:[%s7165_s5 + $0x50] sm:$0xff] }
 0x474   :  { %v2897_v23 = vmul.f32 0.5, %v2896_v11  ;;  %v2731_v60 = vpop.xlane.xlu2 %2730 }
 0x475   :  { %v2775_v22 = vmul.f32 0.0051020407, %v2731_v60  ;;  %3086 = vperm.xlu1 %4018, %v3032_v36  }
 0x476   :  { %v2898_v53 = vsub.f32 1.5, %v2897_v23 }
 0x477   :  { %v4073_v21 = vpop.eup %4072  ;;  %v2795_v61 = vadd.f32 0.001, %v2775_v22 }
 0x478   :  { %v2905_v29 = vmul.f32 %v4073_v21, %v2794_v37  ;;  %v2899_v30 = vmul.f32 %v4071_v57, %v2898_v53  ;;  %vm2911_vm0 = vweird.f32 %v4073_v21 }
 0x479   :  { %4074 = vrsqrt.f32 %v2795_v61  ;;  %vm2912_vm5 = vmor %vm2910_vm4, %vm2911_vm0  ;;  %vm2920_vm7 = vweird.f32 %v2795_v61 }
 0x47a   :  { %v2906_v25 = vmul.f32 %v4073_v21, %v2905_v29  ;;  %v2903_v42 = vsel %vm2902_vm2, %v4071_v57, %v2899_v30 }
 0x47b   :  { %v3033_v5 = vmul.f32 %v3013_v46, %v2903_v42  ;;  %v3015_v42 = vld [vmem:[%s7165_s5 + $0x58] sm:$0xff] }
 0x47c   :  { %v2907_v8 = vmul.f32 0.5, %v2906_v25  ;;  %v2735_v15 = vpop.xlane.xlu0 %2734 }
 0x47d   :  { %v2776_v18 = vmul.f32 0.0051020407, %v2735_v15  ;;  %3091 = vperm.xlu0 %4017, %v3033_v5  }
 0x47e   :  { %v2908_v33 = vsub.f32 1.5, %v2907_v8 }
 0x47f   :  { %v4075_v55 = vpop.eup %4074  ;;  %v2796_v24 = vadd.f32 0.001, %v2776_v18 }
 0x480   :  { %v2915_v27 = vmul.f32 %v4075_v55, %v2795_v61  ;;  %v2909_v11 = vmul.f32 %v4073_v21, %v2908_v33  ;;  %vm2921_vm6 = vweird.f32 %v4075_v55 }
 0x481   :  { %4076 = vrsqrt.f32 %v2796_v24  ;;  %vm2922_vm8 = vmor %vm2920_vm7, %vm2921_vm6  ;;  %vm2930_vm10 = vweird.f32 %v2796_v24 }
 0x482   :  { %v2916_v36 = vmul.f32 %v4075_v55, %v2915_v27  ;;  %v2913_v57 = vsel %vm2912_vm5, %v4073_v21, %v2909_v11 }
 0x483   :  { %v3034_v23 = vmul.f32 %v3014_v62, %v2913_v57  ;;  %v3016_v57 = vld [vmem:[%s7165_s5 + $0x60] sm:$0xff] }
 0x484   :  { %v2917_v60 = vmul.f32 0.5, %v2916_v36  ;;  %v2739_v22 = vpop.xlane.xlu1 %2738 }
 0x485   :  { %v2777_v53 = vmul.f32 0.0051020407, %v2739_v22  ;;  %3096 = vperm.xlu2 %4019, %v3034_v23  }
 0x486   :  { %v2918_v29 = vsub.f32 1.5, %v2917_v60 }
 0x487   :  { %v4077_v30 = vpop.eup %4076  ;;  %v2797_v46 = vadd.f32 0.001, %v2777_v53 }
 0x488   :  { %v2925_v37 = vmul.f32 %v4077_v30, %v2796_v24  ;;  %v2919_v25 = vmul.f32 %v4075_v55, %v2918_v29  ;;  %vm2931_vm9 = vweird.f32 %v4077_v30 }
 0x489   :  { %4078 = vrsqrt.f32 %v2797_v46  ;;  %vm2932_vm11 = vmor %vm2930_vm10, %vm2931_vm9  ;;  %vm2940_vm13 = vweird.f32 %v2797_v46 }
 0x48a   :  { %v2926_v5 = vmul.f32 %v4077_v30, %v2925_v37  ;;  %v2923_v21 = vsel %vm2922_vm8, %v4075_v55, %v2919_v25 }
 0x48b   :  { %v3035_v8 = vmul.f32 %v3015_v42, %v2923_v21  ;;  %v3017_v21 = vld [vmem:[%s7165_s5 + $0x68] sm:$0xff] }
 0x48c   :  { %v2927_v15 = vmul.f32 0.5, %v2926_v5  ;;  %v2743_v18 = vpop.xlane.xlu2 %2742 }
 0x48d   :  { %v2778_v33 = vmul.f32 0.0051020407, %v2743_v18  ;;  %3101 = vperm.xlu1 %4018, %v3035_v8  }
 0x48e   :  { %v2928_v27 = vsub.f32 1.5, %v2927_v15 }
 0x48f   :  { %v4079_v11 = vpop.eup %4078  ;;  %v2798_v62 = vadd.f32 0.001, %v2778_v33 }
 0x490   :  { %v2935_v61 = vmul.f32 %v4079_v11, %v2797_v46  ;;  %v2929_v36 = vmul.f32 %v4077_v30, %v2928_v27  ;;  %vm2941_vm12 = vweird.f32 %v4079_v11 }
 0x491   :  { %4080 = vrsqrt.f32 %v2798_v62  ;;  %vm2942_vm14 = vmor %vm2940_vm13, %vm2941_vm12  ;;  %vm2950_vm1 = vweird.f32 %v2798_v62 }
 0x492   :  { %v2936_v23 = vmul.f32 %v4079_v11, %v2935_v61  ;;  %v2933_v55 = vsel %vm2932_vm11, %v4077_v30, %v2929_v36 }
 0x493   :  { %v3036_v60 = vmul.f32 %v3016_v57, %v2933_v55  ;;  %v3018_v55 = vld [vmem:[%s7165_s5 + $0x70] sm:$0xff] }
 0x494   :  { %v2937_v22 = vmul.f32 0.5, %v2936_v23  ;;  %v2747_v53 = vpop.xlane.xlu0 %2746 }
 0x495   :  { %v2779_v29 = vmul.f32 0.0051020407, %v2747_v53  ;;  %3106 = vperm.xlu0 %4017, %v3036_v60  }
 0x496   :  { %v2938_v37 = vsub.f32 1.5, %v2937_v22 }
 0x497   :  { %v4081_v25 = vpop.eup %4080  ;;  %v2799_v42 = vadd.f32 0.001, %v2779_v29 }
 0x498   :  { %v2945_v24 = vmul.f32 %v4081_v25, %v2798_v62  ;;  %v2939_v5 = vmul.f32 %v4079_v11, %v2938_v37  ;;  %vm2951_vm15 = vweird.f32 %v4081_v25 }
 0x499   :  { %4082 = vrsqrt.f32 %v2799_v42  ;;  %vm2952_vm2 = vmor %vm2950_vm1, %vm2951_vm15  ;;  %vm2960_vm4 = vweird.f32 %v2799_v42 }
 0x49a   :  { %v2946_v8 = vmul.f32 %v4081_v25, %v2945_v24  ;;  %v2943_v30 = vsel %vm2942_vm14, %v4079_v11, %v2939_v5 }
 0x49b   :  { %v3037_v15 = vmul.f32 %v3017_v21, %v2943_v30  ;;  %v3019_v30 = vld [vmem:[%s7165_s5 + $0x78] sm:$0xff] }
 0x49c   :  { %v2947_v18 = vmul.f32 0.5, %v2946_v8  ;;  %v2751_v33 = vpop.xlane.xlu1 %2750 }
 0x49d   :  { %v2780_v27 = vmul.f32 0.0051020407, %v2751_v33  ;;  %3111 = vperm.xlu2 %4019, %v3037_v15  }
 0x49e   :  { %v2948_v61 = vsub.f32 1.5, %v2947_v18 }
 0x49f   :  { %v4083_v36 = vpop.eup %4082  ;;  %v2800_v57 = vadd.f32 0.001, %v2780_v27 }
 0x4a0   :  { %v2955_v46 = vmul.f32 %v4083_v36, %v2799_v42  ;;  %v2949_v23 = vmul.f32 %v4081_v25, %v2948_v61  ;;  %vm2961_vm0 = vweird.f32 %v4083_v36 }
 0x4a1   :  { %4084 = vrsqrt.f32 %v2800_v57  ;;  %vm2962_vm5 = vmor %vm2960_vm4, %vm2961_vm0  ;;  %vm2970_vm7 = vweird.f32 %v2800_v57 }
 0x4a2   :  { %v2956_v60 = vmul.f32 %v4083_v36, %v2955_v46  ;;  %v2953_v11 = vsel %vm2952_vm2, %v4081_v25, %v2949_v23 }
 0x4a3   :  { %v3038_v22 = vmul.f32 %v3018_v55, %v2953_v11 }
 0x4a4   :  { %v2957_v53 = vmul.f32 0.5, %v2956_v60  ;;  %v2755_v29 = vpop.xlane.xlu2 %2754 }
 0x4a5   :  { %v2781_v37 = vmul.f32 0.0051020407, %v2755_v29  ;;  %3116 = vperm.xlu1 %4018, %v3038_v22  }
 0x4a6   :  { %v2958_v24 = vsub.f32 1.5, %v2957_v53 }
 0x4a7   :  { %v4085_v5 = vpop.eup %4084  ;;  %v2801_v21 = vadd.f32 0.001, %v2781_v37  ;;  %v3020_v37 = vld [vmem:[%s7165_s5 + $0x80] sm:$0xff] }
 0x4a8   :  { %v2965_v62 = vmul.f32 %v4085_v5, %v2800_v57  ;;  %v2959_v8 = vmul.f32 %v4083_v36, %v2958_v24  ;;  %vm2971_vm6 = vweird.f32 %v4085_v5 }
 0x4a9   :  { %4086 = vrsqrt.f32 %v2801_v21  ;;  %vm2972_vm8 = vmor %vm2970_vm7, %vm2971_vm6  ;;  %vm2980_vm10 = vweird.f32 %v2801_v21 }
 0x4aa   :  { %v2966_v15 = vmul.f32 %v4085_v5, %v2965_v62  ;;  %v2963_v25 = vsel %vm2962_vm5, %v4083_v36, %v2959_v8 }
 0x4ab   :  { %v3039_v18 = vmul.f32 %v3019_v30, %v2963_v25 }
 0x4ac   :  { %v2967_v33 = vmul.f32 0.5, %v2966_v15  ;;  %v3047_v27 = vpop.permute.xlu2 %3046  ;;  %v2759_v61 = vpop.xlane.xlu0 %2758 }
 0x4ad   :  { %v3144_v46 = vmul.f32 %v3047_v27, %v6577_v4  ;;  %v3145_v23 = vmul.f32 %v3047_v27, %v6580_v1  ;;  %v2782_v55 = vmul.f32 0.0051020407, %v2759_v61  ;;  %3121 = vperm.xlu0 %4017, %v3039_v18  }
 0x4ae   :  { %v2968_v42 = vsub.f32 1.5, %v2967_v33 }
 0x4af   :  { %v4087_v60 = vpop.eup %4086  ;;  %v3304_v11 = vadd.f32 %v6513_v59, %v3144_v46  ;;  %v3305_v22 = vadd.f32 %v6513_v59, %v3145_v23  ;;  %v2802_v53 = vadd.f32 0.001, %v2782_v55  ;;  %v3021_v23 = vld [vmem:[%s7165_s5 + $0x88] sm:$0xff] }
 0x4b0   :  { %v2975_v36 = vmul.f32 %v4087_v60, %v2801_v21  ;;  %v2969_v29 = vmul.f32 %v4085_v5, %v2968_v42  ;;  %vm2981_vm9 = vweird.f32 %v4087_v60 }
 0x4b1   :  { %3344 = vst [vmem:[%s7166_s7] sm:$0xff] %v3304_v11  ;;  %4088 = vrsqrt.f32 %v2802_v53  ;;  %vm2982_vm11 = vmor %vm2980_vm10, %vm2981_vm9  ;;  %vm2990_vm13 = vweird.f32 %v2802_v53 }
 0x4b2   :  { %v2976_v4 = vmul.f32 %v4087_v60, %v2975_v36  ;;  %3345 = vst.msk [vmem:[%s7166_s7 + $0x8] sm:$0xff] %vm2503_vm3, %v3305_v22  ;;  %v2973_v59 = vsel %vm2972_vm8, %v4085_v5, %v2969_v29 }
 0x4b3   :  { %v3040_v1 = vmul.f32 %v3020_v37, %v2973_v59 }
 0x4b4   :  { %v2977_v57 = vmul.f32 0.5, %v2976_v4  ;;  %v2763_v24 = vpop.xlane.xlu1 %2762  ;;  %v3067_v62 = vpop.permute.xlu2 %3066  ;;  %v3022_v4 = vld [vmem:[%s7165_s5 + $0x90] sm:$0xff] }
 0x4b5   :  { %v2783_v8 = vmul.f32 0.0051020407, %v2763_v24  ;;  %v3152_v30 = vmul.f32 %v3067_v62, %v6646_v17  ;;  %v3153_v15 = vmul.f32 %v3067_v62, %v6649_v45  ;;  %3126 = vperm.xlu2 %4019, %v3040_v1  }
 0x4b6   :  { %v2978_v25 = vsub.f32 1.5, %v2977_v57  ;;  %v3202_v57 = vld [vmem:[%s7160_s6 + $0x90] sm:$0xff] }
 0x4b7   :  { %v4089_v18 = vpop.eup %4088  ;;  %v2803_v33 = vadd.f32 0.001, %v2783_v8  ;;  %v3312_v27 = vadd.f32 %v6515_v16, %v3152_v30  ;;  %v3313_v61 = vadd.f32 %v6515_v16, %v3153_v15 }
 0x4b8   :  { %v2985_v5 = vmul.f32 %v4089_v18, %v2802_v53  ;;  %v2979_v46 = vmul.f32 %v4087_v60, %v2978_v25  ;;  %vm2991_vm12 = vweird.f32 %v4089_v18 }
 0x4b9   :  { %4090 = vrsqrt.f32 %v2803_v33  ;;  %3352 = vst [vmem:[%s7166_s7 + $0x40] sm:$0xff] %v3312_v27  ;;  %vm2992_vm14 = vmor %vm2990_vm13, %vm2991_vm12  ;;  %vm3000_vm1 = vweird.f32 %v2803_v33  ;;  %v3023_v27 = vld [vmem:[%s7165_s5 + $0x98] sm:$0xff] }
 0x4ba   :  { %v2986_v17 = vmul.f32 %v4089_v18, %v2985_v5  ;;  %3353 = vst.msk [vmem:[%s7166_s7 + $0x48] sm:$0xff] %vm2503_vm3, %v3313_v61  ;;  %v2983_v16 = vsel %vm2982_vm11, %v4087_v60, %v2979_v46 }
 0x4bb   :  { %v3041_v45 = vmul.f32 %v3021_v23, %v2983_v16 }
 0x4bc   :  { %v2987_v21 = vmul.f32 0.5, %v2986_v17 }
 0x4bd   :  { %3131 = vperm.xlu1 %4018, %v3041_v45  }
 0x4be   :  { %v2988_v55 = vsub.f32 1.5, %v2987_v21 }
 0x4bf   :  { %v4091_v42 = vpop.eup %4090  ;;  %v3052_v11 = vpop.permute.xlu0 %3051 }
 0x4c0   :  { %v2995_v22 = vmul.f32 %v4091_v42, %v2803_v33  ;;  %v3146_v36 = vmul.f32 %v3052_v11, %v6596_v49  ;;  %v3147_v29 = vmul.f32 %v3052_v11, %v6599_v2  ;;  %v2989_v37 = vmul.f32 %v4089_v18, %v2988_v55 }
 0x4c1   :  { %vm3001_vm15 = vweird.f32 %v4091_v42 }
 0x4c2   :  { %v2996_v60 = vmul.f32 %v4091_v42, %v2995_v22  ;;  %v3306_v59 = vadd.f32 %v6503_v20, %v3146_v36  ;;  %v3307_v1 = vadd.f32 %v6503_v20, %v3147_v29  ;;  %v2993_v24 = vsel %vm2992_vm14, %v4089_v18, %v2989_v37  ;;  %vm3002_vm2 = vmor %vm3000_vm1, %vm3001_vm15  ;;  %v7398_v22 = vld [vmem:[#allocation3_spill] sm:$0xff] }
 0x4c3   :  { %v3042_v2 = vmul.f32 %v3022_v4, %v2993_v24  ;;  %v7399_v4 = vld [vmem:[#allocation2_spill] sm:$0xff] }
 0x4c4   :  { %v2997_v49 = vmul.f32 0.5, %v2996_v60  ;;  %3346 = vst [vmem:[%s7166_s7 + $0x10] sm:$0xff] %v3306_v59 }
 0x4c5   :  { %3347 = vst.msk [vmem:[%s7166_s7 + $0x18] sm:$0xff] %vm2503_vm3, %v3307_v1  ;;  %3296 = vperm.xlu1 %4018, %v3202_v57   ;;  %3136 = vperm.xlu0 %4017, %v3042_v2   ;;  %v7400_v57 = vld [vmem:[#allocation49_spill] sm:$0xff] }
 0x4c6   :  { %v2998_v53 = vsub.f32 1.5, %v2997_v49 }
 0x4c7   :  { %v3082_v20 = vpop.permute.xlu2 %3081  ;;  %v3062_v62 = vpop.permute.xlu0 %3061 }
 0x4c8   :  { %v3158_v8 = vmul.f32 %v3082_v20, %v6680_v28  ;;  %v3159_v30 = vmul.f32 %v3082_v20, %v6683_v38  ;;  %v3150_v15 = vmul.f32 %v3062_v62, %v6630_v58  ;;  %v3151_v25 = vmul.f32 %v3062_v62, %v6633_v41  ;;  %v3203_v58 = vld [vmem:[%s7160_s6 + $0x98] sm:$0xff] }
 0x4c9   :  { %v2999_v18 = vmul.f32 %v4091_v42, %v2998_v53  ;;  %v7401_v53 = vld [vmem:[#allocation5_spill] sm:$0xff] }
 0x4ca   :  { %v3318_v61 = vadd.f32 %v6530_v39, %v3158_v8  ;;  %v3319_v5 = vadd.f32 %v6530_v39, %v3159_v30  ;;  %v3310_v46 = vadd.f32 %v6525_v47, %v3150_v15  ;;  %v3311_v28 = vadd.f32 %v6525_v47, %v3151_v25  ;;  %v7402_v30 = vld [vmem:[#allocation4_spill] sm:$0xff] }
 0x4cb   :  { %v3003_v38 = vsel %vm3002_vm2, %v4091_v42, %v2999_v18 }
 0x4cc   :  { %3358 = vst [vmem:[%s7166_s7 + $0x70] sm:$0xff] %v3318_v61  ;;  %v3057_v41 = vpop.permute.xlu1 %3056  ;;  %v3043_v33 = vmul.f32 %v3023_v27, %v3003_v38 }
 0x4cd   :  { %3359 = vst.msk [vmem:[%s7166_s7 + $0x78] sm:$0xff] %vm2503_vm3, %v3319_v5  ;;  %v3148_v39 = vmul.f32 %v3057_v41, %v6613_v34  ;;  %v3149_v47 = vmul.f32 %v3057_v41, %v6616_v26  ;;  %3301 = vperm.xlu0 %4017, %v3203_v58   ;;  %v3201_v34 = vld [vmem:[%s7160_s6 + $0x88] sm:$0xff]  ;;  %v7404_v58 = vld [vmem:[#allocation54_spill] sm:$0xff] }
 0x4ce   :  { %3350 = vst [vmem:[%s7166_s7 + $0x30] sm:$0xff] %v3310_v46  ;;  %3141 = vperm.xlu2 %4019, %v3043_v33   ;;  %v7403_v46 = vld [vmem:[#allocation7_spill] sm:$0xff]  ;;  %v7405_v41 = vld [vmem:[#allocation6_spill] sm:$0xff] }
 0x4cf   :  { %3351 = vst.msk [vmem:[%s7166_s7 + $0x38] sm:$0xff] %vm2503_vm3, %v3311_v28  ;;  %v3308_v23 = vadd.f32 %v6505_v12, %v3148_v39  ;;  %v3309_v17 = vadd.f32 %v6505_v12, %v3149_v47  ;;  %v7406_v47 = vld [vmem:[#allocation9_spill] sm:$0xff] }
 0x4d1   :  { %3348 = vst [vmem:[%s7166_s7 + $0x20] sm:$0xff] %v3308_v23 }
 0x4d2   :  { %3349 = vst.msk [vmem:[%s7166_s7 + $0x28] sm:$0xff] %vm2503_vm3, %v3309_v17  ;;  %v7407_v17 = vld [vmem:[#allocation10_spill] sm:$0xff] }
 0x4d4   :  { %v3072_v26 = vpop.permute.xlu1 %3071 }
 0x4d5   :  { %v3154_v16 = vmul.f32 %v3072_v26, %v6658_v9  ;;  %v3155_v45 = vmul.f32 %v3072_v26, %v6661_v19 }
 0x4d6   :  { %3291 = vperm.xlu2 %4019, %v3201_v34   ;;  %v7408_v34 = vld [vmem:[#allocation8_spill] sm:$0xff] }
 0x4d7   :  { %v3314_v12 = vadd.f32 %v6520_v51, %v3154_v16  ;;  %v3315_v21 = vadd.f32 %v6520_v51, %v3155_v45  ;;  %v3077_v55 = vpop.permute.xlu0 %3076 }
 0x4d8   :  { %v3156_v42 = vmul.f32 %v3077_v55, %v6669_v63  ;;  %v3157_v11 = vmul.f32 %v3077_v55, %v6672_v44 }
 0x4d9   :  { %3354 = vst [vmem:[%s7166_s7 + $0x50] sm:$0xff] %v3314_v12 }
 0x4da   :  { %3355 = vst.msk [vmem:[%s7166_s7 + $0x58] sm:$0xff] %vm2503_vm3, %v3315_v21  ;;  %v3316_v9 = vadd.f32 %v6540_v13, %v3156_v42  ;;  %v3317_v19 = vadd.f32 %v6540_v13, %v3157_v11  ;;  %v7409_v21 = vld [vmem:[#allocation11_spill] sm:$0xff]  ;;  %v7410_v42 = vld [vmem:[#allocation12_spill] sm:$0xff] }
 0x4dc   :  { %3356 = vst [vmem:[%s7166_s7 + $0x60] sm:$0xff] %v3316_v9 }
 0x4dd   :  { %3357 = vst.msk [vmem:[%s7166_s7 + $0x68] sm:$0xff] %vm2503_vm3, %v3317_v19 }
 0x4df   :  { %v3097_v51 = vpop.permute.xlu2 %3096 }
 0x4e0   :  { %v3164_v63 = vmul.f32 %v3097_v51, %v6713_v48  ;;  %v3165_v44 = vmul.f32 %v3097_v51, %v6716_v52 }
 0x4e2   :  { %v3324_v36 = vadd.f32 %v7398_v22, %v3164_v63  ;;  %v3325_v29 = vadd.f32 %v7398_v22, %v3165_v44  ;;  %v7411_v44 = vld [vmem:[#allocation13_spill] sm:$0xff] }
 0x4e4   :  { %3364 = vst [vmem:[%s7166_s7 + $0xa0] sm:$0xff] %v3324_v36  ;;  %v7412_v36 = vld [vmem:[#allocation14_spill] sm:$0xff] }
 0x4e5   :  { %3365 = vst.msk [vmem:[%s7166_s7 + $0xa8] sm:$0xff] %vm2503_vm3, %v3325_v29 }
 0x4e7   :  { %v3087_v13 = vpop.permute.xlu1 %3086 }
 0x4e8   :  { %v3160_v37 = vmul.f32 %v3087_v13, %v6691_v50  ;;  %v3161_v48 = vmul.f32 %v3087_v13, %v6694_v3 }
 0x4ea   :  { %v3320_v52 = vadd.f32 %v7399_v4, %v3160_v37  ;;  %v3321_v60 = vadd.f32 %v7399_v4, %v3161_v48  ;;  %v7413_v4 = vld [vmem:[#allocation15_spill] sm:$0xff] }
 0x4ec   :  { %3360 = vst [vmem:[%s7166_s7 + $0x80] sm:$0xff] %v3320_v52 }
 0x4ed   :  { %3361 = vst.msk [vmem:[%s7166_s7 + $0x88] sm:$0xff] %vm2503_vm3, %v3321_v60  ;;  %v7414_v60 = vld [vmem:[#allocation16_spill] sm:$0xff] }
 0x4ef   :  { %v3092_v59 = vpop.permute.xlu0 %3091 }
 0x4f0   :  { %v3162_v1 = vmul.f32 %v3092_v59, %v6702_v43  ;;  %v3163_v50 = vmul.f32 %v3092_v59, %v6705_v0 }
 0x4f2   :  { %v3322_v3 = vadd.f32 %v7400_v57, %v3162_v1  ;;  %v3323_v24 = vadd.f32 %v7400_v57, %v3163_v50 }
 0x4f4   :  { %3362 = vst [vmem:[%s7166_s7 + $0x90] sm:$0xff] %v3322_v3 }
 0x4f5   :  { %3363 = vst.msk [vmem:[%s7166_s7 + $0x98] sm:$0xff] %vm2503_vm3, %v3323_v24 }
 0x4f7   :  { %v3112_v49 = vpop.permute.xlu2 %3111 }
 0x4f8   :  { %v3170_v2 = vmul.f32 %v3112_v49, %v6746_v56  ;;  %v3171_v43 = vmul.f32 %v3112_v49, %v6749_v6 }
 0x4fa   :  { %v3330_v0 = vadd.f32 %v7401_v53, %v3170_v2  ;;  %v3331_v20 = vadd.f32 %v7401_v53, %v3171_v43 }
 0x4fc   :  { %3370 = vst [vmem:[%s7166_s7 + $0xd0] sm:$0xff] %v3330_v0 }
 0x4fd   :  { %3371 = vst.msk [vmem:[%s7166_s7 + $0xd8] sm:$0xff] %vm2503_vm3, %v3331_v20 }
 0x4ff   :  { %v3102_v62 = vpop.permute.xlu1 %3101 }
 0x500   :  { %v3166_v8 = vmul.f32 %v3102_v62, %v6724_v32  ;;  %v3167_v56 = vmul.f32 %v3102_v62, %v6727_v14 }
 0x502   :  { %v3326_v6 = vadd.f32 %v7402_v30, %v3166_v8  ;;  %v3327_v15 = vadd.f32 %v7402_v30, %v3167_v56 }
 0x504   :  { %3366 = vst [vmem:[%s7166_s7 + $0xb0] sm:$0xff] %v3326_v6 }
 0x505   :  { %3367 = vst.msk [vmem:[%s7166_s7 + $0xb8] sm:$0xff] %vm2503_vm3, %v3327_v15 }
 0x507   :  { %v3107_v25 = vpop.permute.xlu0 %3106 }
 0x508   :  { %v3168_v18 = vmul.f32 %v3107_v25, %v6735_v40  ;;  %v3169_v32 = vmul.f32 %v3107_v25, %v6738_v54 }
 0x50a   :  { %v3328_v14 = vadd.f32 %v6567_v35, %v3168_v18  ;;  %v3329_v27 = vadd.f32 %v6567_v35, %v3169_v32 }
 0x50c   :  { %3368 = vst [vmem:[%s7166_s7 + $0xc0] sm:$0xff] %v3328_v14 }
 0x50d   :  { %3369 = vst.msk [vmem:[%s7166_s7 + $0xc8] sm:$0xff] %vm2503_vm3, %v3329_v27 }
 0x50f   :  { %v3127_v61 = vpop.permute.xlu2 %3126 }
 0x510   :  { %v3176_v5 = vmul.f32 %v3127_v61, %v6781_v10  ;;  %v3177_v40 = vmul.f32 %v3127_v61, %v6784_v7 }
 0x512   :  { %v3336_v54 = vadd.f32 %v7403_v46, %v3176_v5  ;;  %v3337_v28 = vadd.f32 %v7403_v46, %v3177_v40 }
 0x514   :  { %3376 = vst [vmem:[%s7166_s7 + $0x100] sm:$0xff] %v3336_v54 }
 0x515   :  { %3377 = vst.msk [vmem:[%s7166_s7 + $0x108] sm:$0xff] %vm2503_vm3, %v3337_v28 }
 0x517   :  { %v3117_v35 = vpop.permute.xlu1 %3116 }
 0x518   :  { %v3172_v38 = vmul.f32 %v3117_v35, %v6757_v31  ;;  %v3173_v10 = vmul.f32 %v3117_v35, %v7404_v58 }
 0x51a   :  { %v3332_v7 = vadd.f32 %v7405_v41, %v3172_v38  ;;  %v3333_v33 = vadd.f32 %v7405_v41, %v3173_v10 }
 0x51c   :  { %3372 = vst [vmem:[%s7166_s7 + $0xe0] sm:$0xff] %v3332_v7 }
 0x51d   :  { %3373 = vst.msk [vmem:[%s7166_s7 + $0xe8] sm:$0xff] %vm2503_vm3, %v3333_v33 }
 0x51f   :  { %v3122_v39 = vpop.permute.xlu0 %3121 }
 0x520   :  { %v3174_v23 = vmul.f32 %v3122_v39, %v7406_v47  ;;  %v3175_v31 = vmul.f32 %v3122_v39, %v7407_v17 }
 0x522   :  { %v3334_v26 = vadd.f32 %v7408_v34, %v3174_v23  ;;  %v3335_v16 = vadd.f32 %v7408_v34, %v3175_v31 }
 0x524   :  { %3374 = vst [vmem:[%s7166_s7 + $0xf0] sm:$0xff] %v3334_v26 }
 0x525   :  { %3375 = vst.msk [vmem:[%s7166_s7 + $0xf8] sm:$0xff] %vm2503_vm3, %v3335_v16 }
 0x528   :  { %v3142_v45 = vpop.permute.xlu2 %3141 }
 0x529   :  { %v3182_v52 = vmul.f32 %v3142_v45, %v7413_v4  ;;  %v3183_v59 = vmul.f32 %v3142_v45, %v7414_v60 }
 0x52f   :  { %v3132_v12 = vpop.permute.xlu1 %3131 }
 0x530   :  { %v3178_v55 = vmul.f32 %v3132_v12, %v7409_v21  ;;  %v3179_v11 = vmul.f32 %v3132_v12, %v7410_v42  ;;  %v3292_v9 = vpop.permute.xlu2 %3291 }
 0x532   :  { %v3338_v19 = vadd.f32 %v3292_v9, %v3178_v55  ;;  %v3339_v51 = vadd.f32 %v3292_v9, %v3179_v11 }
 0x534   :  { %3378 = vst [vmem:[%s7166_s7 + $0x110] sm:$0xff] %v3338_v19 }
 0x535   :  { %3379 = vst.msk [vmem:[%s7166_s7 + $0x118] sm:$0xff] %vm2503_vm3, %v3339_v51 }
 0x537   :  { %v3137_v63 = vpop.permute.xlu0 %3136  ;;  %v3297_v13 = vpop.permute.xlu1 %3296 }
 0x538   :  { %v3180_v22 = vmul.f32 %v3137_v63, %v7411_v44  ;;  %v3181_v29 = vmul.f32 %v3137_v63, %v7412_v36 }
 0x53a   :  { %v3340_v37 = vadd.f32 %v3297_v13, %v3180_v22  ;;  %v3341_v48 = vadd.f32 %v3297_v13, %v3181_v29 }
 0x53c   :  { %3380 = vst [vmem:[%s7166_s7 + $0x120] sm:$0xff] %v3340_v37 }
 0x53d   :  { %3381 = vst.msk [vmem:[%s7166_s7 + $0x128] sm:$0xff] %vm2503_vm3, %v3341_v48 }
 0x53f   :  { %v3302_v1 = vpop.permute.xlu0 %3301 }
 0x540   :  { %v3342_v50 = vadd.f32 %v3302_v1, %v3182_v52  ;;  %v3343_v57 = vadd.f32 %v3302_v1, %v3183_v59 }
 0x542   :  { %3382 = vst [vmem:[%s7166_s7 + $0x130] sm:$0xff] %v3342_v50 }
 0x543   :  { %3383 = vst.msk [vmem:[%s7166_s7 + $0x138] sm:$0xff] %vm2503_vm3, %v3343_v57 }

</bundles_post_ra>
